<compile_context>
chip_gen: v7x
topology: tpu7x:2x2x1
jax: 0.10.0
libtpu: 0.0.40
codegen_flags: <defaults>
</compile_context>

<pallas_src>
import functools

import jax
import jax.numpy as jnp
from jax import lax
from jax.experimental import pallas as pl
from jax.experimental.pallas import tpu as pltpu

EPS = 1e-5
VMEM = pl.BlockSpec(memory_space=pltpu.MemorySpace.VMEM)


# --------------------------------------------------------------------------
# In-kernel helpers
# --------------------------------------------------------------------------
def _bn_act(acc, gamma, beta, m, relu, residual=None):
    """Training-mode BatchNorm in f32 (batch mean, biased variance, eps=1e-5).

    Single pass over the conv accumulator: sum and sum-of-squares together
    (axis-0 reduction runs on the XLU, which is otherwise idle here).
    """
    s1 = jnp.sum(acc, axis=0, keepdims=True)
    s2 = jnp.sum(acc * acc, axis=0, keepdims=True)
    mean = s1 * (1.0 / m)
    var = jnp.maximum(s2 * (1.0 / m) - mean * mean, 0.0)
    y = (acc - mean) * lax.rsqrt(var + EPS) * gamma + beta
    if residual is not None:
        y = y + residual
    if relu:
        y = jnp.maximum(y, 0.0)
    return y


# --------------------------------------------------------------------------
# Kernel bodies (each one = one fused pipeline stage, whole operands in VMEM)
# --------------------------------------------------------------------------
def _stem_kernel(x_ref, w_ref, g_ref, b_ref, o_ref, *, n, ho, wo, qk):
    """Stem: 7x7/2 conv + BN + ReLU, fully fused.

    The stride-2 conv is computed as a stride-1 tap loop over the
    space-to-depth input (prepared once in the wrapper, no duplication):
    x_ref (N, Hs, Ws, 4*Cin) f32, w_ref (qk*qk, 4*Cin, Cout) bf16.
    """
    x = x_ref[...]                                    # f32, slices stay f32
    m = n * ho * wo
    cout = w_ref.shape[-1]
    acc = jnp.zeros((m, cout), jnp.float32)
    for qi in range(qk):
        for qj in range(qk):
            win = x[:, qi:qi + ho, qj:qj + wo, :].reshape(m, -1)
            acc = acc + jnp.dot(win.astype(jnp.bfloat16),
                                w_ref[qi * qk + qj],
                                preferred_element_type=jnp.float32)
    o_ref[...] = _bn_act(acc, g_ref[...], b_ref[...], m, relu=True)


def _basic_block_kernel(xp_ref, w1_ref, g1_ref, b1_ref, w2_ref, g2_ref, b2_ref,
                        o_ref, y1p_ref, *, n, h, w, k):
    """ResidualBlock(8, stride 1, identity shortcut), fully fused:
       conv1(3x3) -> BN1 -> ReLU -> conv2(3x3) -> BN2 -> +x -> ReLU.

    xp_ref: zero-padded block input (N, H+2, W+2, C) f32.  The conv1 output is
    staged inside a zero "frame" in the VMEM scratch y1p_ref so conv2's padding
    is free and never round-trips through HBM; all scratch stores are kept
    sublane-aligned (data column offset 8).
    """
    pad = k // 2                      # 1
    woff = 8                          # sublane-aligned data column offset
    m = n * h * w
    c = w1_ref.shape[-1]

    xp = xp_ref[...]                                  # (n, h+2, w+2, c) f32

    # ---- conv1 + BN1 + ReLU (tap loop, no im2col) ----
    acc = jnp.zeros((m, c), jnp.float32)
    for i in range(k):
        for j in range(k):
            win = xp[:, i:i + h, j:j + w, :].reshape(m, -1)
            acc = acc + jnp.dot(win.astype(jnp.bfloat16), w1_ref[i * k + j],
                                preferred_element_type=jnp.float32)
    y1 = _bn_act(acc, g1_ref[...], b1_ref[...], m, relu=True)      # (m, c)

    # ---- stage y1 inside the zeroed VMEM frame (aligned row stores) ----
    y1p_ref[...] = jnp.zeros_like(y1p_ref)
    for nn in range(n):
        for a in range(h):
            r0 = (nn * h + a) * w
            y1p_ref[nn, pad + a, woff:woff + w, :] = y1[r0:r0 + w, :]
    y1p = y1p_ref[...]                                # (n, h+2, w+16, c) f32

    # ---- conv2 + BN2 + identity residual + ReLU ----
    acc2 = jnp.zeros((m, c), jnp.float32)
    for i in range(k):
        for j in range(k):
            c0 = woff - pad + j
            win = y1p[:, i:i + h, c0:c0 + w, :].reshape(m, -1)
            acc2 = acc2 + jnp.dot(win.astype(jnp.bfloat16), w2_ref[i * k + j],
                                  preferred_element_type=jnp.float32)
    shortcut = xp[:, pad:pad + h, pad:pad + w, :].reshape(m, c)    # identity
    o_ref[...] = _bn_act(acc2, g2_ref[...], b2_ref[...], m, relu=True,
                         residual=shortcut)


def _conv1x1_bn_relu_kernel(x_ref, w_ref, g_ref, b_ref, o_ref):
    """Bottleneck conv1 (1x1) + BN1 + ReLU, fused (pure 2D)."""
    acc = jnp.dot(x_ref[...].astype(jnp.bfloat16), w_ref[...],
                  preferred_element_type=jnp.float32)
    o_ref[...] = _bn_act(acc, g_ref[...], b_ref[...], x_ref.shape[0], relu=True)


def _bneck_tail_head_kernel(p2_ref, w2_ref, g2_ref, b2_ref,
                            w3_ref, g3_ref, b3_ref,
                            xs_ref, ws_ref, pool_ref, fcw_ref, fcb_ref, o_ref):
    """Bottleneck tail + classifier head, fused (only the logits reach HBM):
       conv2(3x3/2, wrapper patches) -> BN2 -> ReLU -> conv3(1x1) -> BN3
       -> + conv_stem(1x1/2) shortcut -> ReLU -> global avg pool -> Linear.
    """
    m = p2_ref.shape[0]                               # N * Ho * Wo
    a2 = jnp.dot(p2_ref[...].astype(jnp.bfloat16), w2_ref[...],
                 preferred_element_type=jnp.float32)
    y2 = _bn_act(a2, g2_ref[...], b2_ref[...], m, relu=True)

    a3 = jnp.dot(y2.astype(jnp.bfloat16), w3_ref[...],
                 preferred_element_type=jnp.float32)
    # PyTorch conv_stem has no BN / ReLU before the residual add.
    sc = jnp.dot(xs_ref[...].astype(jnp.bfloat16), ws_ref[...],
                 preferred_element_type=jnp.float32)
    out = _bn_act(a3, g3_ref[...], b3_ref[...], m, relu=True, residual=sc)

    # AdaptiveAvgPool2d(1) as a matmul; pool_ref already carries 1/(Ho*Wo).
    pooled = jnp.dot(pool_ref[...], out.astype(jnp.bfloat16),
                     preferred_element_type=jnp.float32)          # (N, C)
    o_ref[...] = jnp.dot(pooled.astype(jnp.bfloat16), fcw_ref[...],
                         preferred_element_type=jnp.float32) + fcb_ref[...]


# --------------------------------------------------------------------------
# Wrapper-side (plain JAX) layout prep: no data duplication except the tiny
# patch matrix of the bottleneck's stride-2 conv.
# --------------------------------------------------------------------------
def _cost(flops, *arrays):
    nbytes = sum(int(a.size) * a.dtype.itemsize for a in arrays)
    return pl.CostEstimate(flops=int(flops), transcendentals=0,
                           bytes_accessed=int(nbytes))


def space_to_depth2(x):
    """(N, H, W, C) with even H, W -> (N, H/2, W/2, 4C); phase order
    (0,0),(0,1),(1,0),(1,1) along channels."""
    phases = [x[:, ri::2, rj::2, :] for ri in (0, 1) for rj in (0, 1)]
    return jnp.concatenate(phases, axis=-1)


def stride2_weight(w):
    """(kh, kw, cin, cout) stride-2 conv weight -> (qk*qk, 4*cin, cout) so the
    conv becomes a stride-1 tap loop over the space-to-depth input."""
    kh, kw, cin, cout = w.shape
    qk = (kh + 1) // 2
    weff = jnp.zeros((qk, qk, 4, cin, cout), w.dtype)
    for ri in (0, 1):
        for rj in (0, 1):
            sub = w[ri::2, rj::2]
            weff = weff.at[:sub.shape[0], :sub.shape[1], 2 * ri + rj].set(sub)
    return weff.reshape(qk * qk, 4 * cin, cout)


def im2col(x, kh, kw, stride, pad):
    """Patch matrix; only used for the bottleneck's 3x3/2 conv (4.6 KB here)."""
    n, h, w, c = x.shape
    xp = jnp.pad(x, ((0, 0), (pad, pad), (pad, pad), (0, 0)))
    ho = (h + 2 * pad - kh) // stride + 1
    wo = (w + 2 * pad - kw) // stride + 1
    cols = [xp[:, i:i + (ho - 1) * stride + 1:stride,
                  j:j + (wo - 1) * stride + 1:stride, :]
            for i in range(kh) for j in range(kw)]
    p = jnp.stack(cols, axis=3)                       # (n, ho, wo, kh*kw, c)
    return p.reshape(n * ho * wo, kh * kw * c), ho, wo


# --------------------------------------------------------------------------
# Deterministic synthetic parameters (no checkpoint loading)
# --------------------------------------------------------------------------
def build_params(key):
    ks = iter(jax.random.split(key, 32))

    def conv_w(kh, kw, cin, cout):
        return 0.1 * jax.random.normal(next(ks), (kh, kw, cin, cout),
                                       jnp.float32)

    def bn(c):
        g = 1.0 + 0.1 * jax.random.normal(next(ks), (1, c), jnp.float32)
        b = 0.1 * jax.random.normal(next(ks), (1, c), jnp.float32)
        return g, b

    p = {}
    p['stem_w'] = conv_w(7, 7, 3, 8);   p['stem_bn'] = bn(8)
    p['b1_w1'] = conv_w(3, 3, 8, 8);    p['b1_bn1'] = bn(8)
    p['b1_w2'] = conv_w(3, 3, 8, 8);    p['b1_bn2'] = bn(8)
    p['b2_w1'] = conv_w(1, 1, 8, 4);    p['b2_bn1'] = bn(4)
    p['b2_w2'] = conv_w(3, 3, 4, 4);    p['b2_bn2'] = bn(4)
    p['b2_w3'] = conv_w(1, 1, 4, 16);   p['b2_bn3'] = bn(16)
    p['b2_ws'] = conv_w(1, 1, 8, 16)
    p['fc_w'] = 0.1 * jax.random.normal(next(ks), (16, 10), jnp.float32)
    p['fc_b'] = 0.1 * jax.random.normal(next(ks), (1, 10), jnp.float32)
    return p


# --------------------------------------------------------------------------
# Full forward: 4 fused pallas_calls
# --------------------------------------------------------------------------
@jax.jit
def resnet_forward(params, x_nchw):
    """x_nchw: (N, 3, 16, 16) f32 -> logits (N, 10)."""
    bf = jnp.bfloat16
    x = jnp.transpose(x_nchw, (0, 2, 3, 1)).astype(jnp.float32)   # NHWC
    n, hin, win_, _ = x.shape

    # ---- stage 1: stem 7x7/2 conv + BN + ReLU ----------------------------
    xs2d = space_to_depth2(jnp.pad(x, ((0, 0), (3, 3), (3, 3), (0, 0))))
    w_stem = stride2_weight(params['stem_w']).astype(bf)          # (16, 12, 8)
    ho = (hin + 2 * 3 - 7) // 2 + 1
    wo = (win_ + 2 * 3 - 7) // 2 + 1
    m0 = n * ho * wo
    g0, b0 = params['stem_bn']
    y = pl.pallas_call(
        functools.partial(_stem_kernel, n=n, ho=ho, wo=wo, qk=4),
        out_shape=jax.ShapeDtypeStruct((m0, 8), jnp.float32),
        in_specs=[VMEM] * 4, out_specs=VMEM,
        cost_estimate=_cost(2 * m0 * 12 * 8 * 16, xs2d, w_stem),
    )(xs2d, w_stem, g0, b0)
    x1 = y.reshape(n, ho, wo, 8)

    # ---- stage 2: basic residual block (fully fused) ----------------------
    h1, w1 = x1.shape[1], x1.shape[2]
    m1 = n * h1 * w1
    xp = jnp.pad(x1, ((0, 0), (1, 1), (1, 1), (0, 0)))
    w11 = params['b1_w1'].reshape(9, 8, 8).astype(bf)
    w12 = params['b1_w2'].reshape(9, 8, 8).astype(bf)
    g11, b11 = params['b1_bn1']
    g12, b12 = params['b1_bn2']
    x2 = pl.pallas_call(
        functools.partial(_basic_block_kernel, n=n, h=h1, w=w1, k=3),
        out_shape=jax.ShapeDtypeStruct((m1, 8), jnp.float32),
        in_specs=[VMEM] * 7, out_specs=VMEM,
        scratch_shapes=[pltpu.VMEM((n, h1 + 2, w1 + 16, 8), jnp.float32)],
        cost_estimate=_cost(2 * 2 * m1 * 9 * 8 * 8, xp, w11, w12),
    )(xp, w11, g11, b11, w12, g12, b12)
    x2_4d = x2.reshape(n, h1, w1, 8)

    # ---- stage 3: bottleneck conv1 (1x1) + BN1 + ReLU ----------------------
    w21 = params['b2_w1'].reshape(8, 4).astype(bf)
    g21, b21 = params['b2_bn1']
    y1 = pl.pallas_call(
        _conv1x1_bn_relu_kernel,
        out_shape=jax.ShapeDtypeStruct((m1, 4), jnp.float32),
        in_specs=[VMEM] * 4, out_specs=VMEM,
        cost_estimate=_cost(2 * m1 * 8 * 4, x2, w21),
    )(x2, w21, g21, b21)

    # ---- stage 4: bottleneck tail + classifier head (fused) ----------------
    patches, ho2, wo2 = im2col(y1.reshape(n, h1, w1, 4), 3, 3, 2, 1)
    m2 = n * ho2 * wo2
    w22 = params['b2_w2'].reshape(36, 4).astype(bf)
    g22, b22 = params['b2_bn2']
    w23 = params['b2_w3'].reshape(4, 16).astype(bf)
    g23, b23 = params['b2_bn3']
    ws = params['b2_ws'].reshape(8, 16).astype(bf)
    xs = x2_4d[:, ::2, ::2, :].reshape(m2, 8)                     # 1x1/2 taps
    pool = (jnp.repeat(jnp.eye(n, dtype=jnp.float32), ho2 * wo2, axis=1)
            / (ho2 * wo2)).astype(bf)                             # (N, m2)
    fcw = params['fc_w'].astype(bf)
    fcb = params['fc_b']
    logits = pl.pallas_call(
        _bneck_tail_head_kernel,
        out_shape=jax.ShapeDtypeStruct((n, 10), jnp.float32),
        in_specs=[VMEM] * 12, out_specs=VMEM,
        cost_estimate=_cost(2 * m2 * (36 * 4 + 4 * 16 + 8 * 16)
                            + 2 * n * m2 * 16 + 2 * n * 16 * 10,
                            patches, xs, w22, w23, ws, pool, fcw),
    )(patches, w22, g22, b22, w23, g23, b23, xs, ws, pool, fcw, fcb)
    return logits


# --------------------------------------------------------------------------
if __name__ == "__main__":
    key = jax.random.PRNGKey(0)
    k_params, k_input = jax.random.split(key)

    # ResNet(StemConfig(8, 7, 2, 3),
    #        architecture=[(BASIC, 1, 8, None), (BOTTLENECK, 1, 16, None)],
    #        output_size=10, use_bias=False)
    params = build_params(k_params)

    # PyTorch NCHW input convention.
    x = jax.random.normal(k_input, (2, 3, 16, 16), jnp.float32)

    logits = resnet_forward(params, x)
    logits = jax.block_until_ready(logits)
    assert logits.shape == (2, 10) and logits.dtype == jnp.float32
    assert bool(jnp.all(jnp.isfinite(logits)))
    print("KERNEL_OK")
</pallas_src>

<mosaic_0001>
module attributes {stable_mosaic.version = 11 : i64} {
  func.func @_basic_block_kernel(%arg0: memref<2x10x10x8xf32, #tpu.memory_space<vmem>>, %arg1: memref<9x8x8xbf16, #tpu.memory_space<vmem>>, %arg2: memref<1x8xf32, #tpu.memory_space<vmem>>, %arg3: memref<1x8xf32, #tpu.memory_space<vmem>>, %arg4: memref<9x8x8xbf16, #tpu.memory_space<vmem>>, %arg5: memref<1x8xf32, #tpu.memory_space<vmem>>, %arg6: memref<1x8xf32, #tpu.memory_space<vmem>>, %arg7: memref<128x8xf32, #tpu.memory_space<vmem>>, %arg8: memref<2x10x24x8xf32, #tpu.memory_space<vmem>>) attributes {dimension_semantics = [], scalar_prefetch = 0 : i64, scratch_operands = 1 : i64, tpu.core_type = #tpu.core_type<tc>} {
    %c0 = arith.constant 0 : index
    %c0_0 = arith.constant 0 : index
    %c0_1 = arith.constant 0 : index
    %c0_2 = arith.constant 0 : index
    %0 = vector.load %arg0[%c0, %c0_0, %c0_1, %c0_2] : memref<2x10x10x8xf32, #tpu.memory_space<vmem>>, vector<2x10x10x8xf32>
    %cst = arith.constant 0.000000e+00 : f32
    %1 = vector.broadcast %cst : f32 to vector<128x8xf32>
    %2 = vector.extract_strided_slice %0 {offsets = [0, 0, 0, 0], sizes = [2, 8, 8, 8], strides = [1, 1, 1, 1]} : vector<2x10x10x8xf32> to vector<2x8x8x8xf32>
    %3 = vector.shape_cast %2 : vector<2x8x8x8xf32> to vector<128x8xf32>
    %4 = arith.truncf %3 : vector<128x8xf32> to vector<128x8xbf16>
    %c0_3 = arith.constant 0 : index
    %c0_4 = arith.constant 0 : index
    %c0_5 = arith.constant 0 : index
    %5 = vector.load %arg1[%c0_3, %c0_4, %c0_5] : memref<9x8x8xbf16, #tpu.memory_space<vmem>>, vector<1x8x8xbf16>
    %6 = vector.shape_cast %5 : vector<1x8x8xbf16> to vector<8x8xbf16>
    %cst_6 = arith.constant dense<0.000000e+00> : vector<128x8xf32>
    %7 = tpu.matmul %4, %6, %cst_6 {dimension_numbers = #tpu.dot_dimension_numbers<[1], [0], [0], [1], [0, 0, 1, 1], [], []>} : vector<128x8xbf16>, vector<8x8xbf16>, vector<128x8xf32> -> vector<128x8xf32>
    %8 = arith.addf %1, %7 : vector<128x8xf32>
    %9 = vector.extract_strided_slice %0 {offsets = [0, 0, 1, 0], sizes = [2, 8, 8, 8], strides = [1, 1, 1, 1]} : vector<2x10x10x8xf32> to vector<2x8x8x8xf32>
    %10 = vector.shape_cast %9 : vector<2x8x8x8xf32> to vector<128x8xf32>
    %11 = arith.truncf %10 : vector<128x8xf32> to vector<128x8xbf16>
    %c1 = arith.constant 1 : index
    %c0_7 = arith.constant 0 : index
    %c0_8 = arith.constant 0 : index
    %12 = vector.load %arg1[%c1, %c0_7, %c0_8] : memref<9x8x8xbf16, #tpu.memory_space<vmem>>, vector<1x8x8xbf16>
    %13 = vector.shape_cast %12 : vector<1x8x8xbf16> to vector<8x8xbf16>
    %cst_9 = arith.constant dense<0.000000e+00> : vector<128x8xf32>
    %14 = tpu.matmul %11, %13, %cst_9 {dimension_numbers = #tpu.dot_dimension_numbers<[1], [0], [0], [1], [0, 0, 1, 1], [], []>} : vector<128x8xbf16>, vector<8x8xbf16>, vector<128x8xf32> -> vector<128x8xf32>
    %15 = arith.addf %8, %14 : vector<128x8xf32>
    %16 = vector.extract_strided_slice %0 {offsets = [0, 0, 2, 0], sizes = [2, 8, 8, 8], strides = [1, 1, 1, 1]} : vector<2x10x10x8xf32> to vector<2x8x8x8xf32>
    %17 = vector.shape_cast %16 : vector<2x8x8x8xf32> to vector<128x8xf32>
    %18 = arith.truncf %17 : vector<128x8xf32> to vector<128x8xbf16>
    %c2 = arith.constant 2 : index
    %c0_10 = arith.constant 0 : index
    %c0_11 = arith.constant 0 : index
    %19 = vector.load %arg1[%c2, %c0_10, %c0_11] : memref<9x8x8xbf16, #tpu.memory_space<vmem>>, vector<1x8x8xbf16>
    %20 = vector.shape_cast %19 : vector<1x8x8xbf16> to vector<8x8xbf16>
    %cst_12 = arith.constant dense<0.000000e+00> : vector<128x8xf32>
    %21 = tpu.matmul %18, %20, %cst_12 {dimension_numbers = #tpu.dot_dimension_numbers<[1], [0], [0], [1], [0, 0, 1, 1], [], []>} : vector<128x8xbf16>, vector<8x8xbf16>, vector<128x8xf32> -> vector<128x8xf32>
    %22 = arith.addf %15, %21 : vector<128x8xf32>
    %23 = vector.extract_strided_slice %0 {offsets = [0, 1, 0, 0], sizes = [2, 8, 8, 8], strides = [1, 1, 1, 1]} : vector<2x10x10x8xf32> to vector<2x8x8x8xf32>
    %24 = vector.shape_cast %23 : vector<2x8x8x8xf32> to vector<128x8xf32>
    %25 = arith.truncf %24 : vector<128x8xf32> to vector<128x8xbf16>
    %c3 = arith.constant 3 : index
    %c0_13 = arith.constant 0 : index
    %c0_14 = arith.constant 0 : index
    %26 = vector.load %arg1[%c3, %c0_13, %c0_14] : memref<9x8x8xbf16, #tpu.memory_space<vmem>>, vector<1x8x8xbf16>
    %27 = vector.shape_cast %26 : vector<1x8x8xbf16> to vector<8x8xbf16>
    %cst_15 = arith.constant dense<0.000000e+00> : vector<128x8xf32>
    %28 = tpu.matmul %25, %27, %cst_15 {dimension_numbers = #tpu.dot_dimension_numbers<[1], [0], [0], [1], [0, 0, 1, 1], [], []>} : vector<128x8xbf16>, vector<8x8xbf16>, vector<128x8xf32> -> vector<128x8xf32>
    %29 = arith.addf %22, %28 : vector<128x8xf32>
    %30 = vector.extract_strided_slice %0 {offsets = [0, 1, 1, 0], sizes = [2, 8, 8, 8], strides = [1, 1, 1, 1]} : vector<2x10x10x8xf32> to vector<2x8x8x8xf32>
    %31 = vector.shape_cast %30 : vector<2x8x8x8xf32> to vector<128x8xf32>
    %32 = arith.truncf %31 : vector<128x8xf32> to vector<128x8xbf16>
    %c4 = arith.constant 4 : index
    %c0_16 = arith.constant 0 : index
    %c0_17 = arith.constant 0 : index
    %33 = vector.load %arg1[%c4, %c0_16, %c0_17] : memref<9x8x8xbf16, #tpu.memory_space<vmem>>, vector<1x8x8xbf16>
    %34 = vector.shape_cast %33 : vector<1x8x8xbf16> to vector<8x8xbf16>
    %cst_18 = arith.constant dense<0.000000e+00> : vector<128x8xf32>
    %35 = tpu.matmul %32, %34, %cst_18 {dimension_numbers = #tpu.dot_dimension_numbers<[1], [0], [0], [1], [0, 0, 1, 1], [], []>} : vector<128x8xbf16>, vector<8x8xbf16>, vector<128x8xf32> -> vector<128x8xf32>
    %36 = arith.addf %29, %35 : vector<128x8xf32>
    %37 = vector.extract_strided_slice %0 {offsets = [0, 1, 2, 0], sizes = [2, 8, 8, 8], strides = [1, 1, 1, 1]} : vector<2x10x10x8xf32> to vector<2x8x8x8xf32>
    %38 = vector.shape_cast %37 : vector<2x8x8x8xf32> to vector<128x8xf32>
    %39 = arith.truncf %38 : vector<128x8xf32> to vector<128x8xbf16>
    %c5 = arith.constant 5 : index
    %c0_19 = arith.constant 0 : index
    %c0_20 = arith.constant 0 : index
    %40 = vector.load %arg1[%c5, %c0_19, %c0_20] : memref<9x8x8xbf16, #tpu.memory_space<vmem>>, vector<1x8x8xbf16>
    %41 = vector.shape_cast %40 : vector<1x8x8xbf16> to vector<8x8xbf16>
    %cst_21 = arith.constant dense<0.000000e+00> : vector<128x8xf32>
    %42 = tpu.matmul %39, %41, %cst_21 {dimension_numbers = #tpu.dot_dimension_numbers<[1], [0], [0], [1], [0, 0, 1, 1], [], []>} : vector<128x8xbf16>, vector<8x8xbf16>, vector<128x8xf32> -> vector<128x8xf32>
    %43 = arith.addf %36, %42 : vector<128x8xf32>
    %44 = vector.extract_strided_slice %0 {offsets = [0, 2, 0, 0], sizes = [2, 8, 8, 8], strides = [1, 1, 1, 1]} : vector<2x10x10x8xf32> to vector<2x8x8x8xf32>
    %45 = vector.shape_cast %44 : vector<2x8x8x8xf32> to vector<128x8xf32>
    %46 = arith.truncf %45 : vector<128x8xf32> to vector<128x8xbf16>
    %c6 = arith.constant 6 : index
    %c0_22 = arith.constant 0 : index
    %c0_23 = arith.constant 0 : index
    %47 = vector.load %arg1[%c6, %c0_22, %c0_23] : memref<9x8x8xbf16, #tpu.memory_space<vmem>>, vector<1x8x8xbf16>
    %48 = vector.shape_cast %47 : vector<1x8x8xbf16> to vector<8x8xbf16>
    %cst_24 = arith.constant dense<0.000000e+00> : vector<128x8xf32>
    %49 = tpu.matmul %46, %48, %cst_24 {dimension_numbers = #tpu.dot_dimension_numbers<[1], [0], [0], [1], [0, 0, 1, 1], [], []>} : vector<128x8xbf16>, vector<8x8xbf16>, vector<128x8xf32> -> vector<128x8xf32>
    %50 = arith.addf %43, %49 : vector<128x8xf32>
    %51 = vector.extract_strided_slice %0 {offsets = [0, 2, 1, 0], sizes = [2, 8, 8, 8], strides = [1, 1, 1, 1]} : vector<2x10x10x8xf32> to vector<2x8x8x8xf32>
    %52 = vector.shape_cast %51 : vector<2x8x8x8xf32> to vector<128x8xf32>
    %53 = arith.truncf %52 : vector<128x8xf32> to vector<128x8xbf16>
    %c7 = arith.constant 7 : index
    %c0_25 = arith.constant 0 : index
    %c0_26 = arith.constant 0 : index
    %54 = vector.load %arg1[%c7, %c0_25, %c0_26] : memref<9x8x8xbf16, #tpu.memory_space<vmem>>, vector<1x8x8xbf16>
    %55 = vector.shape_cast %54 : vector<1x8x8xbf16> to vector<8x8xbf16>
    %cst_27 = arith.constant dense<0.000000e+00> : vector<128x8xf32>
    %56 = tpu.matmul %53, %55, %cst_27 {dimension_numbers = #tpu.dot_dimension_numbers<[1], [0], [0], [1], [0, 0, 1, 1], [], []>} : vector<128x8xbf16>, vector<8x8xbf16>, vector<128x8xf32> -> vector<128x8xf32>
    %57 = arith.addf %50, %56 : vector<128x8xf32>
    %58 = vector.extract_strided_slice %0 {offsets = [0, 2, 2, 0], sizes = [2, 8, 8, 8], strides = [1, 1, 1, 1]} : vector<2x10x10x8xf32> to vector<2x8x8x8xf32>
    %59 = vector.shape_cast %58 : vector<2x8x8x8xf32> to vector<128x8xf32>
    %60 = arith.truncf %59 : vector<128x8xf32> to vector<128x8xbf16>
    %c8 = arith.constant 8 : index
    %c0_28 = arith.constant 0 : index
    %c0_29 = arith.constant 0 : index
    %61 = vector.load %arg1[%c8, %c0_28, %c0_29] : memref<9x8x8xbf16, #tpu.memory_space<vmem>>, vector<1x8x8xbf16>
    %62 = vector.shape_cast %61 : vector<1x8x8xbf16> to vector<8x8xbf16>
    %cst_30 = arith.constant dense<0.000000e+00> : vector<128x8xf32>
    %63 = tpu.matmul %60, %62, %cst_30 {dimension_numbers = #tpu.dot_dimension_numbers<[1], [0], [0], [1], [0, 0, 1, 1], [], []>} : vector<128x8xbf16>, vector<8x8xbf16>, vector<128x8xf32> -> vector<128x8xf32>
    %64 = arith.addf %57, %63 : vector<128x8xf32>
    %c0_31 = arith.constant 0 : index
    %c0_32 = arith.constant 0 : index
    %65 = vector.load %arg2[%c0_31, %c0_32] : memref<1x8xf32, #tpu.memory_space<vmem>>, vector<1x8xf32>
    %c0_33 = arith.constant 0 : index
    %c0_34 = arith.constant 0 : index
    %66 = vector.load %arg3[%c0_33, %c0_34] : memref<1x8xf32, #tpu.memory_space<vmem>>, vector<1x8xf32>
    %cst_35 = arith.constant dense<0.000000e+00> : vector<8xf32>
    %67 = vector.multi_reduction <add>, %64, %cst_35 [0] : vector<128x8xf32> to vector<8xf32>
    %68 = vector.shape_cast %67 : vector<8xf32> to vector<1x8xf32>
    %69 = arith.mulf %64, %64 : vector<128x8xf32>
    %cst_36 = arith.constant dense<0.000000e+00> : vector<8xf32>
    %70 = vector.multi_reduction <add>, %69, %cst_36 [0] : vector<128x8xf32> to vector<8xf32>
    %71 = vector.shape_cast %70 : vector<8xf32> to vector<1x8xf32>
    %cst_37 = arith.constant 7.812500e-03 : f32
    %72 = vector.broadcast %cst_37 : f32 to vector<1x8xf32>
    %73 = arith.mulf %68, %72 : vector<1x8xf32>
    %cst_38 = arith.constant 7.812500e-03 : f32
    %74 = vector.broadcast %cst_38 : f32 to vector<1x8xf32>
    %75 = arith.mulf %71, %74 : vector<1x8xf32>
    %76 = arith.mulf %73, %73 : vector<1x8xf32>
    %77 = arith.subf %75, %76 : vector<1x8xf32>
    %cst_39 = arith.constant 0.000000e+00 : f32
    %78 = vector.broadcast %cst_39 : f32 to vector<1x8xf32>
    %79 = arith.maximumf %77, %78 : vector<1x8xf32>
    %80 = vector.broadcast %73 : vector<1x8xf32> to vector<128x8xf32>
    %81 = arith.subf %64, %80 : vector<128x8xf32>
    %cst_40 = arith.constant 9.99999974E-6 : f32
    %82 = vector.broadcast %cst_40 : f32 to vector<1x8xf32>
    %83 = arith.addf %79, %82 : vector<1x8xf32>
    %84 = math.rsqrt %83 : vector<1x8xf32>
    %85 = vector.broadcast %84 : vector<1x8xf32> to vector<128x8xf32>
    %86 = arith.mulf %81, %85 : vector<128x8xf32>
    %87 = vector.broadcast %65 : vector<1x8xf32> to vector<128x8xf32>
    %88 = arith.mulf %86, %87 : vector<128x8xf32>
    %89 = vector.broadcast %66 : vector<1x8xf32> to vector<128x8xf32>
    %90 = arith.addf %88, %89 : vector<128x8xf32>
    %cst_41 = arith.constant 0.000000e+00 : f32
    %91 = vector.broadcast %cst_41 : f32 to vector<128x8xf32>
    %92 = arith.maximumf %90, %91 : vector<128x8xf32>
    %cst_42 = arith.constant 0.000000e+00 : f32
    %93 = vector.broadcast %cst_42 : f32 to vector<2x10x24x8xf32>
    %c0_43 = arith.constant 0 : index
    %c0_44 = arith.constant 0 : index
    %c0_45 = arith.constant 0 : index
    %c0_46 = arith.constant 0 : index
    %94 = vector.load %arg8[%c0_43, %c0_44, %c0_45, %c0_46] : memref<2x10x24x8xf32, #tpu.memory_space<vmem>>, vector<2x10x24x8xf32>
    tpu.vector_store %arg8[%c0_43, %c0_44, %c0_45, %c0_46], %93 {strides = array<i32>} : memref<2x10x24x8xf32, #tpu.memory_space<vmem>>, vector<2x10x24x8xf32>,
    %95 = vector.extract_strided_slice %92 {offsets = [0, 0], sizes = [8, 8], strides = [1, 1]} : vector<128x8xf32> to vector<8x8xf32>
    %c0_47 = arith.constant 0 : index
    %c1_48 = arith.constant 1 : index
    %c8_49 = arith.constant 8 : index
    %c0_50 = arith.constant 0 : index
    %96 = vector.load %arg8[%c0_47, %c1_48, %c8_49, %c0_50] : memref<2x10x24x8xf32, #tpu.memory_space<vmem>>, vector<1x1x8x8xf32>
    %97 = vector.shape_cast %96 : vector<1x1x8x8xf32> to vector<8x8xf32>
    %98 = vector.shape_cast %95 : vector<8x8xf32> to vector<1x1x8x8xf32>
    tpu.vector_store %arg8[%c0_47, %c1_48, %c8_49, %c0_50], %98 {strides = array<i32>} : memref<2x10x24x8xf32, #tpu.memory_space<vmem>>, vector<1x1x8x8xf32>,
    %99 = vector.extract_strided_slice %92 {offsets = [8, 0], sizes = [8, 8], strides = [1, 1]} : vector<128x8xf32> to vector<8x8xf32>
    %c0_51 = arith.constant 0 : index
    %c2_52 = arith.constant 2 : index
    %c8_53 = arith.constant 8 : index
    %c0_54 = arith.constant 0 : index
    %100 = vector.load %arg8[%c0_51, %c2_52, %c8_53, %c0_54] : memref<2x10x24x8xf32, #tpu.memory_space<vmem>>, vector<1x1x8x8xf32>
    %101 = vector.shape_cast %100 : vector<1x1x8x8xf32> to vector<8x8xf32>
    %102 = vector.shape_cast %99 : vector<8x8xf32> to vector<1x1x8x8xf32>
    tpu.vector_store %arg8[%c0_51, %c2_52, %c8_53, %c0_54], %102 {strides = array<i32>} : memref<2x10x24x8xf32, #tpu.memory_space<vmem>>, vector<1x1x8x8xf32>,
    %103 = vector.extract_strided_slice %92 {offsets = [16, 0], sizes = [8, 8], strides = [1, 1]} : vector<128x8xf32> to vector<8x8xf32>
    %c0_55 = arith.constant 0 : index
    %c3_56 = arith.constant 3 : index
    %c8_57 = arith.constant 8 : index
    %c0_58 = arith.constant 0 : index
    %104 = vector.load %arg8[%c0_55, %c3_56, %c8_57, %c0_58] : memref<2x10x24x8xf32, #tpu.memory_space<vmem>>, vector<1x1x8x8xf32>
    %105 = vector.shape_cast %104 : vector<1x1x8x8xf32> to vector<8x8xf32>
    %106 = vector.shape_cast %103 : vector<8x8xf32> to vector<1x1x8x8xf32>
    tpu.vector_store %arg8[%c0_55, %c3_56, %c8_57, %c0_58], %106 {strides = array<i32>} : memref<2x10x24x8xf32, #tpu.memory_space<vmem>>, vector<1x1x8x8xf32>,
    %107 = vector.extract_strided_slice %92 {offsets = [24, 0], sizes = [8, 8], strides = [1, 1]} : vector<128x8xf32> to vector<8x8xf32>
    %c0_59 = arith.constant 0 : index
    %c4_60 = arith.constant 4 : index
    %c8_61 = arith.constant 8 : index
    %c0_62 = arith.constant 0 : index
    %108 = vector.load %arg8[%c0_59, %c4_60, %c8_61, %c0_62] : memref<2x10x24x8xf32, #tpu.memory_space<vmem>>, vector<1x1x8x8xf32>
    %109 = vector.shape_cast %108 : vector<1x1x8x8xf32> to vector<8x8xf32>
    %110 = vector.shape_cast %107 : vector<8x8xf32> to vector<1x1x8x8xf32>
    tpu.vector_store %arg8[%c0_59, %c4_60, %c8_61, %c0_62], %110 {strides = array<i32>} : memref<2x10x24x8xf32, #tpu.memory_space<vmem>>, vector<1x1x8x8xf32>,
    %111 = vector.extract_strided_slice %92 {offsets = [32, 0], sizes = [8, 8], strides = [1, 1]} : vector<128x8xf32> to vector<8x8xf32>
    %c0_63 = arith.constant 0 : index
    %c5_64 = arith.constant 5 : index
    %c8_65 = arith.constant 8 : index
    %c0_66 = arith.constant 0 : index
    %112 = vector.load %arg8[%c0_63, %c5_64, %c8_65, %c0_66] : memref<2x10x24x8xf32, #tpu.memory_space<vmem>>, vector<1x1x8x8xf32>
    %113 = vector.shape_cast %112 : vector<1x1x8x8xf32> to vector<8x8xf32>
    %114 = vector.shape_cast %111 : vector<8x8xf32> to vector<1x1x8x8xf32>
    tpu.vector_store %arg8[%c0_63, %c5_64, %c8_65, %c0_66], %114 {strides = array<i32>} : memref<2x10x24x8xf32, #tpu.memory_space<vmem>>, vector<1x1x8x8xf32>,
    %115 = vector.extract_strided_slice %92 {offsets = [40, 0], sizes = [8, 8], strides = [1, 1]} : vector<128x8xf32> to vector<8x8xf32>
    %c0_67 = arith.constant 0 : index
    %c6_68 = arith.constant 6 : index
    %c8_69 = arith.constant 8 : index
    %c0_70 = arith.constant 0 : index
    %116 = vector.load %arg8[%c0_67, %c6_68, %c8_69, %c0_70] : memref<2x10x24x8xf32, #tpu.memory_space<vmem>>, vector<1x1x8x8xf32>
    %117 = vector.shape_cast %116 : vector<1x1x8x8xf32> to vector<8x8xf32>
    %118 = vector.shape_cast %115 : vector<8x8xf32> to vector<1x1x8x8xf32>
    tpu.vector_store %arg8[%c0_67, %c6_68, %c8_69, %c0_70], %118 {strides = array<i32>} : memref<2x10x24x8xf32, #tpu.memory_space<vmem>>, vector<1x1x8x8xf32>,
    %119 = vector.extract_strided_slice %92 {offsets = [48, 0], sizes = [8, 8], strides = [1, 1]} : vector<128x8xf32> to vector<8x8xf32>
    %c0_71 = arith.constant 0 : index
    %c7_72 = arith.constant 7 : index
    %c8_73 = arith.constant 8 : index
    %c0_74 = arith.constant 0 : index
    %120 = vector.load %arg8[%c0_71, %c7_72, %c8_73, %c0_74] : memref<2x10x24x8xf32, #tpu.memory_space<vmem>>, vector<1x1x8x8xf32>
    %121 = vector.shape_cast %120 : vector<1x1x8x8xf32> to vector<8x8xf32>
    %122 = vector.shape_cast %119 : vector<8x8xf32> to vector<1x1x8x8xf32>
    tpu.vector_store %arg8[%c0_71, %c7_72, %c8_73, %c0_74], %122 {strides = array<i32>} : memref<2x10x24x8xf32, #tpu.memory_space<vmem>>, vector<1x1x8x8xf32>,
    %123 = vector.extract_strided_slice %92 {offsets = [56, 0], sizes = [8, 8], strides = [1, 1]} : vector<128x8xf32> to vector<8x8xf32>
    %c0_75 = arith.constant 0 : index
    %c8_76 = arith.constant 8 : index
    %c8_77 = arith.constant 8 : index
    %c0_78 = arith.constant 0 : index
    %124 = vector.load %arg8[%c0_75, %c8_76, %c8_77, %c0_78] : memref<2x10x24x8xf32, #tpu.memory_space<vmem>>, vector<1x1x8x8xf32>
    %125 = vector.shape_cast %124 : vector<1x1x8x8xf32> to vector<8x8xf32>
    %126 = vector.shape_cast %123 : vector<8x8xf32> to vector<1x1x8x8xf32>
    tpu.vector_store %arg8[%c0_75, %c8_76, %c8_77, %c0_78], %126 {strides = array<i32>} : memref<2x10x24x8xf32, #tpu.memory_space<vmem>>, vector<1x1x8x8xf32>,
    %127 = vector.extract_strided_slice %92 {offsets = [64, 0], sizes = [8, 8], strides = [1, 1]} : vector<128x8xf32> to vector<8x8xf32>
    %c1_79 = arith.constant 1 : index
    %c1_80 = arith.constant 1 : index
    %c8_81 = arith.constant 8 : index
    %c0_82 = arith.constant 0 : index
    %128 = vector.load %arg8[%c1_79, %c1_80, %c8_81, %c0_82] : memref<2x10x24x8xf32, #tpu.memory_space<vmem>>, vector<1x1x8x8xf32>
    %129 = vector.shape_cast %128 : vector<1x1x8x8xf32> to vector<8x8xf32>
    %130 = vector.shape_cast %127 : vector<8x8xf32> to vector<1x1x8x8xf32>
    tpu.vector_store %arg8[%c1_79, %c1_80, %c8_81, %c0_82], %130 {strides = array<i32>} : memref<2x10x24x8xf32, #tpu.memory_space<vmem>>, vector<1x1x8x8xf32>,
    %131 = vector.extract_strided_slice %92 {offsets = [72, 0], sizes = [8, 8], strides = [1, 1]} : vector<128x8xf32> to vector<8x8xf32>
    %c1_83 = arith.constant 1 : index
    %c2_84 = arith.constant 2 : index
    %c8_85 = arith.constant 8 : index
    %c0_86 = arith.constant 0 : index
    %132 = vector.load %arg8[%c1_83, %c2_84, %c8_85, %c0_86] : memref<2x10x24x8xf32, #tpu.memory_space<vmem>>, vector<1x1x8x8xf32>
    %133 = vector.shape_cast %132 : vector<1x1x8x8xf32> to vector<8x8xf32>
    %134 = vector.shape_cast %131 : vector<8x8xf32> to vector<1x1x8x8xf32>
    tpu.vector_store %arg8[%c1_83, %c2_84, %c8_85, %c0_86], %134 {strides = array<i32>} : memref<2x10x24x8xf32, #tpu.memory_space<vmem>>, vector<1x1x8x8xf32>,
    %135 = vector.extract_strided_slice %92 {offsets = [80, 0], sizes = [8, 8], strides = [1, 1]} : vector<128x8xf32> to vector<8x8xf32>
    %c1_87 = arith.constant 1 : index
    %c3_88 = arith.constant 3 : index
    %c8_89 = arith.constant 8 : index
    %c0_90 = arith.constant 0 : index
    %136 = vector.load %arg8[%c1_87, %c3_88, %c8_89, %c0_90] : memref<2x10x24x8xf32, #tpu.memory_space<vmem>>, vector<1x1x8x8xf32>
    %137 = vector.shape_cast %136 : vector<1x1x8x8xf32> to vector<8x8xf32>
    %138 = vector.shape_cast %135 : vector<8x8xf32> to vector<1x1x8x8xf32>
    tpu.vector_store %arg8[%c1_87, %c3_88, %c8_89, %c0_90], %138 {strides = array<i32>} : memref<2x10x24x8xf32, #tpu.memory_space<vmem>>, vector<1x1x8x8xf32>,
    %139 = vector.extract_strided_slice %92 {offsets = [88, 0], sizes = [8, 8], strides = [1, 1]} : vector<128x8xf32> to vector<8x8xf32>
    %c1_91 = arith.constant 1 : index
    %c4_92 = arith.constant 4 : index
    %c8_93 = arith.constant 8 : index
    %c0_94 = arith.constant 0 : index
    %140 = vector.load %arg8[%c1_91, %c4_92, %c8_93, %c0_94] : memref<2x10x24x8xf32, #tpu.memory_space<vmem>>, vector<1x1x8x8xf32>
    %141 = vector.shape_cast %140 : vector<1x1x8x8xf32> to vector<8x8xf32>
    %142 = vector.shape_cast %139 : vector<8x8xf32> to vector<1x1x8x8xf32>
    tpu.vector_store %arg8[%c1_91, %c4_92, %c8_93, %c0_94], %142 {strides = array<i32>} : memref<2x10x24x8xf32, #tpu.memory_space<vmem>>, vector<1x1x8x8xf32>,
    %143 = vector.extract_strided_slice %92 {offsets = [96, 0], sizes = [8, 8], strides = [1, 1]} : vector<128x8xf32> to vector<8x8xf32>
    %c1_95 = arith.constant 1 : index
    %c5_96 = arith.constant 5 : index
    %c8_97 = arith.constant 8 : index
    %c0_98 = arith.constant 0 : index
    %144 = vector.load %arg8[%c1_95, %c5_96, %c8_97, %c0_98] : memref<2x10x24x8xf32, #tpu.memory_space<vmem>>, vector<1x1x8x8xf32>
    %145 = vector.shape_cast %144 : vector<1x1x8x8xf32> to vector<8x8xf32>
    %146 = vector.shape_cast %143 : vector<8x8xf32> to vector<1x1x8x8xf32>
    tpu.vector_store %arg8[%c1_95, %c5_96, %c8_97, %c0_98], %146 {strides = array<i32>} : memref<2x10x24x8xf32, #tpu.memory_space<vmem>>, vector<1x1x8x8xf32>,
    %147 = vector.extract_strided_slice %92 {offsets = [104, 0], sizes = [8, 8], strides = [1, 1]} : vector<128x8xf32> to vector<8x8xf32>
    %c1_99 = arith.constant 1 : index
    %c6_100 = arith.constant 6 : index
    %c8_101 = arith.constant 8 : index
    %c0_102 = arith.constant 0 : index
    %148 = vector.load %arg8[%c1_99, %c6_100, %c8_101, %c0_102] : memref<2x10x24x8xf32, #tpu.memory_space<vmem>>, vector<1x1x8x8xf32>
    %149 = vector.shape_cast %148 : vector<1x1x8x8xf32> to vector<8x8xf32>
    %150 = vector.shape_cast %147 : vector<8x8xf32> to vector<1x1x8x8xf32>
    tpu.vector_store %arg8[%c1_99, %c6_100, %c8_101, %c0_102], %150 {strides = array<i32>} : memref<2x10x24x8xf32, #tpu.memory_space<vmem>>, vector<1x1x8x8xf32>,
    %151 = vector.extract_strided_slice %92 {offsets = [112, 0], sizes = [8, 8], strides = [1, 1]} : vector<128x8xf32> to vector<8x8xf32>
    %c1_103 = arith.constant 1 : index
    %c7_104 = arith.constant 7 : index
    %c8_105 = arith.constant 8 : index
    %c0_106 = arith.constant 0 : index
    %152 = vector.load %arg8[%c1_103, %c7_104, %c8_105, %c0_106] : memref<2x10x24x8xf32, #tpu.memory_space<vmem>>, vector<1x1x8x8xf32>
    %153 = vector.shape_cast %152 : vector<1x1x8x8xf32> to vector<8x8xf32>
    %154 = vector.shape_cast %151 : vector<8x8xf32> to vector<1x1x8x8xf32>
    tpu.vector_store %arg8[%c1_103, %c7_104, %c8_105, %c0_106], %154 {strides = array<i32>} : memref<2x10x24x8xf32, #tpu.memory_space<vmem>>, vector<1x1x8x8xf32>,
    %155 = vector.extract_strided_slice %92 {offsets = [120, 0], sizes = [8, 8], strides = [1, 1]} : vector<128x8xf32> to vector<8x8xf32>
    %c1_107 = arith.constant 1 : index
    %c8_108 = arith.constant 8 : index
    %c8_109 = arith.constant 8 : index
    %c0_110 = arith.constant 0 : index
    %156 = vector.load %arg8[%c1_107, %c8_108, %c8_109, %c0_110] : memref<2x10x24x8xf32, #tpu.memory_space<vmem>>, vector<1x1x8x8xf32>
    %157 = vector.shape_cast %156 : vector<1x1x8x8xf32> to vector<8x8xf32>
    %158 = vector.shape_cast %155 : vector<8x8xf32> to vector<1x1x8x8xf32>
    tpu.vector_store %arg8[%c1_107, %c8_108, %c8_109, %c0_110], %158 {strides = array<i32>} : memref<2x10x24x8xf32, #tpu.memory_space<vmem>>, vector<1x1x8x8xf32>,
    %c0_111 = arith.constant 0 : index
    %c0_112 = arith.constant 0 : index
    %c0_113 = arith.constant 0 : index
    %c0_114 = arith.constant 0 : index
    %159 = vector.load %arg8[%c0_111, %c0_112, %c0_113, %c0_114] : memref<2x10x24x8xf32, #tpu.memory_space<vmem>>, vector<2x10x24x8xf32>
    %cst_115 = arith.constant 0.000000e+00 : f32
    %160 = vector.broadcast %cst_115 : f32 to vector<128x8xf32>
    %161 = vector.extract_strided_slice %159 {offsets = [0, 0, 7, 0], sizes = [2, 8, 8, 8], strides = [1, 1, 1, 1]} : vector<2x10x24x8xf32> to vector<2x8x8x8xf32>
    %162 = vector.shape_cast %161 : vector<2x8x8x8xf32> to vector<128x8xf32>
    %163 = arith.truncf %162 : vector<128x8xf32> to vector<128x8xbf16>
    %c0_116 = arith.constant 0 : index
    %c0_117 = arith.constant 0 : index
    %c0_118 = arith.constant 0 : index
    %164 = vector.load %arg4[%c0_116, %c0_117, %c0_118] : memref<9x8x8xbf16, #tpu.memory_space<vmem>>, vector<1x8x8xbf16>
    %165 = vector.shape_cast %164 : vector<1x8x8xbf16> to vector<8x8xbf16>
    %cst_119 = arith.constant dense<0.000000e+00> : vector<128x8xf32>
    %166 = tpu.matmul %163, %165, %cst_119 {dimension_numbers = #tpu.dot_dimension_numbers<[1], [0], [0], [1], [0, 0, 1, 1], [], []>} : vector<128x8xbf16>, vector<8x8xbf16>, vector<128x8xf32> -> vector<128x8xf32>
    %167 = arith.addf %160, %166 : vector<128x8xf32>
    %168 = vector.extract_strided_slice %159 {offsets = [0, 0, 8, 0], sizes = [2, 8, 8, 8], strides = [1, 1, 1, 1]} : vector<2x10x24x8xf32> to vector<2x8x8x8xf32>
    %169 = vector.shape_cast %168 : vector<2x8x8x8xf32> to vector<128x8xf32>
    %170 = arith.truncf %169 : vector<128x8xf32> to vector<128x8xbf16>
    %c1_120 = arith.constant 1 : index
    %c0_121 = arith.constant 0 : index
    %c0_122 = arith.constant 0 : index
    %171 = vector.load %arg4[%c1_120, %c0_121, %c0_122] : memref<9x8x8xbf16, #tpu.memory_space<vmem>>, vector<1x8x8xbf16>
    %172 = vector.shape_cast %171 : vector<1x8x8xbf16> to vector<8x8xbf16>
    %cst_123 = arith.constant dense<0.000000e+00> : vector<128x8xf32>
    %173 = tpu.matmul %170, %172, %cst_123 {dimension_numbers = #tpu.dot_dimension_numbers<[1], [0], [0], [1], [0, 0, 1, 1], [], []>} : vector<128x8xbf16>, vector<8x8xbf16>, vector<128x8xf32> -> vector<128x8xf32>
    %174 = arith.addf %167, %173 : vector<128x8xf32>
    %175 = vector.extract_strided_slice %159 {offsets = [0, 0, 9, 0], sizes = [2, 8, 8, 8], strides = [1, 1, 1, 1]} : vector<2x10x24x8xf32> to vector<2x8x8x8xf32>
    %176 = vector.shape_cast %175 : vector<2x8x8x8xf32> to vector<128x8xf32>
    %177 = arith.truncf %176 : vector<128x8xf32> to vector<128x8xbf16>
    %c2_124 = arith.constant 2 : index
    %c0_125 = arith.constant 0 : index
    %c0_126 = arith.constant 0 : index
    %178 = vector.load %arg4[%c2_124, %c0_125, %c0_126] : memref<9x8x8xbf16, #tpu.memory_space<vmem>>, vector<1x8x8xbf16>
    %179 = vector.shape_cast %178 : vector<1x8x8xbf16> to vector<8x8xbf16>
    %cst_127 = arith.constant dense<0.000000e+00> : vector<128x8xf32>
    %180 = tpu.matmul %177, %179, %cst_127 {dimension_numbers = #tpu.dot_dimension_numbers<[1], [0], [0], [1], [0, 0, 1, 1], [], []>} : vector<128x8xbf16>, vector<8x8xbf16>, vector<128x8xf32> -> vector<128x8xf32>
    %181 = arith.addf %174, %180 : vector<128x8xf32>
    %182 = vector.extract_strided_slice %159 {offsets = [0, 1, 7, 0], sizes = [2, 8, 8, 8], strides = [1, 1, 1, 1]} : vector<2x10x24x8xf32> to vector<2x8x8x8xf32>
    %183 = vector.shape_cast %182 : vector<2x8x8x8xf32> to vector<128x8xf32>
    %184 = arith.truncf %183 : vector<128x8xf32> to vector<128x8xbf16>
    %c3_128 = arith.constant 3 : index
    %c0_129 = arith.constant 0 : index
    %c0_130 = arith.constant 0 : index
    %185 = vector.load %arg4[%c3_128, %c0_129, %c0_130] : memref<9x8x8xbf16, #tpu.memory_space<vmem>>, vector<1x8x8xbf16>
    %186 = vector.shape_cast %185 : vector<1x8x8xbf16> to vector<8x8xbf16>
    %cst_131 = arith.constant dense<0.000000e+00> : vector<128x8xf32>
    %187 = tpu.matmul %184, %186, %cst_131 {dimension_numbers = #tpu.dot_dimension_numbers<[1], [0], [0], [1], [0, 0, 1, 1], [], []>} : vector<128x8xbf16>, vector<8x8xbf16>, vector<128x8xf32> -> vector<128x8xf32>
    %188 = arith.addf %181, %187 : vector<128x8xf32>
    %189 = vector.extract_strided_slice %159 {offsets = [0, 1, 8, 0], sizes = [2, 8, 8, 8], strides = [1, 1, 1, 1]} : vector<2x10x24x8xf32> to vector<2x8x8x8xf32>
    %190 = vector.shape_cast %189 : vector<2x8x8x8xf32> to vector<128x8xf32>
    %191 = arith.truncf %190 : vector<128x8xf32> to vector<128x8xbf16>
    %c4_132 = arith.constant 4 : index
    %c0_133 = arith.constant 0 : index
    %c0_134 = arith.constant 0 : index
    %192 = vector.load %arg4[%c4_132, %c0_133, %c0_134] : memref<9x8x8xbf16, #tpu.memory_space<vmem>>, vector<1x8x8xbf16>
    %193 = vector.shape_cast %192 : vector<1x8x8xbf16> to vector<8x8xbf16>
    %cst_135 = arith.constant dense<0.000000e+00> : vector<128x8xf32>
    %194 = tpu.matmul %191, %193, %cst_135 {dimension_numbers = #tpu.dot_dimension_numbers<[1], [0], [0], [1], [0, 0, 1, 1], [], []>} : vector<128x8xbf16>, vector<8x8xbf16>, vector<128x8xf32> -> vector<128x8xf32>
    %195 = arith.addf %188, %194 : vector<128x8xf32>
    %196 = vector.extract_strided_slice %159 {offsets = [0, 1, 9, 0], sizes = [2, 8, 8, 8], strides = [1, 1, 1, 1]} : vector<2x10x24x8xf32> to vector<2x8x8x8xf32>
    %197 = vector.shape_cast %196 : vector<2x8x8x8xf32> to vector<128x8xf32>
    %198 = arith.truncf %197 : vector<128x8xf32> to vector<128x8xbf16>
    %c5_136 = arith.constant 5 : index
    %c0_137 = arith.constant 0 : index
    %c0_138 = arith.constant 0 : index
    %199 = vector.load %arg4[%c5_136, %c0_137, %c0_138] : memref<9x8x8xbf16, #tpu.memory_space<vmem>>, vector<1x8x8xbf16>
    %200 = vector.shape_cast %199 : vector<1x8x8xbf16> to vector<8x8xbf16>
    %cst_139 = arith.constant dense<0.000000e+00> : vector<128x8xf32>
    %201 = tpu.matmul %198, %200, %cst_139 {dimension_numbers = #tpu.dot_dimension_numbers<[1], [0], [0], [1], [0, 0, 1, 1], [], []>} : vector<128x8xbf16>, vector<8x8xbf16>, vector<128x8xf32> -> vector<128x8xf32>
    %202 = arith.addf %195, %201 : vector<128x8xf32>
    %203 = vector.extract_strided_slice %159 {offsets = [0, 2, 7, 0], sizes = [2, 8, 8, 8], strides = [1, 1, 1, 1]} : vector<2x10x24x8xf32> to vector<2x8x8x8xf32>
    %204 = vector.shape_cast %203 : vector<2x8x8x8xf32> to vector<128x8xf32>
    %205 = arith.truncf %204 : vector<128x8xf32> to vector<128x8xbf16>
    %c6_140 = arith.constant 6 : index
    %c0_141 = arith.constant 0 : index
    %c0_142 = arith.constant 0 : index
    %206 = vector.load %arg4[%c6_140, %c0_141, %c0_142] : memref<9x8x8xbf16, #tpu.memory_space<vmem>>, vector<1x8x8xbf16>
    %207 = vector.shape_cast %206 : vector<1x8x8xbf16> to vector<8x8xbf16>
    %cst_143 = arith.constant dense<0.000000e+00> : vector<128x8xf32>
    %208 = tpu.matmul %205, %207, %cst_143 {dimension_numbers = #tpu.dot_dimension_numbers<[1], [0], [0], [1], [0, 0, 1, 1], [], []>} : vector<128x8xbf16>, vector<8x8xbf16>, vector<128x8xf32> -> vector<128x8xf32>
    %209 = arith.addf %202, %208 : vector<128x8xf32>
    %210 = vector.extract_strided_slice %159 {offsets = [0, 2, 8, 0], sizes = [2, 8, 8, 8], strides = [1, 1, 1, 1]} : vector<2x10x24x8xf32> to vector<2x8x8x8xf32>
    %211 = vector.shape_cast %210 : vector<2x8x8x8xf32> to vector<128x8xf32>
    %212 = arith.truncf %211 : vector<128x8xf32> to vector<128x8xbf16>
    %c7_144 = arith.constant 7 : index
    %c0_145 = arith.constant 0 : index
    %c0_146 = arith.constant 0 : index
    %213 = vector.load %arg4[%c7_144, %c0_145, %c0_146] : memref<9x8x8xbf16, #tpu.memory_space<vmem>>, vector<1x8x8xbf16>
    %214 = vector.shape_cast %213 : vector<1x8x8xbf16> to vector<8x8xbf16>
    %cst_147 = arith.constant dense<0.000000e+00> : vector<128x8xf32>
    %215 = tpu.matmul %212, %214, %cst_147 {dimension_numbers = #tpu.dot_dimension_numbers<[1], [0], [0], [1], [0, 0, 1, 1], [], []>} : vector<128x8xbf16>, vector<8x8xbf16>, vector<128x8xf32> -> vector<128x8xf32>
    %216 = arith.addf %209, %215 : vector<128x8xf32>
    %217 = vector.extract_strided_slice %159 {offsets = [0, 2, 9, 0], sizes = [2, 8, 8, 8], strides = [1, 1, 1, 1]} : vector<2x10x24x8xf32> to vector<2x8x8x8xf32>
    %218 = vector.shape_cast %217 : vector<2x8x8x8xf32> to vector<128x8xf32>
    %219 = arith.truncf %218 : vector<128x8xf32> to vector<128x8xbf16>
    %c8_148 = arith.constant 8 : index
    %c0_149 = arith.constant 0 : index
    %c0_150 = arith.constant 0 : index
    %220 = vector.load %arg4[%c8_148, %c0_149, %c0_150] : memref<9x8x8xbf16, #tpu.memory_space<vmem>>, vector<1x8x8xbf16>
    %221 = vector.shape_cast %220 : vector<1x8x8xbf16> to vector<8x8xbf16>
    %cst_151 = arith.constant dense<0.000000e+00> : vector<128x8xf32>
    %222 = tpu.matmul %219, %221, %cst_151 {dimension_numbers = #tpu.dot_dimension_numbers<[1], [0], [0], [1], [0, 0, 1, 1], [], []>} : vector<128x8xbf16>, vector<8x8xbf16>, vector<128x8xf32> -> vector<128x8xf32>
    %223 = arith.addf %216, %222 : vector<128x8xf32>
    %224 = vector.extract_strided_slice %0 {offsets = [0, 1, 1, 0], sizes = [2, 8, 8, 8], strides = [1, 1, 1, 1]} : vector<2x10x10x8xf32> to vector<2x8x8x8xf32>
    %225 = vector.shape_cast %224 : vector<2x8x8x8xf32> to vector<128x8xf32>
    %c0_152 = arith.constant 0 : index
    %c0_153 = arith.constant 0 : index
    %226 = vector.load %arg5[%c0_152, %c0_153] : memref<1x8xf32, #tpu.memory_space<vmem>>, vector<1x8xf32>
    %c0_154 = arith.constant 0 : index
    %c0_155 = arith.constant 0 : index
    %227 = vector.load %arg6[%c0_154, %c0_155] : memref<1x8xf32, #tpu.memory_space<vmem>>, vector<1x8xf32>
    %cst_156 = arith.constant dense<0.000000e+00> : vector<8xf32>
    %228 = vector.multi_reduction <add>, %223, %cst_156 [0] : vector<128x8xf32> to vector<8xf32>
    %229 = vector.shape_cast %228 : vector<8xf32> to vector<1x8xf32>
    %230 = arith.mulf %223, %223 : vector<128x8xf32>
    %cst_157 = arith.constant dense<0.000000e+00> : vector<8xf32>
    %231 = vector.multi_reduction <add>, %230, %cst_157 [0] : vector<128x8xf32> to vector<8xf32>
    %232 = vector.shape_cast %231 : vector<8xf32> to vector<1x8xf32>
    %cst_158 = arith.constant 7.812500e-03 : f32
    %233 = vector.broadcast %cst_158 : f32 to vector<1x8xf32>
    %234 = arith.mulf %229, %233 : vector<1x8xf32>
    %cst_159 = arith.constant 7.812500e-03 : f32
    %235 = vector.broadcast %cst_159 : f32 to vector<1x8xf32>
    %236 = arith.mulf %232, %235 : vector<1x8xf32>
    %237 = arith.mulf %234, %234 : vector<1x8xf32>
    %238 = arith.subf %236, %237 : vector<1x8xf32>
    %cst_160 = arith.constant 0.000000e+00 : f32
    %239 = vector.broadcast %cst_160 : f32 to vector<1x8xf32>
    %240 = arith.maximumf %238, %239 : vector<1x8xf32>
    %241 = vector.broadcast %234 : vector<1x8xf32> to vector<128x8xf32>
    %242 = arith.subf %223, %241 : vector<128x8xf32>
    %cst_161 = arith.constant 9.99999974E-6 : f32
    %243 = vector.broadcast %cst_161 : f32 to vector<1x8xf32>
    %244 = arith.addf %240, %243 : vector<1x8xf32>
    %245 = math.rsqrt %244 : vector<1x8xf32>
    %246 = vector.broadcast %245 : vector<1x8xf32> to vector<128x8xf32>
    %247 = arith.mulf %242, %246 : vector<128x8xf32>
    %248 = vector.broadcast %226 : vector<1x8xf32> to vector<128x8xf32>
    %249 = arith.mulf %247, %248 : vector<128x8xf32>
    %250 = vector.broadcast %227 : vector<1x8xf32> to vector<128x8xf32>
    %251 = arith.addf %249, %250 : vector<128x8xf32>
    %252 = arith.addf %251, %225 : vector<128x8xf32>
    %cst_162 = arith.constant 0.000000e+00 : f32
    %253 = vector.broadcast %cst_162 : f32 to vector<128x8xf32>
    %254 = arith.maximumf %252, %253 : vector<128x8xf32>
    %c0_163 = arith.constant 0 : index
    %c0_164 = arith.constant 0 : index
    %255 = vector.load %arg7[%c0_163, %c0_164] : memref<128x8xf32, #tpu.memory_space<vmem>>, vector<128x8xf32>
    tpu.vector_store %arg7[%c0_163, %c0_164], %254 {strides = array<i32>} : memref<128x8xf32, #tpu.memory_space<vmem>>, vector<128x8xf32>,
    return
  }
}

module attributes {stable_mosaic.version = 11 : i64} {
  func.func @_stem_kernel(%arg0: memref<2x11x11x12xf32, #tpu.memory_space<vmem>>, %arg1: memref<16x12x8xbf16, #tpu.memory_space<vmem>>, %arg2: memref<1x8xf32, #tpu.memory_space<vmem>>, %arg3: memref<1x8xf32, #tpu.memory_space<vmem>>, %arg4: memref<128x8xf32, #tpu.memory_space<vmem>>) attributes {dimension_semantics = [], scalar_prefetch = 0 : i64, scratch_operands = 0 : i64, tpu.core_type = #tpu.core_type<tc>} {
    %c0 = arith.constant 0 : index
    %c0_0 = arith.constant 0 : index
    %c0_1 = arith.constant 0 : index
    %c0_2 = arith.constant 0 : index
    %0 = vector.load %arg0[%c0, %c0_0, %c0_1, %c0_2] : memref<2x11x11x12xf32, #tpu.memory_space<vmem>>, vector<2x11x11x12xf32>
    %cst = arith.constant 0.000000e+00 : f32
    %1 = vector.broadcast %cst : f32 to vector<128x8xf32>
    %2 = vector.extract_strided_slice %0 {offsets = [0, 0, 0, 0], sizes = [2, 8, 8, 12], strides = [1, 1, 1, 1]} : vector<2x11x11x12xf32> to vector<2x8x8x12xf32>
    %3 = vector.shape_cast %2 : vector<2x8x8x12xf32> to vector<128x12xf32>
    %4 = arith.truncf %3 : vector<128x12xf32> to vector<128x12xbf16>
    %c0_3 = arith.constant 0 : index
    %c0_4 = arith.constant 0 : index
    %c0_5 = arith.constant 0 : index
    %5 = vector.load %arg1[%c0_3, %c0_4, %c0_5] : memref<16x12x8xbf16, #tpu.memory_space<vmem>>, vector<1x12x8xbf16>
    %6 = vector.shape_cast %5 : vector<1x12x8xbf16> to vector<12x8xbf16>
    %cst_6 = arith.constant dense<0.000000e+00> : vector<128x8xf32>
    %7 = tpu.matmul %4, %6, %cst_6 {dimension_numbers = #tpu.dot_dimension_numbers<[1], [0], [0], [1], [0, 0, 1, 1], [], []>} : vector<128x12xbf16>, vector<12x8xbf16>, vector<128x8xf32> -> vector<128x8xf32>
    %8 = arith.addf %1, %7 : vector<128x8xf32>
    %9 = vector.extract_strided_slice %0 {offsets = [0, 0, 1, 0], sizes = [2, 8, 8, 12], strides = [1, 1, 1, 1]} : vector<2x11x11x12xf32> to vector<2x8x8x12xf32>
    %10 = vector.shape_cast %9 : vector<2x8x8x12xf32> to vector<128x12xf32>
    %11 = arith.truncf %10 : vector<128x12xf32> to vector<128x12xbf16>
    %c1 = arith.constant 1 : index
    %c0_7 = arith.constant 0 : index
    %c0_8 = arith.constant 0 : index
    %12 = vector.load %arg1[%c1, %c0_7, %c0_8] : memref<16x12x8xbf16, #tpu.memory_space<vmem>>, vector<1x12x8xbf16>
    %13 = vector.shape_cast %12 : vector<1x12x8xbf16> to vector<12x8xbf16>
    %cst_9 = arith.constant dense<0.000000e+00> : vector<128x8xf32>
    %14 = tpu.matmul %11, %13, %cst_9 {dimension_numbers = #tpu.dot_dimension_numbers<[1], [0], [0], [1], [0, 0, 1, 1], [], []>} : vector<128x12xbf16>, vector<12x8xbf16>, vector<128x8xf32> -> vector<128x8xf32>
    %15 = arith.addf %8, %14 : vector<128x8xf32>
    %16 = vector.extract_strided_slice %0 {offsets = [0, 0, 2, 0], sizes = [2, 8, 8, 12], strides = [1, 1, 1, 1]} : vector<2x11x11x12xf32> to vector<2x8x8x12xf32>
    %17 = vector.shape_cast %16 : vector<2x8x8x12xf32> to vector<128x12xf32>
    %18 = arith.truncf %17 : vector<128x12xf32> to vector<128x12xbf16>
    %c2 = arith.constant 2 : index
    %c0_10 = arith.constant 0 : index
    %c0_11 = arith.constant 0 : index
    %19 = vector.load %arg1[%c2, %c0_10, %c0_11] : memref<16x12x8xbf16, #tpu.memory_space<vmem>>, vector<1x12x8xbf16>
    %20 = vector.shape_cast %19 : vector<1x12x8xbf16> to vector<12x8xbf16>
    %cst_12 = arith.constant dense<0.000000e+00> : vector<128x8xf32>
    %21 = tpu.matmul %18, %20, %cst_12 {dimension_numbers = #tpu.dot_dimension_numbers<[1], [0], [0], [1], [0, 0, 1, 1], [], []>} : vector<128x12xbf16>, vector<12x8xbf16>, vector<128x8xf32> -> vector<128x8xf32>
    %22 = arith.addf %15, %21 : vector<128x8xf32>
    %23 = vector.extract_strided_slice %0 {offsets = [0, 0, 3, 0], sizes = [2, 8, 8, 12], strides = [1, 1, 1, 1]} : vector<2x11x11x12xf32> to vector<2x8x8x12xf32>
    %24 = vector.shape_cast %23 : vector<2x8x8x12xf32> to vector<128x12xf32>
    %25 = arith.truncf %24 : vector<128x12xf32> to vector<128x12xbf16>
    %c3 = arith.constant 3 : index
    %c0_13 = arith.constant 0 : index
    %c0_14 = arith.constant 0 : index
    %26 = vector.load %arg1[%c3, %c0_13, %c0_14] : memref<16x12x8xbf16, #tpu.memory_space<vmem>>, vector<1x12x8xbf16>
    %27 = vector.shape_cast %26 : vector<1x12x8xbf16> to vector<12x8xbf16>
    %cst_15 = arith.constant dense<0.000000e+00> : vector<128x8xf32>
    %28 = tpu.matmul %25, %27, %cst_15 {dimension_numbers = #tpu.dot_dimension_numbers<[1], [0], [0], [1], [0, 0, 1, 1], [], []>} : vector<128x12xbf16>, vector<12x8xbf16>, vector<128x8xf32> -> vector<128x8xf32>
    %29 = arith.addf %22, %28 : vector<128x8xf32>
    %30 = vector.extract_strided_slice %0 {offsets = [0, 1, 0, 0], sizes = [2, 8, 8, 12], strides = [1, 1, 1, 1]} : vector<2x11x11x12xf32> to vector<2x8x8x12xf32>
    %31 = vector.shape_cast %30 : vector<2x8x8x12xf32> to vector<128x12xf32>
    %32 = arith.truncf %31 : vector<128x12xf32> to vector<128x12xbf16>
    %c4 = arith.constant 4 : index
    %c0_16 = arith.constant 0 : index
    %c0_17 = arith.constant 0 : index
    %33 = vector.load %arg1[%c4, %c0_16, %c0_17] : memref<16x12x8xbf16, #tpu.memory_space<vmem>>, vector<1x12x8xbf16>
    %34 = vector.shape_cast %33 : vector<1x12x8xbf16> to vector<12x8xbf16>
    %cst_18 = arith.constant dense<0.000000e+00> : vector<128x8xf32>
    %35 = tpu.matmul %32, %34, %cst_18 {dimension_numbers = #tpu.dot_dimension_numbers<[1], [0], [0], [1], [0, 0, 1, 1], [], []>} : vector<128x12xbf16>, vector<12x8xbf16>, vector<128x8xf32> -> vector<128x8xf32>
    %36 = arith.addf %29, %35 : vector<128x8xf32>
    %37 = vector.extract_strided_slice %0 {offsets = [0, 1, 1, 0], sizes = [2, 8, 8, 12], strides = [1, 1, 1, 1]} : vector<2x11x11x12xf32> to vector<2x8x8x12xf32>
    %38 = vector.shape_cast %37 : vector<2x8x8x12xf32> to vector<128x12xf32>
    %39 = arith.truncf %38 : vector<128x12xf32> to vector<128x12xbf16>
    %c5 = arith.constant 5 : index
    %c0_19 = arith.constant 0 : index
    %c0_20 = arith.constant 0 : index
    %40 = vector.load %arg1[%c5, %c0_19, %c0_20] : memref<16x12x8xbf16, #tpu.memory_space<vmem>>, vector<1x12x8xbf16>
    %41 = vector.shape_cast %40 : vector<1x12x8xbf16> to vector<12x8xbf16>
    %cst_21 = arith.constant dense<0.000000e+00> : vector<128x8xf32>
    %42 = tpu.matmul %39, %41, %cst_21 {dimension_numbers = #tpu.dot_dimension_numbers<[1], [0], [0], [1], [0, 0, 1, 1], [], []>} : vector<128x12xbf16>, vector<12x8xbf16>, vector<128x8xf32> -> vector<128x8xf32>
    %43 = arith.addf %36, %42 : vector<128x8xf32>
    %44 = vector.extract_strided_slice %0 {offsets = [0, 1, 2, 0], sizes = [2, 8, 8, 12], strides = [1, 1, 1, 1]} : vector<2x11x11x12xf32> to vector<2x8x8x12xf32>
    %45 = vector.shape_cast %44 : vector<2x8x8x12xf32> to vector<128x12xf32>
    %46 = arith.truncf %45 : vector<128x12xf32> to vector<128x12xbf16>
    %c6 = arith.constant 6 : index
    %c0_22 = arith.constant 0 : index
    %c0_23 = arith.constant 0 : index
    %47 = vector.load %arg1[%c6, %c0_22, %c0_23] : memref<16x12x8xbf16, #tpu.memory_space<vmem>>, vector<1x12x8xbf16>
    %48 = vector.shape_cast %47 : vector<1x12x8xbf16> to vector<12x8xbf16>
    %cst_24 = arith.constant dense<0.000000e+00> : vector<128x8xf32>
    %49 = tpu.matmul %46, %48, %cst_24 {dimension_numbers = #tpu.dot_dimension_numbers<[1], [0], [0], [1], [0, 0, 1, 1], [], []>} : vector<128x12xbf16>, vector<12x8xbf16>, vector<128x8xf32> -> vector<128x8xf32>
    %50 = arith.addf %43, %49 : vector<128x8xf32>
    %51 = vector.extract_strided_slice %0 {offsets = [0, 1, 3, 0], sizes = [2, 8, 8, 12], strides = [1, 1, 1, 1]} : vector<2x11x11x12xf32> to vector<2x8x8x12xf32>
    %52 = vector.shape_cast %51 : vector<2x8x8x12xf32> to vector<128x12xf32>
    %53 = arith.truncf %52 : vector<128x12xf32> to vector<128x12xbf16>
    %c7 = arith.constant 7 : index
    %c0_25 = arith.constant 0 : index
    %c0_26 = arith.constant 0 : index
    %54 = vector.load %arg1[%c7, %c0_25, %c0_26] : memref<16x12x8xbf16, #tpu.memory_space<vmem>>, vector<1x12x8xbf16>
    %55 = vector.shape_cast %54 : vector<1x12x8xbf16> to vector<12x8xbf16>
    %cst_27 = arith.constant dense<0.000000e+00> : vector<128x8xf32>
    %56 = tpu.matmul %53, %55, %cst_27 {dimension_numbers = #tpu.dot_dimension_numbers<[1], [0], [0], [1], [0, 0, 1, 1], [], []>} : vector<128x12xbf16>, vector<12x8xbf16>, vector<128x8xf32> -> vector<128x8xf32>
    %57 = arith.addf %50, %56 : vector<128x8xf32>
    %58 = vector.extract_strided_slice %0 {offsets = [0, 2, 0, 0], sizes = [2, 8, 8, 12], strides = [1, 1, 1, 1]} : vector<2x11x11x12xf32> to vector<2x8x8x12xf32>
    %59 = vector.shape_cast %58 : vector<2x8x8x12xf32> to vector<128x12xf32>
    %60 = arith.truncf %59 : vector<128x12xf32> to vector<128x12xbf16>
    %c8 = arith.constant 8 : index
    %c0_28 = arith.constant 0 : index
    %c0_29 = arith.constant 0 : index
    %61 = vector.load %arg1[%c8, %c0_28, %c0_29] : memref<16x12x8xbf16, #tpu.memory_space<vmem>>, vector<1x12x8xbf16>
    %62 = vector.shape_cast %61 : vector<1x12x8xbf16> to vector<12x8xbf16>
    %cst_30 = arith.constant dense<0.000000e+00> : vector<128x8xf32>
    %63 = tpu.matmul %60, %62, %cst_30 {dimension_numbers = #tpu.dot_dimension_numbers<[1], [0], [0], [1], [0, 0, 1, 1], [], []>} : vector<128x12xbf16>, vector<12x8xbf16>, vector<128x8xf32> -> vector<128x8xf32>
    %64 = arith.addf %57, %63 : vector<128x8xf32>
    %65 = vector.extract_strided_slice %0 {offsets = [0, 2, 1, 0], sizes = [2, 8, 8, 12], strides = [1, 1, 1, 1]} : vector<2x11x11x12xf32> to vector<2x8x8x12xf32>
    %66 = vector.shape_cast %65 : vector<2x8x8x12xf32> to vector<128x12xf32>
    %67 = arith.truncf %66 : vector<128x12xf32> to vector<128x12xbf16>
    %c9 = arith.constant 9 : index
    %c0_31 = arith.constant 0 : index
    %c0_32 = arith.constant 0 : index
    %68 = vector.load %arg1[%c9, %c0_31, %c0_32] : memref<16x12x8xbf16, #tpu.memory_space<vmem>>, vector<1x12x8xbf16>
    %69 = vector.shape_cast %68 : vector<1x12x8xbf16> to vector<12x8xbf16>
    %cst_33 = arith.constant dense<0.000000e+00> : vector<128x8xf32>
    %70 = tpu.matmul %67, %69, %cst_33 {dimension_numbers = #tpu.dot_dimension_numbers<[1], [0], [0], [1], [0, 0, 1, 1], [], []>} : vector<128x12xbf16>, vector<12x8xbf16>, vector<128x8xf32> -> vector<128x8xf32>
    %71 = arith.addf %64, %70 : vector<128x8xf32>
    %72 = vector.extract_strided_slice %0 {offsets = [0, 2, 2, 0], sizes = [2, 8, 8, 12], strides = [1, 1, 1, 1]} : vector<2x11x11x12xf32> to vector<2x8x8x12xf32>
    %73 = vector.shape_cast %72 : vector<2x8x8x12xf32> to vector<128x12xf32>
    %74 = arith.truncf %73 : vector<128x12xf32> to vector<128x12xbf16>
    %c10 = arith.constant 10 : index
    %c0_34 = arith.constant 0 : index
    %c0_35 = arith.constant 0 : index
    %75 = vector.load %arg1[%c10, %c0_34, %c0_35] : memref<16x12x8xbf16, #tpu.memory_space<vmem>>, vector<1x12x8xbf16>
    %76 = vector.shape_cast %75 : vector<1x12x8xbf16> to vector<12x8xbf16>
    %cst_36 = arith.constant dense<0.000000e+00> : vector<128x8xf32>
    %77 = tpu.matmul %74, %76, %cst_36 {dimension_numbers = #tpu.dot_dimension_numbers<[1], [0], [0], [1], [0, 0, 1, 1], [], []>} : vector<128x12xbf16>, vector<12x8xbf16>, vector<128x8xf32> -> vector<128x8xf32>
    %78 = arith.addf %71, %77 : vector<128x8xf32>
    %79 = vector.extract_strided_slice %0 {offsets = [0, 2, 3, 0], sizes = [2, 8, 8, 12], strides = [1, 1, 1, 1]} : vector<2x11x11x12xf32> to vector<2x8x8x12xf32>
    %80 = vector.shape_cast %79 : vector<2x8x8x12xf32> to vector<128x12xf32>
    %81 = arith.truncf %80 : vector<128x12xf32> to vector<128x12xbf16>
    %c11 = arith.constant 11 : index
    %c0_37 = arith.constant 0 : index
    %c0_38 = arith.constant 0 : index
    %82 = vector.load %arg1[%c11, %c0_37, %c0_38] : memref<16x12x8xbf16, #tpu.memory_space<vmem>>, vector<1x12x8xbf16>
    %83 = vector.shape_cast %82 : vector<1x12x8xbf16> to vector<12x8xbf16>
    %cst_39 = arith.constant dense<0.000000e+00> : vector<128x8xf32>
    %84 = tpu.matmul %81, %83, %cst_39 {dimension_numbers = #tpu.dot_dimension_numbers<[1], [0], [0], [1], [0, 0, 1, 1], [], []>} : vector<128x12xbf16>, vector<12x8xbf16>, vector<128x8xf32> -> vector<128x8xf32>
    %85 = arith.addf %78, %84 : vector<128x8xf32>
    %86 = vector.extract_strided_slice %0 {offsets = [0, 3, 0, 0], sizes = [2, 8, 8, 12], strides = [1, 1, 1, 1]} : vector<2x11x11x12xf32> to vector<2x8x8x12xf32>
    %87 = vector.shape_cast %86 : vector<2x8x8x12xf32> to vector<128x12xf32>
    %88 = arith.truncf %87 : vector<128x12xf32> to vector<128x12xbf16>
    %c12 = arith.constant 12 : index
    %c0_40 = arith.constant 0 : index
    %c0_41 = arith.constant 0 : index
    %89 = vector.load %arg1[%c12, %c0_40, %c0_41] : memref<16x12x8xbf16, #tpu.memory_space<vmem>>, vector<1x12x8xbf16>
    %90 = vector.shape_cast %89 : vector<1x12x8xbf16> to vector<12x8xbf16>
    %cst_42 = arith.constant dense<0.000000e+00> : vector<128x8xf32>
    %91 = tpu.matmul %88, %90, %cst_42 {dimension_numbers = #tpu.dot_dimension_numbers<[1], [0], [0], [1], [0, 0, 1, 1], [], []>} : vector<128x12xbf16>, vector<12x8xbf16>, vector<128x8xf32> -> vector<128x8xf32>
    %92 = arith.addf %85, %91 : vector<128x8xf32>
    %93 = vector.extract_strided_slice %0 {offsets = [0, 3, 1, 0], sizes = [2, 8, 8, 12], strides = [1, 1, 1, 1]} : vector<2x11x11x12xf32> to vector<2x8x8x12xf32>
    %94 = vector.shape_cast %93 : vector<2x8x8x12xf32> to vector<128x12xf32>
    %95 = arith.truncf %94 : vector<128x12xf32> to vector<128x12xbf16>
    %c13 = arith.constant 13 : index
    %c0_43 = arith.constant 0 : index
    %c0_44 = arith.constant 0 : index
    %96 = vector.load %arg1[%c13, %c0_43, %c0_44] : memref<16x12x8xbf16, #tpu.memory_space<vmem>>, vector<1x12x8xbf16>
    %97 = vector.shape_cast %96 : vector<1x12x8xbf16> to vector<12x8xbf16>
    %cst_45 = arith.constant dense<0.000000e+00> : vector<128x8xf32>
    %98 = tpu.matmul %95, %97, %cst_45 {dimension_numbers = #tpu.dot_dimension_numbers<[1], [0], [0], [1], [0, 0, 1, 1], [], []>} : vector<128x12xbf16>, vector<12x8xbf16>, vector<128x8xf32> -> vector<128x8xf32>
    %99 = arith.addf %92, %98 : vector<128x8xf32>
    %100 = vector.extract_strided_slice %0 {offsets = [0, 3, 2, 0], sizes = [2, 8, 8, 12], strides = [1, 1, 1, 1]} : vector<2x11x11x12xf32> to vector<2x8x8x12xf32>
    %101 = vector.shape_cast %100 : vector<2x8x8x12xf32> to vector<128x12xf32>
    %102 = arith.truncf %101 : vector<128x12xf32> to vector<128x12xbf16>
    %c14 = arith.constant 14 : index
    %c0_46 = arith.constant 0 : index
    %c0_47 = arith.constant 0 : index
    %103 = vector.load %arg1[%c14, %c0_46, %c0_47] : memref<16x12x8xbf16, #tpu.memory_space<vmem>>, vector<1x12x8xbf16>
    %104 = vector.shape_cast %103 : vector<1x12x8xbf16> to vector<12x8xbf16>
    %cst_48 = arith.constant dense<0.000000e+00> : vector<128x8xf32>
    %105 = tpu.matmul %102, %104, %cst_48 {dimension_numbers = #tpu.dot_dimension_numbers<[1], [0], [0], [1], [0, 0, 1, 1], [], []>} : vector<128x12xbf16>, vector<12x8xbf16>, vector<128x8xf32> -> vector<128x8xf32>
    %106 = arith.addf %99, %105 : vector<128x8xf32>
    %107 = vector.extract_strided_slice %0 {offsets = [0, 3, 3, 0], sizes = [2, 8, 8, 12], strides = [1, 1, 1, 1]} : vector<2x11x11x12xf32> to vector<2x8x8x12xf32>
    %108 = vector.shape_cast %107 : vector<2x8x8x12xf32> to vector<128x12xf32>
    %109 = arith.truncf %108 : vector<128x12xf32> to vector<128x12xbf16>
    %c15 = arith.constant 15 : index
    %c0_49 = arith.constant 0 : index
    %c0_50 = arith.constant 0 : index
    %110 = vector.load %arg1[%c15, %c0_49, %c0_50] : memref<16x12x8xbf16, #tpu.memory_space<vmem>>, vector<1x12x8xbf16>
    %111 = vector.shape_cast %110 : vector<1x12x8xbf16> to vector<12x8xbf16>
    %cst_51 = arith.constant dense<0.000000e+00> : vector<128x8xf32>
    %112 = tpu.matmul %109, %111, %cst_51 {dimension_numbers = #tpu.dot_dimension_numbers<[1], [0], [0], [1], [0, 0, 1, 1], [], []>} : vector<128x12xbf16>, vector<12x8xbf16>, vector<128x8xf32> -> vector<128x8xf32>
    %113 = arith.addf %106, %112 : vector<128x8xf32>
    %c0_52 = arith.constant 0 : index
    %c0_53 = arith.constant 0 : index
    %114 = vector.load %arg2[%c0_52, %c0_53] : memref<1x8xf32, #tpu.memory_space<vmem>>, vector<1x8xf32>
    %c0_54 = arith.constant 0 : index
    %c0_55 = arith.constant 0 : index
    %115 = vector.load %arg3[%c0_54, %c0_55] : memref<1x8xf32, #tpu.memory_space<vmem>>, vector<1x8xf32>
    %cst_56 = arith.constant dense<0.000000e+00> : vector<8xf32>
    %116 = vector.multi_reduction <add>, %113, %cst_56 [0] : vector<128x8xf32> to vector<8xf32>
    %117 = vector.shape_cast %116 : vector<8xf32> to vector<1x8xf32>
    %118 = arith.mulf %113, %113 : vector<128x8xf32>
    %cst_57 = arith.constant dense<0.000000e+00> : vector<8xf32>
    %119 = vector.multi_reduction <add>, %118, %cst_57 [0] : vector<128x8xf32> to vector<8xf32>
    %120 = vector.shape_cast %119 : vector<8xf32> to vector<1x8xf32>
    %cst_58 = arith.constant 7.812500e-03 : f32
    %121 = vector.broadcast %cst_58 : f32 to vector<1x8xf32>
    %122 = arith.mulf %117, %121 : vector<1x8xf32>
    %cst_59 = arith.constant 7.812500e-03 : f32
    %123 = vector.broadcast %cst_59 : f32 to vector<1x8xf32>
    %124 = arith.mulf %120, %123 : vector<1x8xf32>
    %125 = arith.mulf %122, %122 : vector<1x8xf32>
    %126 = arith.subf %124, %125 : vector<1x8xf32>
    %cst_60 = arith.constant 0.000000e+00 : f32
    %127 = vector.broadcast %cst_60 : f32 to vector<1x8xf32>
    %128 = arith.maximumf %126, %127 : vector<1x8xf32>
    %129 = vector.broadcast %122 : vector<1x8xf32> to vector<128x8xf32>
    %130 = arith.subf %113, %129 : vector<128x8xf32>
    %cst_61 = arith.constant 9.99999974E-6 : f32
    %131 = vector.broadcast %cst_61 : f32 to vector<1x8xf32>
    %132 = arith.addf %128, %131 : vector<1x8xf32>
    %133 = math.rsqrt %132 : vector<1x8xf32>
    %134 = vector.broadcast %133 : vector<1x8xf32> to vector<128x8xf32>
    %135 = arith.mulf %130, %134 : vector<128x8xf32>
    %136 = vector.broadcast %114 : vector<1x8xf32> to vector<128x8xf32>
    %137 = arith.mulf %135, %136 : vector<128x8xf32>
    %138 = vector.broadcast %115 : vector<1x8xf32> to vector<128x8xf32>
    %139 = arith.addf %137, %138 : vector<128x8xf32>
    %cst_62 = arith.constant 0.000000e+00 : f32
    %140 = vector.broadcast %cst_62 : f32 to vector<128x8xf32>
    %141 = arith.maximumf %139, %140 : vector<128x8xf32>
    %c0_63 = arith.constant 0 : index
    %c0_64 = arith.constant 0 : index
    %142 = vector.load %arg4[%c0_63, %c0_64] : memref<128x8xf32, #tpu.memory_space<vmem>>, vector<128x8xf32>
    tpu.vector_store %arg4[%c0_63, %c0_64], %141 {strides = array<i32>} : memref<128x8xf32, #tpu.memory_space<vmem>>, vector<128x8xf32>,
    return
  }
}

module attributes {stable_mosaic.version = 11 : i64} {
  func.func @_conv1x1_bn_relu_kernel(%arg0: memref<128x8xf32, #tpu.memory_space<vmem>>, %arg1: memref<8x4xbf16, #tpu.memory_space<vmem>>, %arg2: memref<1x4xf32, #tpu.memory_space<vmem>>, %arg3: memref<1x4xf32, #tpu.memory_space<vmem>>, %arg4: memref<128x4xf32, #tpu.memory_space<vmem>>) attributes {dimension_semantics = [], scalar_prefetch = 0 : i64, scratch_operands = 0 : i64, tpu.core_type = #tpu.core_type<tc>} {
    %c0 = arith.constant 0 : index
    %c0_0 = arith.constant 0 : index
    %0 = vector.load %arg0[%c0, %c0_0] : memref<128x8xf32, #tpu.memory_space<vmem>>, vector<128x8xf32>
    %1 = arith.truncf %0 : vector<128x8xf32> to vector<128x8xbf16>
    %c0_1 = arith.constant 0 : index
    %c0_2 = arith.constant 0 : index
    %2 = vector.load %arg1[%c0_1, %c0_2] : memref<8x4xbf16, #tpu.memory_space<vmem>>, vector<8x4xbf16>
    %cst = arith.constant dense<0.000000e+00> : vector<128x4xf32>
    %3 = tpu.matmul %1, %2, %cst {dimension_numbers = #tpu.dot_dimension_numbers<[1], [0], [0], [1], [0, 0, 1, 1], [], []>} : vector<128x8xbf16>, vector<8x4xbf16>, vector<128x4xf32> -> vector<128x4xf32>
    %c0_3 = arith.constant 0 : index
    %c0_4 = arith.constant 0 : index
    %4 = vector.load %arg2[%c0_3, %c0_4] : memref<1x4xf32, #tpu.memory_space<vmem>>, vector<1x4xf32>
    %c0_5 = arith.constant 0 : index
    %c0_6 = arith.constant 0 : index
    %5 = vector.load %arg3[%c0_5, %c0_6] : memref<1x4xf32, #tpu.memory_space<vmem>>, vector<1x4xf32>
    %cst_7 = arith.constant dense<0.000000e+00> : vector<4xf32>
    %6 = vector.multi_reduction <add>, %3, %cst_7 [0] : vector<128x4xf32> to vector<4xf32>
    %7 = vector.shape_cast %6 : vector<4xf32> to vector<1x4xf32>
    %8 = arith.mulf %3, %3 : vector<128x4xf32>
    %cst_8 = arith.constant dense<0.000000e+00> : vector<4xf32>
    %9 = vector.multi_reduction <add>, %8, %cst_8 [0] : vector<128x4xf32> to vector<4xf32>
    %10 = vector.shape_cast %9 : vector<4xf32> to vector<1x4xf32>
    %cst_9 = arith.constant 7.812500e-03 : f32
    %11 = vector.broadcast %cst_9 : f32 to vector<1x4xf32>
    %12 = arith.mulf %7, %11 : vector<1x4xf32>
    %cst_10 = arith.constant 7.812500e-03 : f32
    %13 = vector.broadcast %cst_10 : f32 to vector<1x4xf32>
    %14 = arith.mulf %10, %13 : vector<1x4xf32>
    %15 = arith.mulf %12, %12 : vector<1x4xf32>
    %16 = arith.subf %14, %15 : vector<1x4xf32>
    %cst_11 = arith.constant 0.000000e+00 : f32
    %17 = vector.broadcast %cst_11 : f32 to vector<1x4xf32>
    %18 = arith.maximumf %16, %17 : vector<1x4xf32>
    %19 = vector.broadcast %12 : vector<1x4xf32> to vector<128x4xf32>
    %20 = arith.subf %3, %19 : vector<128x4xf32>
    %cst_12 = arith.constant 9.99999974E-6 : f32
    %21 = vector.broadcast %cst_12 : f32 to vector<1x4xf32>
    %22 = arith.addf %18, %21 : vector<1x4xf32>
    %23 = math.rsqrt %22 : vector<1x4xf32>
    %24 = vector.broadcast %23 : vector<1x4xf32> to vector<128x4xf32>
    %25 = arith.mulf %20, %24 : vector<128x4xf32>
    %26 = vector.broadcast %4 : vector<1x4xf32> to vector<128x4xf32>
    %27 = arith.mulf %25, %26 : vector<128x4xf32>
    %28 = vector.broadcast %5 : vector<1x4xf32> to vector<128x4xf32>
    %29 = arith.addf %27, %28 : vector<128x4xf32>
    %cst_13 = arith.constant 0.000000e+00 : f32
    %30 = vector.broadcast %cst_13 : f32 to vector<128x4xf32>
    %31 = arith.maximumf %29, %30 : vector<128x4xf32>
    %c0_14 = arith.constant 0 : index
    %c0_15 = arith.constant 0 : index
    %32 = vector.load %arg4[%c0_14, %c0_15] : memref<128x4xf32, #tpu.memory_space<vmem>>, vector<128x4xf32>
    tpu.vector_store %arg4[%c0_14, %c0_15], %31 {strides = array<i32>} : memref<128x4xf32, #tpu.memory_space<vmem>>, vector<128x4xf32>,
    return
  }
}

module attributes {stable_mosaic.version = 11 : i64} {
  func.func @_bneck_tail_head_kernel(%arg0: memref<32x36xf32, #tpu.memory_space<vmem>>, %arg1: memref<36x4xbf16, #tpu.memory_space<vmem>>, %arg2: memref<1x4xf32, #tpu.memory_space<vmem>>, %arg3: memref<1x4xf32, #tpu.memory_space<vmem>>, %arg4: memref<4x16xbf16, #tpu.memory_space<vmem>>, %arg5: memref<1x16xf32, #tpu.memory_space<vmem>>, %arg6: memref<1x16xf32, #tpu.memory_space<vmem>>, %arg7: memref<32x8xf32, #tpu.memory_space<vmem>>, %arg8: memref<8x16xbf16, #tpu.memory_space<vmem>>, %arg9: memref<2x32xbf16, #tpu.memory_space<vmem>>, %arg10: memref<16x10xbf16, #tpu.memory_space<vmem>>, %arg11: memref<1x10xf32, #tpu.memory_space<vmem>>, %arg12: memref<2x10xf32, #tpu.memory_space<vmem>>) attributes {dimension_semantics = [], scalar_prefetch = 0 : i64, scratch_operands = 0 : i64, tpu.core_type = #tpu.core_type<tc>} {
    %c0 = arith.constant 0 : index
    %c0_0 = arith.constant 0 : index
    %0 = vector.load %arg0[%c0, %c0_0] : memref<32x36xf32, #tpu.memory_space<vmem>>, vector<32x36xf32>
    %1 = arith.truncf %0 : vector<32x36xf32> to vector<32x36xbf16>
    %c0_1 = arith.constant 0 : index
    %c0_2 = arith.constant 0 : index
    %2 = vector.load %arg1[%c0_1, %c0_2] : memref<36x4xbf16, #tpu.memory_space<vmem>>, vector<36x4xbf16>
    %cst = arith.constant dense<0.000000e+00> : vector<32x4xf32>
    %3 = tpu.matmul %1, %2, %cst {dimension_numbers = #tpu.dot_dimension_numbers<[1], [0], [0], [1], [0, 0, 1, 1], [], []>} : vector<32x36xbf16>, vector<36x4xbf16>, vector<32x4xf32> -> vector<32x4xf32>
    %c0_3 = arith.constant 0 : index
    %c0_4 = arith.constant 0 : index
    %4 = vector.load %arg2[%c0_3, %c0_4] : memref<1x4xf32, #tpu.memory_space<vmem>>, vector<1x4xf32>
    %c0_5 = arith.constant 0 : index
    %c0_6 = arith.constant 0 : index
    %5 = vector.load %arg3[%c0_5, %c0_6] : memref<1x4xf32, #tpu.memory_space<vmem>>, vector<1x4xf32>
    %cst_7 = arith.constant dense<0.000000e+00> : vector<4xf32>
    %6 = vector.multi_reduction <add>, %3, %cst_7 [0] : vector<32x4xf32> to vector<4xf32>
    %7 = vector.shape_cast %6 : vector<4xf32> to vector<1x4xf32>
    %8 = arith.mulf %3, %3 : vector<32x4xf32>
    %cst_8 = arith.constant dense<0.000000e+00> : vector<4xf32>
    %9 = vector.multi_reduction <add>, %8, %cst_8 [0] : vector<32x4xf32> to vector<4xf32>
    %10 = vector.shape_cast %9 : vector<4xf32> to vector<1x4xf32>
    %cst_9 = arith.constant 3.125000e-02 : f32
    %11 = vector.broadcast %cst_9 : f32 to vector<1x4xf32>
    %12 = arith.mulf %7, %11 : vector<1x4xf32>
    %cst_10 = arith.constant 3.125000e-02 : f32
    %13 = vector.broadcast %cst_10 : f32 to vector<1x4xf32>
    %14 = arith.mulf %10, %13 : vector<1x4xf32>
    %15 = arith.mulf %12, %12 : vector<1x4xf32>
    %16 = arith.subf %14, %15 : vector<1x4xf32>
    %cst_11 = arith.constant 0.000000e+00 : f32
    %17 = vector.broadcast %cst_11 : f32 to vector<1x4xf32>
    %18 = arith.maximumf %16, %17 : vector<1x4xf32>
    %19 = vector.broadcast %12 : vector<1x4xf32> to vector<32x4xf32>
    %20 = arith.subf %3, %19 : vector<32x4xf32>
    %cst_12 = arith.constant 9.99999974E-6 : f32
    %21 = vector.broadcast %cst_12 : f32 to vector<1x4xf32>
    %22 = arith.addf %18, %21 : vector<1x4xf32>
    %23 = math.rsqrt %22 : vector<1x4xf32>
    %24 = vector.broadcast %23 : vector<1x4xf32> to vector<32x4xf32>
    %25 = arith.mulf %20, %24 : vector<32x4xf32>
    %26 = vector.broadcast %4 : vector<1x4xf32> to vector<32x4xf32>
    %27 = arith.mulf %25, %26 : vector<32x4xf32>
    %28 = vector.broadcast %5 : vector<1x4xf32> to vector<32x4xf32>
    %29 = arith.addf %27, %28 : vector<32x4xf32>
    %cst_13 = arith.constant 0.000000e+00 : f32
    %30 = vector.broadcast %cst_13 : f32 to vector<32x4xf32>
    %31 = arith.maximumf %29, %30 : vector<32x4xf32>
    %32 = arith.truncf %31 : vector<32x4xf32> to vector<32x4xbf16>
    %c0_14 = arith.constant 0 : index
    %c0_15 = arith.constant 0 : index
    %33 = vector.load %arg4[%c0_14, %c0_15] : memref<4x16xbf16, #tpu.memory_space<vmem>>, vector<4x16xbf16>
    %cst_16 = arith.constant dense<0.000000e+00> : vector<32x16xf32>
    %34 = tpu.matmul %32, %33, %cst_16 {dimension_numbers = #tpu.dot_dimension_numbers<[1], [0], [0], [1], [0, 0, 1, 1], [], []>} : vector<32x4xbf16>, vector<4x16xbf16>, vector<32x16xf32> -> vector<32x16xf32>
    %c0_17 = arith.constant 0 : index
    %c0_18 = arith.constant 0 : index
    %35 = vector.load %arg7[%c0_17, %c0_18] : memref<32x8xf32, #tpu.memory_space<vmem>>, vector<32x8xf32>
    %36 = arith.truncf %35 : vector<32x8xf32> to vector<32x8xbf16>
    %c0_19 = arith.constant 0 : index
    %c0_20 = arith.constant 0 : index
    %37 = vector.load %arg8[%c0_19, %c0_20] : memref<8x16xbf16, #tpu.memory_space<vmem>>, vector<8x16xbf16>
    %cst_21 = arith.constant dense<0.000000e+00> : vector<32x16xf32>
    %38 = tpu.matmul %36, %37, %cst_21 {dimension_numbers = #tpu.dot_dimension_numbers<[1], [0], [0], [1], [0, 0, 1, 1], [], []>} : vector<32x8xbf16>, vector<8x16xbf16>, vector<32x16xf32> -> vector<32x16xf32>
    %c0_22 = arith.constant 0 : index
    %c0_23 = arith.constant 0 : index
    %39 = vector.load %arg5[%c0_22, %c0_23] : memref<1x16xf32, #tpu.memory_space<vmem>>, vector<1x16xf32>
    %c0_24 = arith.constant 0 : index
    %c0_25 = arith.constant 0 : index
    %40 = vector.load %arg6[%c0_24, %c0_25] : memref<1x16xf32, #tpu.memory_space<vmem>>, vector<1x16xf32>
    %cst_26 = arith.constant dense<0.000000e+00> : vector<16xf32>
    %41 = vector.multi_reduction <add>, %34, %cst_26 [0] : vector<32x16xf32> to vector<16xf32>
    %42 = vector.shape_cast %41 : vector<16xf32> to vector<1x16xf32>
    %43 = arith.mulf %34, %34 : vector<32x16xf32>
    %cst_27 = arith.constant dense<0.000000e+00> : vector<16xf32>
    %44 = vector.multi_reduction <add>, %43, %cst_27 [0] : vector<32x16xf32> to vector<16xf32>
    %45 = vector.shape_cast %44 : vector<16xf32> to vector<1x16xf32>
    %cst_28 = arith.constant 3.125000e-02 : f32
    %46 = vector.broadcast %cst_28 : f32 to vector<1x16xf32>
    %47 = arith.mulf %42, %46 : vector<1x16xf32>
    %cst_29 = arith.constant 3.125000e-02 : f32
    %48 = vector.broadcast %cst_29 : f32 to vector<1x16xf32>
    %49 = arith.mulf %45, %48 : vector<1x16xf32>
    %50 = arith.mulf %47, %47 : vector<1x16xf32>
    %51 = arith.subf %49, %50 : vector<1x16xf32>
    %cst_30 = arith.constant 0.000000e+00 : f32
    %52 = vector.broadcast %cst_30 : f32 to vector<1x16xf32>
    %53 = arith.maximumf %51, %52 : vector<1x16xf32>
    %54 = vector.broadcast %47 : vector<1x16xf32> to vector<32x16xf32>
    %55 = arith.subf %34, %54 : vector<32x16xf32>
    %cst_31 = arith.constant 9.99999974E-6 : f32
    %56 = vector.broadcast %cst_31 : f32 to vector<1x16xf32>
    %57 = arith.addf %53, %56 : vector<1x16xf32>
    %58 = math.rsqrt %57 : vector<1x16xf32>
    %59 = vector.broadcast %58 : vector<1x16xf32> to vector<32x16xf32>
    %60 = arith.mulf %55, %59 : vector<32x16xf32>
    %61 = vector.broadcast %39 : vector<1x16xf32> to vector<32x16xf32>
    %62 = arith.mulf %60, %61 : vector<32x16xf32>
    %63 = vector.broadcast %40 : vector<1x16xf32> to vector<32x16xf32>
    %64 = arith.addf %62, %63 : vector<32x16xf32>
    %65 = arith.addf %64, %38 : vector<32x16xf32>
    %cst_32 = arith.constant 0.000000e+00 : f32
    %66 = vector.broadcast %cst_32 : f32 to vector<32x16xf32>
    %67 = arith.maximumf %65, %66 : vector<32x16xf32>
    %c0_33 = arith.constant 0 : index
    %c0_34 = arith.constant 0 : index
    %68 = vector.load %arg9[%c0_33, %c0_34] : memref<2x32xbf16, #tpu.memory_space<vmem>>, vector<2x32xbf16>
    %69 = arith.truncf %67 : vector<32x16xf32> to vector<32x16xbf16>
    %cst_35 = arith.constant dense<0.000000e+00> : vector<2x16xf32>
    %70 = tpu.matmul %68, %69, %cst_35 {dimension_numbers = #tpu.dot_dimension_numbers<[1], [0], [0], [1], [0, 0, 1, 1], [], []>} : vector<2x32xbf16>, vector<32x16xbf16>, vector<2x16xf32> -> vector<2x16xf32>
    %71 = arith.truncf %70 : vector<2x16xf32> to vector<2x16xbf16>
    %c0_36 = arith.constant 0 : index
    %c0_37 = arith.constant 0 : index
    %72 = vector.load %arg10[%c0_36, %c0_37] : memref<16x10xbf16, #tpu.memory_space<vmem>>, vector<16x10xbf16>
    %cst_38 = arith.constant dense<0.000000e+00> : vector<2x10xf32>
    %73 = tpu.matmul %71, %72, %cst_38 {dimension_numbers = #tpu.dot_dimension_numbers<[1], [0], [0], [1], [0, 0, 1, 1], [], []>} : vector<2x16xbf16>, vector<16x10xbf16>, vector<2x10xf32> -> vector<2x10xf32>
    %c0_39 = arith.constant 0 : index
    %c0_40 = arith.constant 0 : index
    %74 = vector.load %arg11[%c0_39, %c0_40] : memref<1x10xf32, #tpu.memory_space<vmem>>, vector<1x10xf32>
    %75 = vector.broadcast %74 : vector<1x10xf32> to vector<2x10xf32>
    %76 = arith.addf %73, %75 : vector<2x10xf32>
    %c0_41 = arith.constant 0 : index
    %c0_42 = arith.constant 0 : index
    %77 = vector.load %arg12[%c0_41, %c0_42] : memref<2x10xf32, #tpu.memory_space<vmem>>, vector<2x10xf32>
    tpu.vector_store %arg12[%c0_41, %c0_42], %76 {strides = array<i32>} : memref<2x10xf32, #tpu.memory_space<vmem>>, vector<2x10xf32>,
    return
  }
}

</mosaic_0001>

<bundles_post_ra>
// kernel: resnet_forward.6
= control target key start
LH: loop header
LB: loop body
LE: loop exit
PB: predicated region body
PF: predicated region fallthrough
CT: control target
= control target key end

     0   :  { %vm68_vm0 = vcmask 1043456   ;;  %vm43_vm1 = vcmask 64512   ;;  %vm171_vm2 = vcmask 31744   ;;  %s706_s1 = inlined_call_operand.vmem [shape: bf16[8,4], index: 1, kind: input, shape index: {}]   ;;  %s707_s0 = inlined_call_operand.vmem [shape: f32[128,8], index: 0, kind: input, shape index: {}]   ;;  %s708_s2 = inlined_call_operand.vmem [shape: f32[1,4], index: 2, kind: input, shape index: {}]   ;;  %s709_s3 = inlined_call_operand.vmem [shape: f32[1,4], index: 3, kind: input, shape index: {}]   ;;  %s710_s4 = inlined_call_operand.vmem [shape: f32[128,4], index: 4, kind: output, shape index: {}]  }
   0x1   :  { %v42_v0 = vld [vmem:[%s706_s1] sm:$0xf]  ;;  %v19_v2 = vld [vmem:[%s707_s0 + $0x8] sm:$0xff]  ;;  %v20_v5 = vld [vmem:[%s707_s0 + $0x10] sm:$0xff] }
   0x2   :  { %v18_v1 = vld [vmem:[%s707_s0] sm:$0xff]  ;;  %420 = vmatprep.subr.msk.bf16.mxu0 %vm68_vm0, %v42_v0  ;;  %v70_v3 = vsel %vm68_vm0, %v42_v0, 0  ;;  %v21_v6 = vld [vmem:[%s707_s0 + $0x18] sm:$0xff]  ;;  %421 = vmatprep.subr.msk.bf16.mxu1 %vm68_vm0, %v42_v0  ;;  %v23_v9 = vld [vmem:[%s707_s0 + $0x28] sm:$0xff] }
   0x3   :  { %v34_v4 = vpack.c.bf16 %v19_v2, %v18_v1  ;;  %v22_v7 = vld [vmem:[%s707_s0 + $0x20] sm:$0xff]  ;;  %401 = vmatpush3.bf16.msra.mxu0 %v70_v3  ;;  %v35_v8 = vpack.c.bf16 %v21_v6, %v20_v5  ;;  %419 = vmatpush3.bf16.msra.mxu1 %v70_v3  ;;  %v27_v12 = vld [vmem:[%s707_s0 + $0x48] sm:$0xff]  ;;  %v28_v13 = vld [vmem:[%s707_s0 + $0x50] sm:$0xff] }
   0x4   :  { %v36_v10 = vpack.c.bf16 %v23_v9, %v22_v7  ;;  %v26_v11 = vld [vmem:[%s707_s0 + $0x40] sm:$0xff]  ;;  %v29_v15 = vld [vmem:[%s707_s0 + $0x58] sm:$0xff]  ;;  %v31_v17 = vld [vmem:[%s707_s0 + $0x68] sm:$0xff] }
   0x5   :  { %402 = vmatprep.mubr.msk.bf16.mxu0 %vm43_vm1, %v34_v4  ;;  %v38_v14 = vpack.c.bf16 %v27_v12, %v26_v11  ;;  %v30_v16 = vld [vmem:[%s707_s0 + $0x60] sm:$0xff]  ;;  %v39_v18 = vpack.c.bf16 %v29_v15, %v28_v13  ;;  %v24_v20 = vld [vmem:[%s707_s0 + $0x30] sm:$0xff]  ;;  %v25_v21 = vld [vmem:[%s707_s0 + $0x38] sm:$0xff] }
   0x6   :  { %403 = vmatmul.mubr.msk.bf16.vlgmr.msra.gmra.mrb[0].mxu0 %vm43_vm1, %v35_v8  ;;  %v40_v19 = vpack.c.bf16 %v31_v17, %v30_v16  ;;  %v32_v22 = vld [vmem:[%s707_s0 + $0x70] sm:$0xff]  ;;  %v33_v23 = vld [vmem:[%s707_s0 + $0x78] sm:$0xff]  ;;  %v37_v24 = vpack.c.bf16 %v25_v21, %v24_v20 }
   0x7   :  { %406 = vmatprep.mubr.msk.bf16.mxu0 %vm43_vm1, %v36_v10  ;;  %410 = vmatprep.mubr.msk.bf16.mxu1 %vm43_vm1, %v38_v14  ;;  %v41_v25 = vpack.c.bf16 %v33_v23, %v32_v22 }
   0x8   :  { %411 = vmatmul.mubr.msk.bf16.vlgmr.msra.gmra.mrb[0].mxu1 %vm43_vm1, %v39_v18 }
   0x9   :  { %414 = vmatprep.mubr.msk.bf16.mxu1 %vm43_vm1, %v40_v19 }
   0xe   :  { %407 = vmatmul.mubr.msk.bf16.gmra.mrb[4].mxu0 %vm43_vm1, %v37_v24 }
  0x10   :  { %415 = vmatmul.mubr.msk.bf16.gmra.mrb[4].mxu1 %vm43_vm1, %v41_v25 }
  0xd9   :  { %v508_v26 = vpop.f32.mrb[0].mxu0 }
  0xda   :  { %v510_v27 = vpop.f32.mrb[1].mxu0  ;;  %v211_v33 = vmul.f32 %v508_v26, %v508_v26  ;;  %v175_v40 = vsel %vm171_vm2, %v508_v26, 0.0 }
  0xdb   :  { %v209_v28 = vmul.f32 %v510_v27, %v510_v27  ;;  %v514_v29 = vpop.f32.mrb[2].mxu0  ;;  %v516_v30 = vpop.f32.mrb[0].mxu1  ;;  %v172_v34 = vsel %vm171_vm2, %v510_v27, 0.0 }
  0xdc   :  { %v518_v31 = vpop.f32.mrb[3].mxu0  ;;  %v520_v32 = vpop.f32.mrb[1].mxu1  ;;  %v212_v42 = vmul.f32 %v514_v29, %v514_v29  ;;  %v228_v46 = vsel %vm171_vm2, %v211_v33, 0.0  ;;  %v177_v47 = vsel %vm171_vm2, %v514_v29, 0.0  ;;  %v219_v21 = vmul.f32 %v516_v30, %v516_v30 }
  0xdd   :  { %v173_v35 = vsel %vm171_vm2, %v518_v31, 0.0  ;;  %v210_v36 = vmul.f32 %v518_v31, %v518_v31  ;;  %v530_v37 = vpop.f32.mrb[2].mxu1  ;;  %v225_v41 = vsel %vm171_vm2, %v209_v28, 0.0  ;;  %v217_v8 = vmul.f32 %v520_v32, %v520_v32 }
  0xde   :  { %v174_v38 = vadd.f32 %v173_v35, %v172_v34  ;;  %v532_v39 = vpop.f32.mrb[3].mxu1  ;;  %v230_v52 = vsel %vm171_vm2, %v212_v42, 0.0  ;;  %v187_v13 = vsel %vm171_vm2, %v520_v32, 0.0  ;;  %v191_v25 = vsel %vm171_vm2, %v516_v30, 0.0 }
  0xdf   :  { %v226_v43 = vsel %vm171_vm2, %v210_v36, 0.0  ;;  %v240_v17 = vsel %vm171_vm2, %v217_v8, 0.0  ;;  %v218_v18 = vmul.f32 %v532_v39, %v532_v39  ;;  %v189_v22 = vsel %vm171_vm2, %v532_v39, 0.0 }
  0xe0   :  { %v176_v44 = vadd.f32 %v175_v40, %v174_v38  ;;  %v227_v45 = vadd.f32 %v226_v43, %v225_v41  ;;  %v220_v28 = vmul.f32 %v530_v37, %v530_v37  ;;  %v244_v38 = vsel %vm171_vm2, %v219_v21, 0.0 }
  0xe1   :  { %v543_v48 = vpop.f32.mrb[4].mxu0  ;;  %v242_v33 = vsel %vm171_vm2, %v218_v18, 0.0  ;;  %v193_v40 = vsel %vm171_vm2, %v530_v37, 0.0 }
  0xe2   :  { %v229_v49 = vadd.f32 %v228_v46, %v227_v45  ;;  %v545_v50 = vpop.f32.mrb[5].mxu0  ;;  %v178_v51 = vadd.f32 %v177_v47, %v176_v44  ;;  %v215_v61 = vmul.f32 %v543_v48, %v543_v48  ;;  %v183_v5 = vsel %vm171_vm2, %v543_v48, 0.0 }
  0xe3   :  { %v179_v53 = vsel %vm171_vm2, %v545_v50, 0.0  ;;  %v213_v54 = vmul.f32 %v545_v50, %v545_v50  ;;  %v552_v55 = vpop.f32.mrb[6].mxu0  ;;  %v554_v56 = vpop.f32.mrb[4].mxu1  ;;  %v246_v44 = vsel %vm171_vm2, %v220_v28, 0.0 }
  0xe4   :  { %v180_v57 = vadd.f32 %v179_v53, %v178_v51  ;;  %v231_v58 = vadd.f32 %v230_v52, %v229_v49  ;;  %v556_v59 = vpop.f32.mrb[7].mxu0  ;;  %v558_v60 = vpop.f32.mrb[5].mxu1  ;;  %v216_v6 = vmul.f32 %v552_v55, %v552_v55  ;;  %v236_v11 = vsel %vm171_vm2, %v215_v61, 0.0 }
  0xe5   :  { %v232_v62 = vsel %vm171_vm2, %v213_v54, 0.0  ;;  %v181_v63 = vsel %vm171_vm2, %v556_v59, 0.0  ;;  %v214_v0 = vmul.f32 %v556_v59, %v556_v59  ;;  %v567_v1 = vpop.f32.mrb[6].mxu1  ;;  %v185_v12 = vsel %vm171_vm2, %v552_v55, 0.0 }
  0xe6   :  { %v233_v2 = vadd.f32 %v232_v62, %v231_v58  ;;  %v182_v3 = vadd.f32 %v181_v63, %v180_v57  ;;  %v569_v4 = vpop.f32.mrb[7].mxu1  ;;  %v238_v16 = vsel %vm171_vm2, %v216_v6, 0.0  ;;  %v221_v34 = vmul.f32 %v558_v60, %v558_v60 }
  0xe7   :  { %v234_v7 = vsel %vm171_vm2, %v214_v0, 0.0  ;;  %v195_v41 = vsel %vm171_vm2, %v558_v60, 0.0  ;;  %v222_v46 = vmul.f32 %v569_v4, %v569_v4  ;;  %v223_v51 = vmul.f32 %v554_v56, %v554_v56 }
  0xe8   :  { %v184_v9 = vadd.f32 %v183_v5, %v182_v3  ;;  %v235_v10 = vadd.f32 %v234_v7, %v233_v2  ;;  %v248_v45 = vsel %vm171_vm2, %v221_v34, 0.0  ;;  %v197_v52 = vsel %vm171_vm2, %v569_v4, 0.0 }
  0xe9   :  { %v199_v57 = vsel %vm171_vm2, %v554_v56, 0.0  ;;  %v224_v58 = vmul.f32 %v567_v1, %v567_v1  ;;  %v250_v61 = vsel %vm171_vm2, %v222_v46, 0.0  ;;  %v252_v0 = vsel %vm171_vm2, %v223_v51, 0.0 }
  0xea   :  { %v237_v14 = vadd.f32 %v236_v11, %v235_v10  ;;  %v186_v15 = vadd.f32 %v185_v12, %v184_v9  ;;  %v201_v2 = vsel %vm171_vm2, %v567_v1, 0.0 }
  0xeb   :  { %v254_v6 = vsel %vm171_vm2, %v224_v58, 0.0 }
  0xec   :  { %v188_v19 = vadd.f32 %v187_v13, %v186_v15  ;;  %v239_v20 = vadd.f32 %v238_v16, %v237_v14 }
  0xee   :  { %v241_v23 = vadd.f32 %v240_v17, %v239_v20  ;;  %v190_v24 = vadd.f32 %v189_v22, %v188_v19 }
  0xf0   :  { %v192_v35 = vadd.f32 %v191_v25, %v190_v24  ;;  %v243_v36 = vadd.f32 %v242_v33, %v241_v23 }
  0xf2   :  { %v245_v42 = vadd.f32 %v244_v38, %v243_v36  ;;  %v194_v43 = vadd.f32 %v193_v40, %v192_v35 }
  0xf4   :  { %v196_v47 = vadd.f32 %v195_v41, %v194_v43  ;;  %v247_v49 = vadd.f32 %v246_v44, %v245_v42 }
  0xf6   :  { %v249_v53 = vadd.f32 %v248_v45, %v247_v49  ;;  %v198_v54 = vadd.f32 %v197_v52, %v196_v47 }
  0xf8   :  { %v200_v62 = vadd.f32 %v199_v57, %v198_v54  ;;  %v251_v63 = vadd.f32 %v250_v61, %v249_v53 }
  0xfa   :  { %v202_v3 = vadd.f32 %v201_v2, %v200_v62  ;;  %v253_v5 = vadd.f32 %v252_v0, %v251_v63  ;;  %v390_v62 = vld [vmem:[%s709_s3] ss:$0 sm:$0xff] }
  0xfc   :  { %v203_v7 = vrot.slane %v202_v3, 4  ;;  %v255_v8 = vadd.f32 %v254_v6, %v253_v5 }
  0xfe   :  { %v204_v9 = vadd.f32 %v203_v7, %v202_v3  ;;  %v256_v10 = vrot.slane %v255_v8, 4 }
 0x100   :  { %v205_v11 = vrot.slane %v204_v9, 2  ;;  %v257_v12 = vadd.f32 %v256_v10, %v255_v8 }
 0x102   :  { %v206_v13 = vadd.f32 %v205_v11, %v204_v9  ;;  %v258_v14 = vrot.slane %v257_v12, 2 }
 0x104   :  { %v207_v15 = vrot.slane %v206_v13, 1  ;;  %v259_v16 = vadd.f32 %v258_v14, %v257_v12 }
 0x106   :  { %v208_v17 = vadd.f32 %v207_v15, %v206_v13  ;;  %v260_v18 = vrot.slane %v259_v16, 1 }
 0x108   :  { %v261_v19 = vadd.f32 %v260_v18, %v259_v16  ;;  %v262_v20 = vmul.f32 0.0078125, %v208_v17 }
 0x10a   :  { %v263_v21 = vmul.f32 0.0078125, %v261_v19  ;;  %v264_v22 = vmul.f32 %v262_v20, %v262_v20  ;;  %v267_v23 = vsub.f32 %v510_v27, %v262_v20  ;;  %v268_v24 = vsub.f32 %v518_v31, %v262_v20 }
 0x10b   :  { %v269_v25 = vsub.f32 %v508_v26, %v262_v20  ;;  %v270_v28 = vsub.f32 %v514_v29, %v262_v20  ;;  %v271_v33 = vsub.f32 %v545_v50, %v262_v20  ;;  %v272_v34 = vsub.f32 %v556_v59, %v262_v20 }
 0x10c   :  { %v265_v35 = vsub.f32 %v263_v21, %v264_v22  ;;  %v273_v36 = vsub.f32 %v543_v48, %v262_v20  ;;  %v274_v38 = vsub.f32 %v552_v55, %v262_v20  ;;  %v275_v40 = vsub.f32 %v520_v32, %v262_v20 }
 0x10d   :  { %v276_v41 = vsub.f32 %v532_v39, %v262_v20  ;;  %v277_v27 = vsub.f32 %v516_v30, %v262_v20  ;;  %v278_v31 = vsub.f32 %v530_v37, %v262_v20  ;;  %v279_v26 = vsub.f32 %v558_v60, %v262_v20  ;;  %v389_v30 = vld [vmem:[%s708_s2] ss:$0 sm:$0xff] }
 0x10e   :  { %v266_v29 = vmax.f32 %v265_v35, 0.0  ;;  %v280_v50 = vsub.f32 %v569_v4, %v262_v20  ;;  %v281_v59 = vsub.f32 %v554_v56, %v262_v20  ;;  %v282_v42 = vsub.f32 %v567_v1, %v262_v20 }
 0x110   :  { %v283_v48 = vadd.f32 1e-05, %v266_v29 }
 0x112   :  { %422 = vrsqrt.f32 %v283_v48 }
 0x11c   :  { %v423_v55 = vpop.eup %422 }
 0x11d   :  { %v285_v43 = vmul.f32 %v423_v55, %v267_v23  ;;  %v286_v32 = vmul.f32 %v423_v55, %v268_v24  ;;  %v287_v44 = vmul.f32 %v423_v55, %v269_v25  ;;  %v288_v39 = vmul.f32 %v423_v55, %v270_v28 }
 0x11e   :  { %v289_v37 = vmul.f32 %v423_v55, %v271_v33  ;;  %v290_v60 = vmul.f32 %v423_v55, %v272_v34  ;;  %v291_v45 = vmul.f32 %v423_v55, %v273_v36  ;;  %v292_v46 = vmul.f32 %v423_v55, %v274_v38 }
 0x11f   :  { %v293_v4 = vmul.f32 %v423_v55, %v275_v40  ;;  %v294_v47 = vmul.f32 %v423_v55, %v276_v41  ;;  %v295_v56 = vmul.f32 %v423_v55, %v277_v27  ;;  %v296_v49 = vmul.f32 %v423_v55, %v278_v31 }
 0x120   :  { %v297_v1 = vmul.f32 %v423_v55, %v279_v26  ;;  %v298_v51 = vmul.f32 %v423_v55, %v280_v50  ;;  %v299_v52 = vmul.f32 %v423_v55, %v281_v59  ;;  %v300_v53 = vmul.f32 %v423_v55, %v282_v42 }
 0x121   :  { %v307_v54 = vmul.f32 %v389_v30, %v285_v43  ;;  %v308_v57 = vmul.f32 %v389_v30, %v286_v32  ;;  %v309_v58 = vmul.f32 %v389_v30, %v287_v44  ;;  %v310_v61 = vmul.f32 %v389_v30, %v288_v39 }
 0x122   :  { %v311_v63 = vmul.f32 %v389_v30, %v289_v37  ;;  %v312_v0 = vmul.f32 %v389_v30, %v290_v60  ;;  %v313_v2 = vmul.f32 %v389_v30, %v291_v45  ;;  %v314_v3 = vmul.f32 %v389_v30, %v292_v46 }
 0x123   :  { %v315_v5 = vmul.f32 %v389_v30, %v293_v4  ;;  %v316_v6 = vmul.f32 %v389_v30, %v294_v47  ;;  %v317_v7 = vmul.f32 %v389_v30, %v295_v56  ;;  %v318_v8 = vmul.f32 %v389_v30, %v296_v49 }
 0x124   :  { %v319_v9 = vmul.f32 %v389_v30, %v297_v1  ;;  %v320_v10 = vmul.f32 %v389_v30, %v298_v51  ;;  %v321_v11 = vmul.f32 %v389_v30, %v299_v52  ;;  %v322_v12 = vmul.f32 %v389_v30, %v300_v53 }
 0x125   :  { %v329_v13 = vadd.f32 %v390_v62, %v307_v54  ;;  %v330_v14 = vadd.f32 %v390_v62, %v308_v57  ;;  %v331_v15 = vadd.f32 %v390_v62, %v309_v58  ;;  %v332_v16 = vadd.f32 %v390_v62, %v310_v61 }
 0x126   :  { %v333_v17 = vadd.f32 %v390_v62, %v311_v63  ;;  %v334_v18 = vadd.f32 %v390_v62, %v312_v0  ;;  %v335_v19 = vadd.f32 %v390_v62, %v313_v2  ;;  %v336_v20 = vadd.f32 %v390_v62, %v314_v3 }
 0x127   :  { %v337_v21 = vadd.f32 %v390_v62, %v315_v5  ;;  %v338_v22 = vadd.f32 %v390_v62, %v316_v6  ;;  %v339_v23 = vadd.f32 %v390_v62, %v317_v7  ;;  %v340_v24 = vadd.f32 %v390_v62, %v318_v8 }
 0x128   :  { %v341_v25 = vadd.f32 %v390_v62, %v319_v9  ;;  %v342_v28 = vadd.f32 %v390_v62, %v320_v10  ;;  %v343_v33 = vadd.f32 %v390_v62, %v321_v11  ;;  %v344_v34 = vadd.f32 %v390_v62, %v322_v12 }
 0x129   :  { %v345_v35 = vmax.f32 %v329_v13, 0.0  ;;  %v346_v36 = vmax.f32 %v330_v14, 0.0  ;;  %v347_v38 = vmax.f32 %v331_v15, 0.0  ;;  %v348_v40 = vmax.f32 %v332_v16, 0.0 }
 0x12a   :  { %v349_v41 = vmax.f32 %v333_v17, 0.0  ;;  %v350_v27 = vmax.f32 %v334_v18, 0.0  ;;  %v351_v31 = vmax.f32 %v335_v19, 0.0  ;;  %v352_v26 = vmax.f32 %v336_v20, 0.0 }
 0x12b   :  { %v353_v29 = vmax.f32 %v337_v21, 0.0  ;;  %v354_v50 = vmax.f32 %v338_v22, 0.0  ;;  %v355_v59 = vmax.f32 %v339_v23, 0.0  ;;  %v356_v42 = vmax.f32 %v340_v24, 0.0  ;;  %361 = vst.msk [vmem:[%s710_s4] sm:$0xff] %vm171_vm2, %v345_v35  ;;  %362 = vst.msk [vmem:[%s710_s4 + $0x8] sm:$0xff] %vm171_vm2, %v346_v36 }
 0x12c   :  { %363 = vst.msk [vmem:[%s710_s4 + $0x10] sm:$0xff] %vm171_vm2, %v347_v38  ;;  %364 = vst.msk [vmem:[%s710_s4 + $0x18] sm:$0xff] %vm171_vm2, %v348_v40  ;;  %v357_v48 = vmax.f32 %v341_v25, 0.0  ;;  %v358_v55 = vmax.f32 %v342_v28, 0.0  ;;  %v359_v43 = vmax.f32 %v343_v33, 0.0  ;;  %v360_v32 = vmax.f32 %v344_v34, 0.0 }
 0x12d   :  { %365 = vst.msk [vmem:[%s710_s4 + $0x20] sm:$0xff] %vm171_vm2, %v349_v41  ;;  %366 = vst.msk [vmem:[%s710_s4 + $0x28] sm:$0xff] %vm171_vm2, %v350_v27 }
 0x12e   :  { %367 = vst.msk [vmem:[%s710_s4 + $0x30] sm:$0xff] %vm171_vm2, %v351_v31  ;;  %368 = vst.msk [vmem:[%s710_s4 + $0x38] sm:$0xff] %vm171_vm2, %v352_v26 }
 0x12f   :  { %369 = vst.msk [vmem:[%s710_s4 + $0x40] sm:$0xff] %vm171_vm2, %v353_v29  ;;  %370 = vst.msk [vmem:[%s710_s4 + $0x48] sm:$0xff] %vm171_vm2, %v354_v50 }
 0x130   :  { %371 = vst.msk [vmem:[%s710_s4 + $0x50] sm:$0xff] %vm171_vm2, %v355_v59  ;;  %372 = vst.msk [vmem:[%s710_s4 + $0x58] sm:$0xff] %vm171_vm2, %v356_v42 }
 0x131   :  { %373 = vst.msk [vmem:[%s710_s4 + $0x60] sm:$0xff] %vm171_vm2, %v357_v48  ;;  %374 = vst.msk [vmem:[%s710_s4 + $0x68] sm:$0xff] %vm171_vm2, %v358_v55 }
 0x132   :  { %375 = vst.msk [vmem:[%s710_s4 + $0x70] sm:$0xff] %vm171_vm2, %v359_v43  ;;  %376 = vst.msk [vmem:[%s710_s4 + $0x78] sm:$0xff] %vm171_vm2, %v360_v32 }

// kernel: resnet_forward.4
= control target key start
LH: loop header
LB: loop body
LE: loop exit
PB: predicated region body
PF: predicated region fallthrough
CT: control target
= control target key end

     0   :  { %vm210_vm0 = vcmask 1045504   ;;  %vm104_vm1 = vcmask 1046528   ;;  %vm185_vm2 = vcmask 97280   ;;  %vm660_vm3 = vcmask 1044480   ;;  %s5064_s1 = inlined_call_operand.vmem [shape: bf16[16,12,8], index: 1, kind: input, shape index: {}]   ;;  %s5065_s0 = inlined_call_operand.vmem [shape: f32[2,11,11,12], index: 0, kind: input, shape index: {}]   ;;  %s5066_s2 = inlined_call_operand.vmem [shape: f32[1,8], index: 2, kind: input, shape index: {}]   ;;  %s5067_s3 = inlined_call_operand.vmem [shape: f32[1,8], index: 3, kind: input, shape index: {}]   ;;  %s5068_s4 = inlined_call_operand.vmem [shape: f32[128,8], index: 4, kind: output, shape index: {}]  }
   0x1   :  { %v3721_v0 = vld [vmem:[%s5064_s1 + $0x8] sm:$0x3f]   ;;  %v3722_v1 = vld [vmem:[%s5064_s1 + $0x40] sm:$0x3f]   ;;  %v3785_v5 = vld [vmem:[%s5065_s0 + $0x10] sm:$0xff]  ;;  %vm2647_vm4 = vcmask 64512  }
   0x2   :  { %3705 = vmatprep.subr.msk.bf16.mxu1 %vm210_vm0, %v3721_v0  ;;  %v212_v2 = vsel %vm210_vm0, %v3721_v0, 0  ;;  %v3775_v3 = vld [vmem:[%s5065_s0] sm:$0xff]  ;;  %v3780_v4 = vld [vmem:[%s5065_s0 + $0x8] sm:$0x7]  ;;  %5134 = vst [vmem:[#allocation2_spill] sm:$0xff] %v3785_v5  ;;  %3713 = vmatprep.subr.msk.bf16.mxu0 %vm210_vm0, %v3722_v1  ;;  %v1550_v6 = vsel %vm210_vm0, %v3722_v1, 0 }
   0x3   :  { %3178 = vmatpush3.bf16.msra.mxu1 %v212_v2  ;;  %v3792_v7 = vld [vmem:[%s5065_s0 + $0x18] sm:$0x7]  ;;  %v3797_v8 = vld [vmem:[%s5065_s0 + $0x20] sm:$0xff]  ;;  %v3802_v9 = vld [vmem:[%s5065_s0 + $0x28] sm:$0x7]  ;;  %3322 = vmatpush3.bf16.msra.mxu0 %v1550_v6  ;;  %v105_v12 = vrot.slane %v3775_v3, 1 }
   0x4   :  { %5135 = vst [vmem:[#allocation3_spill] sm:$0xff] %v3797_v8  ;;  %v3807_v10 = vld [vmem:[%s5065_s0 + $0x30] sm:$0xff]  ;;  %v3812_v11 = vld [vmem:[%s5065_s0 + $0x38] sm:$0x7]  ;;  %v106_v13 = vrot.slane %v3780_v4, 1  ;;  %v108_v14 = vrot.slane %v3785_v5, 1 }
   0x5   :  { %v109_v16 = vrot.slane %v3792_v7, 1  ;;  %v111_v17 = vrot.slane %v3797_v8, 1  ;;  %v112_v18 = vrot.slane %v3802_v9, 1  ;;  %v114_v19 = vrot.slane %v3807_v10, 1  ;;  %v3828_v22 = vld [vmem:[%s5065_s0 + $0x40] sm:$0xff]  ;;  %v3842_v26 = vld [vmem:[%s5065_s0 + $0x50] sm:$0xff] }
   0x6   :  { %v107_v20 = vsel %vm104_vm1, %v105_v12, %v106_v13  ;;  %v115_v21 = vrot.slane %v3812_v11, 1  ;;  %5136 = vst [vmem:[#allocation4_spill] sm:$0xff] %v3828_v22  ;;  %v3723_v25 = vld [vmem:[%s5064_s1] sm:$0x3f]   ;;  %5139 = vst [vmem:[#allocation7_spill] sm:$0xff] %v3842_v26  ;;  %v3852_v30 = vpack.c.bf16 %v3807_v10, %v3797_v8  ;;  %v3864_v33 = vpack.c.bf16 %v3842_v26, %v3828_v22  ;;  %v3889_v39 = vld [vmem:[%s5065_s0 + $0x70] sm:$0xff] }
   0x7   :  { %v3831_v23 = vsel %vm104_vm1, %v108_v14, %v109_v16  ;;  %v3834_v24 = vsel %vm104_vm1, %v111_v17, %v112_v18  ;;  %v3724_v31 = vld [vmem:[%s5064_s1 + $0x48] sm:$0x3f]   ;;  %3706 = vmatprep.subr.msk.bf16.mxu1 %vm210_vm0, %v3723_v25  ;;  %v3874_v35 = vld [vmem:[%s5065_s0 + $0x58] sm:$0x7]  ;;  %v341_v36 = vsel %vm210_vm0, %v3723_v25, 0  ;;  %v3884_v38 = vld [vmem:[%s5065_s0 + $0x60] sm:$0xff] }
   0x8   :  { %5137 = vst [vmem:[#allocation5_spill] sm:$0xff] %v3831_v23  ;;  %5138 = vst [vmem:[#allocation6_spill] sm:$0xff] %v3834_v24  ;;  %v3845_v27 = vsel %vm104_vm1, %v114_v19, %v115_v21  ;;  %v169_v28 = vpack.c.bf16 %v3831_v23, %v107_v20  ;;  %v3869_v34 = vld [vmem:[%s5065_s0 + $0x48] sm:$0x7]  ;;  %3323 = vmatprep.mubr.msk.bf16.mxu0 %vm185_vm2, %v3852_v30  ;;  %v1694_v37 = vsel %vm210_vm0, %v3724_v31, 0  ;;  %v117_v40 = vrot.slane %v3828_v22, 1 }
   0x9   :  { %5140 = vst [vmem:[#allocation8_spill] sm:$0xff] %v3845_v27  ;;  %v3859_v32 = vpack.c.bf16 %v3845_v27, %v3834_v24  ;;  %5141 = vst [vmem:[#allocation9_spill] sm:$0xff] %v3869_v34  ;;  %3324 = vmatmul.mubr.msk.bf16.vlgmr.msra.gmra.mrb[0].mxu0 %vm185_vm2, %v3864_v33  ;;  %v118_v41 = vrot.slane %v3869_v34, 1  ;;  %v120_v42 = vrot.slane %v3842_v26, 1  ;;  %v121_v43 = vrot.slane %v3874_v35, 1  ;;  %3714 = vmatprep.subr.msk.bf16.mxu0 %vm210_vm0, %v3724_v31  ;;  %v3913_v46 = vld [vmem:[%s5065_s0 + $0x80] sm:$0xff] }
   0xa   :  { %3179 = vmatprep.mubr.msk.bf16.mxu1 %vm185_vm2, %v169_v28  ;;  %v3902_v44 = vld [vmem:[%s5065_s0 + $0x68] sm:$0x7]  ;;  %v3908_v45 = vld [vmem:[%s5065_s0 + $0x78] sm:$0x7]  ;;  %3340 = vmatpush3.bf16.msra.mxu0 %v1694_v37  ;;  %v3921_v49 = vpack.c.bf16 %v3889_v39, %v3884_v38  ;;  %v123_v50 = vrot.slane %v3884_v38, 1  ;;  %v3927_v51 = vld [vmem:[%s5065_s0 + $0x90] sm:$0xff] }
   0xb   :  { %3180 = vmatmul.mubr.msk.bf16.vlgmr.msra.gmra.mrb[0].mxu1 %vm185_vm2, %v3859_v32  ;;  %v3916_v47 = vsel %vm104_vm1, %v117_v40, %v118_v41  ;;  %v122_v48 = vsel %vm104_vm1, %v120_v42, %v121_v43  ;;  %v3932_v52 = vld [vmem:[%s5065_s0 + $0xb0] sm:$0xff]  ;;  %v3937_v53 = vld [vmem:[%s5065_s0 + $0xb8] sm:$0x7]  ;;  %v124_v55 = vrot.slane %v3902_v44, 1  ;;  %v126_v56 = vrot.slane %v3889_v39, 1  ;;  %v3948_v58 = vld [vmem:[%s5065_s0 + $0xc0] sm:$0xff] }
   0xc   :  { %3196 = vmatpush3.bf16.msra.mxu1 %v341_v36  ;;  %5142 = vst [vmem:[#allocation10_spill] sm:$0xff] %v3916_v47  ;;  %v3940_v54 = vpack.c.bf16 %v122_v48, %v3916_v47  ;;  %v127_v57 = vrot.slane %v3908_v45, 1  ;;  %v3953_v59 = vld [vmem:[%s5065_s0 + $0xc8] sm:$0x7]  ;;  %3327 = vmatprep.mubr.msk.bf16.mxu0 %vm185_vm2, %v3921_v49  ;;  %v1533_v60 = vpack.c.bf16 %v3927_v51, %v3913_v46  ;;  %v129_v61 = vrot.slane %v3932_v52, 1  ;;  %v3965_v0 = vld [vmem:[%s5065_s0 + $0xd0] sm:$0xff] }
   0xd   :  { %v130_v62 = vrot.slane %v3937_v53, 1  ;;  %v132_v63 = vrot.slane %v3948_v58, 1  ;;  %v3970_v1 = vld [vmem:[%s5065_s0 + $0xe0] sm:$0xff]  ;;  %v125_v2 = vsel %vm104_vm1, %v123_v50, %v124_v55  ;;  %v133_v12 = vrot.slane %v3953_v59, 1  ;;  %v3986_v14 = vld [vmem:[%s5065_s0 + $0xd8] sm:$0x7] }
   0xe   :  { %3183 = vmatprep.mubr.msk.bf16.mxu1 %vm185_vm2, %v3940_v54  ;;  %v3976_v6 = vsel %vm104_vm1, %v126_v56, %v127_v57  ;;  %v3981_v13 = vpack.c.bf16 %v3970_v1, %v3965_v0  ;;  %v3991_v16 = vld [vmem:[%s5065_s0 + $0xe8] sm:$0x7]  ;;  %v3996_v18 = vpack.c.bf16 %v125_v2, %v122_v48  ;;  %v135_v20 = vrot.slane %v3965_v0, 1  ;;  %v4003_v21 = vld [vmem:[%s5065_s0 + $0xf8] sm:$0x7]  ;;  %v4019_v40 = vld [vmem:[%s5065_s0 + $0xf0] sm:$0xff] }
   0xf   :  { %5143 = vst [vmem:[#allocation11_spill] sm:$0xff] %v3976_v6  ;;  %v3994_v17 = vpack.c.bf16 %v3976_v6, %v125_v2  ;;  %v131_v19 = vsel %vm104_vm1, %v129_v61, %v130_v62  ;;  %v4008_v25 = vld [vmem:[%s5065_s0 + $0x108] sm:$0x7]  ;;  %v4011_v28 = vsel %vm104_vm1, %v132_v63, %v133_v12  ;;  %v136_v31 = vrot.slane %v3986_v14, 1  ;;  %v4024_v41 = vld [vmem:[%s5065_s0 + $0x100] sm:$0xff]  ;;  %v4035_v50 = vld [vmem:[%s5065_s0 + $0x110] sm:$0xff] }
  0x10   :  { %5144 = vst [vmem:[#allocation12_spill] sm:$0xff] %v3981_v13  ;;  %5145 = vst [vmem:[#allocation13_spill] sm:$0xff] %v3996_v18  ;;  %v138_v36 = vrot.slane %v3970_v1, 1  ;;  %v139_v37 = vrot.slane %v3991_v16, 1  ;;  %v173_v42 = vpack.c.bf16 %v4011_v28, %v131_v19  ;;  %v141_v43 = vrot.slane %v4019_v40, 1  ;;  %v4040_v55 = vld [vmem:[%s5065_s0 + $0x120] sm:$0xff] }
  0x11   :  { %5146 = vst [vmem:[#allocation14_spill] sm:$0xff] %v4011_v28  ;;  %3328 = vmatmul.mubr.msk.bf16.gmra.mrb[4].mxu0 %vm185_vm2, %v1533_v60  ;;  %v142_v48 = vrot.slane %v4003_v21, 1  ;;  %v4045_v56 = vld [vmem:[%s5065_s0 + $0x118] sm:$0x7]  ;;  %v4050_v57 = vsel %vm104_vm1, %v135_v20, %v136_v31  ;;  %v144_v61 = vrot.slane %v4024_v41, 1  ;;  %v145_v62 = vrot.slane %v4008_v25, 1 }
  0x12   :  { %3331 = vmatprep.mubr.msk.bf16.mxu0 %vm185_vm2, %v3981_v13  ;;  %5147 = vst [vmem:[#allocation15_spill] sm:$0xff] %v4050_v57  ;;  %v4053_v60 = vsel %vm104_vm1, %v138_v36, %v139_v37  ;;  %v4064_v2 = vld [vmem:[%s5065_s0 + $0x128] sm:$0x7]  ;;  %v3725_v12 = vld [vmem:[%s5064_s1 + $0x10] sm:$0x3f]   ;;  %v4078_v31 = vpack.c.bf16 %v4024_v41, %v4019_v40  ;;  %v4082_v36 = vpack.c.bf16 %v4040_v55, %v4035_v50  ;;  %v147_v37 = vrot.slane %v4035_v50, 1 }
  0x13   :  { %3184 = vmatmul.mubr.msk.bf16.gmra.mrb[4].mxu1 %vm185_vm2, %v3994_v17  ;;  %5148 = vst [vmem:[#allocation16_spill] sm:$0xff] %v4053_v60  ;;  %v4059_v63 = vsel %vm104_vm1, %v141_v43, %v142_v48  ;;  %v4070_v19 = vsel %vm104_vm1, %v144_v61, %v145_v62  ;;  %v4074_v20 = vpack.c.bf16 %v4053_v60, %v4050_v57  ;;  %v148_v48 = vrot.slane %v4045_v56, 1  ;;  %v4104_v29 = vld [vmem:[%s5065_s0 + $0x130] sm:$0xff]  ;;  %v4119_v23 = vld [vmem:[%s5065_s0 + $0x140] sm:$0xff] }
  0x14   :  { %3187 = vmatprep.mubr.msk.bf16.mxu1 %vm185_vm2, %v173_v42  ;;  %5149 = vst [vmem:[#allocation17_spill] sm:$0xff] %v4059_v63  ;;  %5150 = vst [vmem:[#allocation18_spill] sm:$0xff] %v4070_v19  ;;  %3707 = vmatprep.subr.msk.bf16.mxu1 %vm210_vm0, %v3725_v12  ;;  %v3726_v42 = vld [vmem:[%s5064_s1 + $0x50] sm:$0x3f]   ;;  %v4091_v43 = vpack.c.bf16 %v4070_v19, %v4059_v63  ;;  %v150_v61 = vrot.slane %v4040_v55, 1  ;;  %v151_v62 = vrot.slane %v4064_v2, 1 }
  0x15   :  { %5151 = vst [vmem:[#allocation19_spill] sm:$0xff] %v4078_v31  ;;  %5152 = vst [vmem:[#allocation20_spill] sm:$0xff] %v4082_v36  ;;  %3715 = vmatprep.subr.msk.bf16.mxu0 %vm210_vm0, %v3726_v42  ;;  %v4111_v15 = vsel %vm104_vm1, %v147_v37, %v148_v48  ;;  %v455_v24 = vrot.slane %v3842_v26, 2  ;;  %v456_v19 = vrot.slane %v3874_v35, 2  ;;  %v1534_v37 = vpack.c.bf16 %v4119_v23, %v4104_v29 }
  0x16   :  { %5153 = vst [vmem:[#allocation21_spill] sm:$0xff] %v4091_v43  ;;  %5154 = vst [vmem:[#allocation22_spill] sm:$0xff] %v4104_v29  ;;  %v4114_v18 = vsel %vm104_vm1, %v150_v61, %v151_v62  ;;  %v62_v48 = vpack.c.bf16 %v3785_v5, %v3775_v3  ;;  %v458_v61 = vrot.slane %v3884_v38, 2  ;;  %v459_v62 = vrot.slane %v3902_v44, 2 }
  0x17   :  { %5155 = vst [vmem:[#allocation23_spill] sm:$0xff] %v4111_v15  ;;  %5156 = vst [vmem:[#allocation24_spill] sm:$0xff] %v4114_v18  ;;  %v4125_v63 = vpack.c.bf16 %v4114_v18, %v4111_v15  ;;  %v444_v60 = vrot.slane %v3792_v7, 2  ;;  %v662_v57 = vrot.slane %v3780_v4, 3  ;;  %v665_v28 = vrot.slane %v3792_v7, 3 }
  0x18   :  { %v4140_v18 = vld [vmem:[%s5065_s0 + $0x88] sm:$0x7]  ;;  %v4145_v15 = vld [vmem:[%s5065_s0 + $0x98] sm:$0x7]  ;;  %v4148_v6 = vsel %vm210_vm0, %v455_v24, %v456_v19  ;;  %v4151_v47 = vsel %vm210_vm0, %v458_v61, %v459_v62  ;;  %v673_v19 = vrot.slane %v3828_v22, 3  ;;  %v1041_v61 = vrot.slane %v3913_v46, 1 }
  0x19   :  { %3332 = vmatmul.mubr.msk.bf16.gmra.mrb[8].mxu0 %vm185_vm2, %v4078_v31  ;;  %5157 = vst [vmem:[#allocation25_spill] sm:$0xff] %v4125_v63  ;;  %5158 = vst [vmem:[#allocation26_spill] sm:$0xff] %v4148_v6  ;;  %v4163_v7 = vpack.c.bf16 %v4151_v47, %v4148_v6  ;;  %v1042_v62 = vrot.slane %v4140_v18, 1  ;;  %v1670_v24 = vrot.slane %v4145_v15, 1  ;;  %v676_v6 = vrot.slane %v3842_v26, 3 }
  0x1a   :  { %3335 = vmatprep.mubr.msk.bf16.mxu0 %vm185_vm2, %v4082_v36  ;;  %v441_v36 = vrot.slane %v3780_v4, 2  ;;  %5159 = vst [vmem:[#allocation27_spill] sm:$0xff] %v4151_v47  ;;  %v4159_v4 = vld [vmem:[%s5065_s0 + $0x138] sm:$0x7]  ;;  %v1044_v47 = vrot.slane %v4104_v29, 1  ;;  %v1672_v27 = vrot.slane %v4119_v23, 1 }
  0x1b   :  { %3188 = vmatmul.mubr.msk.bf16.gmra.mrb[8].mxu1 %vm185_vm2, %v4074_v20  ;;  %5160 = vst [vmem:[#allocation28_spill] sm:$0xff] %v4159_v4  ;;  %5161 = vst [vmem:[#allocation29_spill] sm:$0xff] %v4163_v7  ;;  %v1669_v7 = vrot.slane %v3927_v51, 1  ;;  %v677_v31 = vrot.slane %v3874_v35, 3  ;;  %v1834_v13 = vsel %vm210_vm0, %v3726_v42, 0  ;;  %v440_v29 = vrot.slane %v3775_v3, 2 }
  0x1c   :  { %3191 = vmatprep.mubr.msk.bf16.mxu1 %vm185_vm2, %v4091_v43  ;;  %v545_v43 = vsel %vm210_vm0, %v3725_v12, 0  ;;  %v4192_v26 = vsel %vm104_vm1, %v1041_v61, %v1042_v62  ;;  %v4205_v35 = vld [vmem:[%s5064_s1 + $0x18] sm:$0x3f]   ;;  %v450_v61 = vrot.slane %v3812_v11, 2  ;;  %v661_v62 = vrot.slane %v3775_v3, 3 }
  0x1d   :  { %v4210_v12 = vld [vmem:[%s5064_s1 + $0x58] sm:$0x3f]   ;;  %v668_v3 = vrot.slane %v3802_v9, 3 }
  0x21   :  { %3336 = vmatmul.mubr.msk.bf16.gmra.mrb[12].mxu0 %vm185_vm2, %v1534_v37  ;;  %v4173_v37 = vld [vmem:[%s5065_s0 + $0x148] sm:$0x7] }
  0x22   :  { %3341 = vmatprep.mubr.msk.bf16.mxu0 %vm185_vm2, %v3859_v32  ;;  %5162 = vst [vmem:[#allocation30_spill] sm:$0xff] %v4173_v37  ;;  %v1673_v22 = vrot.slane %v4173_v37, 1  ;;  %v4195_v32 = vsel %vm104_vm1, %v1669_v7, %v1670_v24  ;;  %v66_v37 = vpack.c.bf16 %v3948_v58, %v3932_v52  ;;  %v447_v7 = vrot.slane %v3802_v9, 2 }
  0x23   :  { %3192 = vmatmul.mubr.msk.bf16.gmra.mrb[12].mxu1 %vm185_vm2, %v4125_v63  ;;  %v674_v63 = vrot.slane %v3869_v34, 3  ;;  %v449_v24 = vrot.slane %v3807_v10, 2 }
  0x24   :  { %3197 = vmatprep.mubr.msk.bf16.mxu1 %vm185_vm2, %v62_v48  ;;  %v1045_v48 = vrot.slane %v4159_v4, 1  ;;  %v443_v4 = vrot.slane %v3785_v5, 2  ;;  %v4217_v42 = vsel %vm104_vm1, %v1672_v27, %v1673_v22  ;;  %v1677_v22 = vpack.c.bf16 %v4195_v32, %v4192_v26 }
  0x25   :  { %v4233_v27 = vsel %vm210_vm0, %v440_v29, %v441_v36  ;;  %v671_v36 = vrot.slane %v3812_v11, 3  ;;  %v680_v11 = vrot.slane %v3902_v44, 3  ;;  %v1949_v44 = vrot.slane %v3927_v51, 3 }
  0x26   :  { %v4200_v34 = vsel %vm104_vm1, %v1044_v47, %v1045_v48  ;;  %v446_v47 = vrot.slane %v3797_v8, 2  ;;  %v667_v48 = vrot.slane %v3797_v8, 3 }
  0x29   :  { %3342 = vmatmul.mubr.msk.bf16.vlgmr.msra.gmra.mrb[0].mxu0 %vm185_vm2, %v3940_v54  ;;  %v4236_v54 = vsel %vm210_vm0, %v443_v4, %v444_v60  ;;  %v4255_v60 = vsel %vm660_vm3, %v667_v48, %v668_v3  ;;  %v4262_v4 = vsel %vm210_vm0, %v446_v47, %v447_v7  ;;  %v683_v47 = vrot.slane %v3908_v45, 3 }
  0x2a   :  { %3358 = vmatpush3.bf16.msra.mxu0 %v1834_v13  ;;  %3345 = vmatprep.mubr.msk.bf16.mxu0 %vm185_vm2, %v3994_v17  ;;  %v670_v17 = vrot.slane %v3807_v10, 3  ;;  %v704_v13 = vrot.slane %v4045_v56, 3 }
  0x2b   :  { %3198 = vmatmul.mubr.msk.bf16.vlgmr.msra.gmra.mrb[0].mxu1 %vm185_vm2, %v3852_v30  ;;  %v664_v30 = vrot.slane %v3785_v5, 3  ;;  %3716 = vmatprep.subr.msk.bf16.mxu0 %vm210_vm0, %v4210_v12  ;;  %v5173_v5 = vld [vmem:[#allocation12_spill] sm:$0xff] }
  0x2c   :  { %3214 = vmatpush3.bf16.msra.mxu1 %v545_v43  ;;  %3201 = vmatprep.mubr.msk.bf16.mxu1 %vm185_vm2, %v3864_v33  ;;  %v4246_v33 = vsel %vm660_vm3, %v661_v62, %v662_v57  ;;  %v4259_v43 = vsel %vm660_vm3, %v673_v19, %v674_v63  ;;  %v4265_v57 = vsel %vm210_vm0, %v449_v24, %v450_v61  ;;  %v679_v62 = vrot.slane %v3884_v38, 3 }
  0x2d   :  { %3708 = vmatprep.subr.msk.bf16.mxu1 %vm210_vm0, %v4205_v35  ;;  %v4249_v29 = vsel %vm660_vm3, %v664_v30, %v665_v28  ;;  %v678_v28 = vsel %vm660_vm3, %v676_v6, %v677_v31  ;;  %v4270_v30 = vsel %vm660_vm3, %v670_v17, %v671_v36  ;;  %v682_v63 = vrot.slane %v3889_v39, 3 }
  0x2e   :  { %v4273_v48 = vpack.c.bf16 %v678_v28, %v4259_v43  ;;  %v4279_v19 = vpack.c.bf16 %v4270_v30, %v4255_v60  ;;  %v1369_v6 = vrot.slane %v3913_v46, 3  ;;  %v1370_v31 = vrot.slane %v4140_v18, 3 }
  0x2f   :  { %v681_v7 = vsel %vm660_vm3, %v679_v62, %v680_v11  ;;  %v1950_v24 = vrot.slane %v4145_v15, 3  ;;  %v685_v61 = vrot.slane %v3932_v52, 3  ;;  %v4295_v3 = vsel %vm660_vm3, %v682_v63, %v683_v47 }
  0x30   :  { %v4297_v17 = vpack.c.bf16 %v681_v7, %v678_v28  ;;  %v4304_v36 = vpack.c.bf16 %v4295_v3, %v681_v7  ;;  %v691_v63 = vrot.slane %v3965_v0, 3  ;;  %v692_v47 = vrot.slane %v3986_v14, 3 }
  0x31   :  { %3346 = vmatmul.mubr.msk.bf16.gmra.mrb[4].mxu0 %vm185_vm2, %v1677_v22  ;;  %v686_v22 = vrot.slane %v3937_v53, 3  ;;  %v4307_v62 = vsel %vm660_vm3, %v1949_v44, %v1950_v24  ;;  %v695_v7 = vrot.slane %v3991_v16, 3  ;;  %v697_v44 = vrot.slane %v4019_v40, 3 }
  0x32   :  { %3349 = vmatprep.mubr.msk.bf16.mxu0 %vm185_vm2, %v4074_v20  ;;  %5163 = vst [vmem:[#allocation31_spill] sm:$0xff] %v4297_v17  ;;  %5165 = vst [vmem:[#allocation33_spill] sm:$0xff] %v4304_v36  ;;  %v689_v20 = vrot.slane %v3953_v59, 3  ;;  %v4327_v11 = vsel %vm660_vm3, %v691_v63, %v692_v47  ;;  %v706_v47 = vrot.slane %v4040_v55, 3  ;;  %v707_v24 = vrot.slane %v4064_v2, 3  ;;  %v5207_v36 = vld [vmem:[#allocation18_spill] sm:$0xff] }
  0x33   :  { %3202 = vmatmul.mubr.msk.bf16.gmra.mrb[4].mxu1 %vm185_vm2, %v3921_v49  ;;  %v4300_v49 = vsel %vm660_vm3, %v1369_v6, %v1370_v31  ;;  %5166 = vst [vmem:[#allocation34_spill] sm:$0xff] %v4307_v62  ;;  %v4314_v28 = vsel %vm660_vm3, %v685_v61, %v686_v22  ;;  %v694_v31 = vrot.slane %v3970_v1, 3  ;;  %5169 = vst [vmem:[#allocation37_spill] sm:$0xff] %v4327_v11  ;;  %v698_v61 = vrot.slane %v4003_v21, 3 }
  0x34   :  { %3205 = vmatprep.mubr.msk.bf16.mxu1 %vm185_vm2, %v66_v37  ;;  %5164 = vst [vmem:[#allocation32_spill] sm:$0xff] %v4300_v49  ;;  %v688_v37 = vrot.slane %v3948_v58, 3  ;;  %5167 = vst [vmem:[#allocation35_spill] sm:$0xff] %v4314_v28  ;;  %v700_v22 = vrot.slane %v4024_v41, 3  ;;  %v5179_v28 = vld [vmem:[#allocation19_spill] sm:$0xff] }
  0x35   :  { %v4332_v9 = vsel %vm660_vm3, %v694_v31, %v695_v7  ;;  %v4342_v63 = vsel %vm660_vm3, %v697_v44, %v698_v61  ;;  %v5174_v31 = vld [vmem:[#allocation21_spill] sm:$0xff]  ;;  %v5178_v44 = vld [vmem:[#allocation28_spill] sm:$0xff]  ;;  %v5208_v49 = vld [vmem:[#allocation23_spill] sm:$0xff] }
  0x36   :  { %v4319_v6 = vsel %vm660_vm3, %v688_v37, %v689_v20  ;;  %5170 = vst [vmem:[#allocation38_spill] sm:$0xff] %v4332_v9  ;;  %v701_v37 = vrot.slane %v4008_v25, 3  ;;  %v703_v20 = vrot.slane %v4035_v50, 3  ;;  %v4339_v17 = vpack.c.bf16 %v4332_v9, %v4327_v11  ;;  %5172 = vst [vmem:[#allocation40_spill] sm:$0xff] %v4342_v63  ;;  %v5177_v9 = vld [vmem:[#allocation22_spill] sm:$0xff]  ;;  %v5180_v11 = vld [vmem:[#allocation25_spill] sm:$0xff] }
  0x37   :  { %5168 = vst [vmem:[#allocation36_spill] sm:$0xff] %v4319_v6  ;;  %v1373_v61 = vrot.slane %v5178_v44, 3  ;;  %v5206_v6 = vld [vmem:[#allocation17_spill] sm:$0xff] }
  0x38   :  { %5171 = vst [vmem:[#allocation39_spill] sm:$0xff] %v4339_v17  ;;  %v4351_v7 = vsel %vm660_vm3, %v700_v22, %v701_v37  ;;  %v4354_v8 = vsel %vm660_vm3, %v703_v20, %v704_v13  ;;  %v1372_v17 = vrot.slane %v5177_v9, 3  ;;  %v4367_v22 = vsel %vm660_vm3, %v706_v47, %v707_v24  ;;  %v5183_v37 = vld [vmem:[#allocation30_spill] sm:$0xff]  ;;  %v5188_v47 = vld [vmem:[#allocation7_spill] sm:$0xff] }
  0x39   :  { %3350 = vmatmul.mubr.msk.bf16.gmra.mrb[8].mxu0 %vm185_vm2, %v5174_v31  ;;  %5175 = vst [vmem:[#allocation12_spill] sm:$0xff] %v4351_v7  ;;  %5176 = vst [vmem:[#allocation21_spill] sm:$0xff] %v4354_v8  ;;  %v1952_v13 = vrot.slane %v4119_v23, 3  ;;  %v1953_v20 = vrot.slane %v5183_v37, 3  ;;  %v4374_v31 = vld [vmem:[%s5065_s0 + $0xa0] sm:$0xff] }
  0x3a   :  { %3353 = vmatprep.mubr.msk.bf16.mxu0 %vm185_vm2, %v5180_v11  ;;  %5182 = vst [vmem:[#allocation28_spill] sm:$0xff] %v4367_v22  ;;  %v4381_v11 = vsel %vm660_vm3, %v1372_v17, %v1373_v61 }
  0x3b   :  { %3206 = vmatmul.mubr.msk.bf16.gmra.mrb[8].mxu1 %vm185_vm2, %v5173_v5  ;;  %v4364_v5 = vpack.c.bf16 %v4351_v7, %v4342_v63  ;;  %5185 = vst [vmem:[#allocation25_spill] sm:$0xff] %v4381_v11  ;;  %v4389_v7 = vpack.c.bf16 %v3884_v38, %v5188_v47  ;;  %v4394_v63 = vld [vmem:[%s5065_s0 + $0x150] sm:$0xff]  ;;  %v4408_v38 = vpack.c.bf16 %v3913_v46, %v3889_v39  ;;  %v5203_v11 = vld [vmem:[#allocation14_spill] sm:$0xff] }
  0x3c   :  { %3209 = vmatprep.mubr.msk.bf16.mxu1 %vm185_vm2, %v5179_v28  ;;  %v4378_v28 = vpack.c.bf16 %v4367_v22, %v4354_v8  ;;  %v504_v22 = vpack.c.bf16 %v4236_v54, %v4233_v27  ;;  %v505_v47 = vpack.c.bf16 %v4265_v57, %v4262_v4  ;;  %v5199_v27 = vld [vmem:[#allocation10_spill] sm:$0xff] }
  0x3d   :  { %5181 = vst [vmem:[#allocation22_spill] sm:$0xff] %v4364_v5  ;;  %v5186_v5 = vld [vmem:[#allocation4_spill] sm:$0xff] }
  0x3e   :  { %5184 = vst [vmem:[#allocation19_spill] sm:$0xff] %v4378_v28  ;;  %v4385_v24 = vpack.c.bf16 %v5186_v5, %v3807_v10  ;;  %5189 = vst [vmem:[#allocation4_spill] sm:$0xff] %v4389_v7  ;;  %v5190_v28 = vld [vmem:[#allocation9_spill] sm:$0xff]  ;;  %v5192_v17 = vrot.slane %v5186_v5, 2  ;;  %v4404_v10 = vsel %vm660_vm3, %v1952_v13, %v1953_v20  ;;  %v4418_v5 = vpack.c.bf16 %v4019_v40, %v3970_v1 }
  0x3f   :  { %v5191_v8 = vrot.slane %v5190_v28, 2  ;;  %5193 = vst [vmem:[#allocation7_spill] sm:$0xff] %v4404_v10  ;;  %5194 = vst [vmem:[#allocation9_spill] sm:$0xff] %v4408_v38  ;;  %v4427_v13 = vpack.c.bf16 %v4035_v50, %v4024_v41  ;;  %v4431_v20 = vpack.c.bf16 %v5177_v9, %v4040_v55  ;;  %v461_v38 = vrot.slane %v3889_v39, 2 }
  0x40   :  { %5187 = vst [vmem:[#allocation30_spill] sm:$0xff] %v4385_v24  ;;  %5195 = vst [vmem:[#allocation41_spill] sm:$0xff] %v4418_v5  ;;  %v4442_v5 = vld [vmem:[%s5065_s0 + $0x158] sm:$0x7]  ;;  %v5201_v24 = vld [vmem:[#allocation11_spill] sm:$0xff]  ;;  %v4460_v39 = vpack.c.bf16 %v5208_v49, %v5207_v36 }
  0x41   :  { %v454_v61 = vsel %vm210_vm0, %v5192_v17, %v5191_v8  ;;  %v4423_v8 = vld [vmem:[%s5065_s0 + $0xa8] sm:$0x7]  ;;  %5196 = vst [vmem:[#allocation42_spill] sm:$0xff] %v4427_v13  ;;  %5197 = vst [vmem:[#allocation43_spill] sm:$0xff] %v4431_v20  ;;  %v5198_v17 = vld [vmem:[#allocation8_spill] sm:$0xff]  ;;  %v462_v13 = vrot.slane %v3908_v45, 2  ;;  %v4448_v10 = vpack.c.bf16 %v4192_v26, %v5201_v24  ;;  %v5210_v26 = vpack.c.bf16 %v4217_v42, %v4200_v34 }
  0x42   :  { %v4437_v7 = vpack.c.bf16 %v5199_v27, %v5198_v17  ;;  %v2225_v20 = vrot.slane %v4374_v31, 1  ;;  %v2226_v28 = vrot.slane %v4423_v8, 1  ;;  %v5204_v27 = vld [vmem:[#allocation15_spill] sm:$0xff]  ;;  %v5209_v45 = vld [vmem:[#allocation20_spill] sm:$0xff]  ;;  %v2228_v17 = vrot.slane %v4394_v63, 1 }
  0x43   :  { %5202 = vst [vmem:[#allocation10_spill] sm:$0xff] %v4448_v10  ;;  %3210 = vmatmul.mubr.msk.bf16.gmra.mrb[12].mxu1 %vm185_vm2, %v5209_v45  ;;  %3354 = vmatmul.mubr.msk.bf16.gmra.mrb[12].mxu0 %vm185_vm2, %v5210_v26  ;;  %v5211_v24 = vld [vmem:[#allocation24_spill] sm:$0xff]  ;;  %v463_v45 = vsel %vm210_vm0, %v461_v38, %v462_v13  ;;  %v1809_v38 = vrot.slane %v3927_v51, 2  ;;  %v1810_v13 = vrot.slane %v4145_v15, 2  ;;  %v464_v26 = vrot.slane %v3932_v52, 2 }
  0x44   :  { %5200 = vst [vmem:[#allocation8_spill] sm:$0xff] %v4437_v7  ;;  %v5205_v7 = vld [vmem:[#allocation16_spill] sm:$0xff]  ;;  %v4470_v10 = vpack.c.bf16 %v4200_v34, %v5211_v24  ;;  %3215 = vmatprep.mubr.msk.bf16.mxu1 %vm185_vm2, %v504_v22  ;;  %3359 = vmatprep.mubr.msk.bf16.mxu0 %vm185_vm2, %v505_v47  ;;  %v4479_v36 = vsel %vm104_vm1, %v2225_v20, %v2226_v28  ;;  %v766_v34 = vsel %vm210_vm0, %v4205_v35, 0  ;;  %v5213_v22 = vld [vmem:[#allocation26_spill] sm:$0xff]  ;;  %v1974_v20 = vsel %vm210_vm0, %v4210_v12, 0 }
  0x45   :  { %v4456_v62 = vpack.c.bf16 %v5206_v6, %v5205_v7  ;;  %v2229_v6 = vrot.slane %v4442_v5, 1  ;;  %v4482_v7 = vpack.c.bf16 %v454_v61, %v4265_v57  ;;  %v506_v49 = vpack.c.bf16 %v5213_v22, %v454_v61  ;;  %v4513_v15 = vld [vmem:[%s5064_s1 + $0x20] sm:$0x3f]  }
  0x46   :  { %v1205_v28 = vrot.slane %v3913_v46, 2  ;;  %v1206_v35 = vrot.slane %v4140_v18, 2  ;;  %v465_v61 = vrot.slane %v3937_v53, 2  ;;  %v467_v22 = vrot.slane %v3948_v58, 2  ;;  %v4518_v52 = vld [vmem:[%s5064_s1 + $0x60] sm:$0x3f]  }
  0x47   :  { %5212 = vst [vmem:[#allocation11_spill] sm:$0xff] %v4482_v7  ;;  %v4490_v24 = vsel %vm104_vm1, %v2228_v17, %v2229_v6  ;;  %v5214_v17 = vld [vmem:[#allocation27_spill] sm:$0xff]  ;;  %v468_v12 = vrot.slane %v3953_v59, 2  ;;  %v470_v46 = vrot.slane %v3965_v0, 2  ;;  %v471_v57 = vrot.slane %v3986_v14, 2 }
  0x48   :  { %v507_v6 = vpack.c.bf16 %v463_v45, %v5214_v17  ;;  %v473_v18 = vrot.slane %v3970_v1, 2  ;;  %v474_v7 = vrot.slane %v3991_v16, 2  ;;  %v1207_v53 = vsel %vm210_vm0, %v1205_v28, %v1206_v35 }
  0x49   :  { %v4524_v59 = vsel %vm210_vm0, %v1809_v38, %v1810_v13  ;;  %v466_v1 = vsel %vm210_vm0, %v464_v26, %v465_v61  ;;  %v4528_v14 = vsel %vm210_vm0, %v467_v22, %v468_v12  ;;  %v4533_v16 = vsel %vm210_vm0, %v470_v46, %v471_v57 }
  0x4a   :  { %v4536_v28 = vpack.c.bf16 %v1207_v53, %v463_v45  ;;  %v1817_v35 = vpack.c.bf16 %v4524_v59, %v1207_v53  ;;  %v476_v26 = vrot.slane %v4019_v40, 2  ;;  %v480_v45 = vrot.slane %v4008_v25, 2 }
  0x4b   :  { %3216 = vmatmul.mubr.msk.bf16.vlgmr.msra.gmra.mrb[0].mxu1 %vm185_vm2, %v505_v47  ;;  %3360 = vmatmul.mubr.msk.bf16.vlgmr.msra.gmra.mrb[0].mxu0 %vm185_vm2, %v506_v49  ;;  %v475_v47 = vsel %vm210_vm0, %v473_v18, %v474_v7  ;;  %v479_v7 = vrot.slane %v4024_v41, 2  ;;  %v508_v57 = vpack.c.bf16 %v4528_v14, %v466_v1  ;;  %v482_v13 = vrot.slane %v4035_v50, 2 }
  0x4c   :  { %3232 = vmatpush3.bf16.msra.mxu1 %v766_v34  ;;  %3376 = vmatpush3.bf16.msra.mxu0 %v1974_v20  ;;  %v2365_v34 = vrot.slane %v4374_v31, 2  ;;  %v477_v20 = vrot.slane %v4003_v21, 2  ;;  %v509_v38 = vpack.c.bf16 %v475_v47, %v4533_v16  ;;  %v483_v61 = vrot.slane %v4045_v56, 2 }
  0x4d   :  { %3219 = vmatprep.mubr.msk.bf16.mxu1 %vm185_vm2, %v506_v49  ;;  %3363 = vmatprep.mubr.msk.bf16.mxu0 %vm185_vm2, %v507_v6  ;;  %v2366_v49 = vrot.slane %v4423_v8, 2  ;;  %v485_v22 = vrot.slane %v4040_v55, 2  ;;  %v486_v40 = vrot.slane %v4064_v2, 2  ;;  %v1217_v41 = vpack.c.bf16 %v4533_v16, %v4528_v14 }
  0x4e   :  { %3709 = vmatprep.subr.msk.bf16.mxu1 %vm210_vm0, %v4513_v15  ;;  %3717 = vmatprep.subr.msk.bf16.mxu0 %vm210_vm0, %v4518_v52  ;;  %v478_v25 = vsel %vm210_vm0, %v476_v26, %v477_v20  ;;  %v481_v50 = vsel %vm210_vm0, %v479_v7, %v480_v45  ;;  %v484_v56 = vsel %vm210_vm0, %v482_v13, %v483_v61  ;;  %v1208_v12 = vrot.slane %v5177_v9, 2  ;;  %v3731_v61 = vld [vmem:[%s5064_s1 + $0x28] sm:$0x3f]  }
  0x4f   :  { %v4553_v17 = vsel %vm210_vm0, %v2365_v34, %v2366_v49  ;;  %v4568_v55 = vpack.c.bf16 %v478_v25, %v475_v47  ;;  %v487_v2 = vsel %vm210_vm0, %v485_v22, %v486_v40  ;;  %v1209_v46 = vrot.slane %v5178_v44, 2  ;;  %v5218_v40 = vld [vmem:[#allocation34_spill] sm:$0xff] }
  0x50   :  { %v2373_v21 = vpack.c.bf16 %v4553_v17, %v4524_v59  ;;  %v511_v18 = vpack.c.bf16 %v487_v2, %v484_v56  ;;  %v1812_v53 = vrot.slane %v4119_v23, 2  ;;  %v1813_v1 = vrot.slane %v5183_v37, 2 }
  0x51   :  { %v1210_v47 = vsel %vm210_vm0, %v1208_v12, %v1209_v46  ;;  %v2368_v34 = vrot.slane %v4394_v63, 2  ;;  %v2369_v37 = vrot.slane %v4442_v5, 2  ;;  %v1377_v7 = vpack.c.bf16 %v4255_v60, %v4249_v29  ;;  %v5225_v12 = vld [vmem:[#allocation38_spill] sm:$0xff]  ;;  %v5226_v46 = vld [vmem:[#allocation40_spill] sm:$0xff] }
  0x52   :  { %v4584_v9 = vsel %vm210_vm0, %v1812_v53, %v1813_v1  ;;  %v4586_v44 = vpack.c.bf16 %v1210_v47, %v487_v2  ;;  %v5215_v45 = vpack.c.bf16 %v4249_v29, %v4246_v33  ;;  %v2106_v13 = vsel %vm210_vm0, %v4518_v52, 0  ;;  %v3732_v33 = vld [vmem:[%s5064_s1 + $0x68] sm:$0x3f]   ;;  %v5227_v53 = vld [vmem:[#allocation12_spill] sm:$0xff]  ;;  %v5228_v1 = vld [vmem:[#allocation21_spill] sm:$0xff] }
  0x53   :  { %3220 = vmatmul.mubr.msk.bf16.gmra.mrb[4].mxu1 %vm185_vm2, %v507_v6  ;;  %3364 = vmatmul.mubr.msk.bf16.gmra.mrb[4].mxu0 %vm185_vm2, %v1817_v35  ;;  %v510_v6 = vpack.c.bf16 %v481_v50, %v478_v25  ;;  %v4576_v35 = vpack.c.bf16 %v484_v56, %v481_v50  ;;  %v1818_v49 = vpack.c.bf16 %v4584_v9, %v1210_v47  ;;  %v2506_v52 = vrot.slane %v4423_v8, 3  ;;  %v5220_v25 = vld [vmem:[#allocation36_spill] sm:$0xff]  ;;  %v5221_v50 = vld [vmem:[#allocation37_spill] sm:$0xff]  ;;  %v5222_v2 = vld [vmem:[#allocation35_spill] sm:$0xff] }
  0x54   :  { %3223 = vmatprep.mubr.msk.bf16.mxu1 %vm185_vm2, %v508_v57  ;;  %3367 = vmatprep.mubr.msk.bf16.mxu0 %vm185_vm2, %v509_v38  ;;  %v4592_v26 = vsel %vm210_vm0, %v2368_v34, %v2369_v37  ;;  %v4608_v57 = vpack.c.bf16 %v4259_v43, %v4270_v30  ;;  %v5216_v43 = vld [vmem:[#allocation32_spill] sm:$0xff]  ;;  %v1381_v56 = vpack.c.bf16 %v5221_v50, %v5220_v25  ;;  %v5229_v34 = vld [vmem:[#allocation22_spill] sm:$0xff]  ;;  %v5230_v37 = vld [vmem:[#allocation19_spill] sm:$0xff] }
  0x55   :  { %v2374_v20 = vpack.c.bf16 %v4592_v26, %v4584_v9  ;;  %v4626_v30 = vpack.c.bf16 %v5216_v43, %v4295_v3  ;;  %v5223_v8 = vpack.c.bf16 %v5220_v25, %v5222_v2  ;;  %v4661_v47 = vpack.c.bf16 %v5228_v1, %v5227_v53  ;;  %v5235_v2 = vld [vmem:[#allocation2_spill] sm:$0xff]  ;;  %v3734_v53 = vld [vmem:[%s5064_s1 + $0x70] sm:$0x3f]  }
  0x56   :  { %v5238_v1 = vld [vmem:[#allocation4_spill] sm:$0xff] }
  0x5b   :  { %3224 = vmatmul.mubr.msk.bf16.gmra.mrb[8].mxu1 %vm185_vm2, %v509_v38  ;;  %3368 = vmatmul.mubr.msk.bf16.gmra.mrb[8].mxu0 %vm185_vm2, %v510_v6  ;;  %v922_v38 = vsel %vm210_vm0, %v4513_v15, 0  ;;  %v5217_v15 = vld [vmem:[#allocation33_spill] sm:$0xff] }
  0x5c   :  { %3227 = vmatprep.mubr.msk.bf16.mxu1 %vm185_vm2, %v510_v6  ;;  %3371 = vmatprep.mubr.msk.bf16.mxu0 %vm185_vm2, %v511_v18  ;;  %v5224_v6 = vld [vmem:[#allocation39_spill] sm:$0xff] }
  0x63   :  { %3228 = vmatmul.mubr.msk.bf16.gmra.mrb[12].mxu1 %vm185_vm2, %v511_v18  ;;  %3372 = vmatmul.mubr.msk.bf16.gmra.mrb[12].mxu0 %vm185_vm2, %v1818_v49  ;;  %v4657_v18 = vpack.c.bf16 %v5226_v46, %v5225_v12  ;;  %v5231_v49 = vld [vmem:[#allocation28_spill] sm:$0xff]  ;;  %v2250_v12 = vsel %vm210_vm0, %v3732_v33, 0 }
  0x64   :  { %3233 = vmatprep.mubr.msk.bf16.mxu1 %vm185_vm2, %v5215_v45  ;;  %3377 = vmatprep.mubr.msk.bf16.mxu0 %vm185_vm2, %v4279_v19  ;;  %v5232_v45 = vld [vmem:[#allocation25_spill] sm:$0xff]  ;;  %v3733_v46 = vld [vmem:[%s5064_s1 + $0x30] sm:$0x3f]  }
  0x6b   :  { %3234 = vmatmul.mubr.msk.bf16.vlgmr.msra.gmra.mrb[0].mxu1 %vm185_vm2, %v4279_v19  ;;  %3378 = vmatmul.mubr.msk.bf16.vlgmr.msra.gmra.mrb[0].mxu0 %vm185_vm2, %v4273_v48  ;;  %v2505_v19 = vrot.slane %v4374_v31, 3 }
  0x6c   :  { %3250 = vmatpush3.bf16.msra.mxu1 %v922_v38  ;;  %3394 = vmatpush3.bf16.msra.mxu0 %v2106_v13  ;;  %v4673_v38 = vpack.c.bf16 %v5232_v45, %v5231_v49  ;;  %v2508_v13 = vrot.slane %v4394_v63, 3  ;;  %v5243_v49 = vld [vmem:[#allocation42_spill] sm:$0xff] }
  0x6d   :  { %3237 = vmatprep.mubr.msk.bf16.mxu1 %vm185_vm2, %v4273_v48  ;;  %3381 = vmatprep.mubr.msk.bf16.mxu0 %vm185_vm2, %v5217_v15  ;;  %v4637_v22 = vsel %vm660_vm3, %v2505_v19, %v2506_v52  ;;  %v5219_v48 = vpack.c.bf16 %v5218_v40, %v5216_v43  ;;  %v2509_v43 = vrot.slane %v4442_v5, 3  ;;  %v1090_v5 = vsel %vm210_vm0, %v3731_v61, 0 }
  0x6e   :  { %3710 = vmatprep.subr.msk.bf16.mxu1 %vm210_vm0, %v3731_v61  ;;  %3718 = vmatprep.subr.msk.bf16.mxu0 %vm210_vm0, %v3732_v33  ;;  %v2513_v3 = vpack.c.bf16 %v4637_v22, %v5218_v40  ;;  %v5239_v61 = vld [vmem:[#allocation9_spill] sm:$0xff]  ;;  %v5240_v33 = vpack.c.bf16 %v4374_v31, %v3927_v51  ;;  %v5244_v51 = vld [vmem:[#allocation43_spill] sm:$0xff] }
  0x6f   :  { %v4680_v52 = vsel %vm660_vm3, %v2508_v13, %v2509_v43  ;;  %v5247_v31 = vld [vmem:[#allocation5_spill] sm:$0xff]  ;;  %v5249_v13 = vld [vmem:[#allocation8_spill] sm:$0xff]  ;;  %v1254_v43 = vsel %vm210_vm0, %v3733_v46, 0 }
  0x73   :  { %3238 = vmatmul.mubr.msk.bf16.gmra.mrb[4].mxu1 %vm185_vm2, %v5217_v15  ;;  %3382 = vmatmul.mubr.msk.bf16.gmra.mrb[4].mxu0 %vm185_vm2, %v5219_v48  ;;  %v5233_v15 = vld [vmem:[#allocation7_spill] sm:$0xff] }
  0x74   :  { %3241 = vmatprep.mubr.msk.bf16.mxu1 %vm185_vm2, %v5223_v8  ;;  %3385 = vmatprep.mubr.msk.bf16.mxu0 %vm185_vm2, %v5224_v6  ;;  %v1958_v19 = vpack.c.bf16 %v5233_v15, %v5232_v45  ;;  %v5234_v48 = vld [vmem:[#allocation3_spill] sm:$0xff] }
  0x75   :  { %v5236_v8 = vpack.c.bf16 %v5234_v48, %v5235_v2  ;;  %v3735_v48 = vld [vmem:[%s5064_s1 + $0x38] sm:$0x3f]   ;;  %v5251_v2 = vld [vmem:[#allocation10_spill] sm:$0xff] }
  0x7b   :  { %3242 = vmatmul.mubr.msk.bf16.gmra.mrb[8].mxu1 %vm185_vm2, %v5224_v6  ;;  %3386 = vmatmul.mubr.msk.bf16.gmra.mrb[8].mxu0 %vm185_vm2, %v5229_v34  ;;  %v5237_v6 = vld [vmem:[#allocation30_spill] sm:$0xff] }
  0x7c   :  { %3245 = vmatprep.mubr.msk.bf16.mxu1 %vm185_vm2, %v5229_v34  ;;  %3389 = vmatprep.mubr.msk.bf16.mxu0 %vm185_vm2, %v5230_v37  ;;  %v5241_v34 = vpack.c.bf16 %v3965_v0, %v3948_v58  ;;  %v5245_v58 = vpack.c.bf16 %v4394_v63, %v4119_v23  ;;  %v5246_v0 = vld [vmem:[#allocation6_spill] sm:$0xff]  ;;  %v3736_v23 = vld [vmem:[%s5064_s1 + $0x78] sm:$0x3f]  }
  0x7d   :  { %v5248_v45 = vpack.c.bf16 %v5246_v0, %v5247_v31  ;;  %v5250_v63 = vld [vmem:[#allocation13_spill] sm:$0xff] }
  0x83   :  { %3246 = vmatmul.mubr.msk.bf16.gmra.mrb[12].mxu1 %vm185_vm2, %v5230_v37  ;;  %3390 = vmatmul.mubr.msk.bf16.gmra.mrb[12].mxu0 %vm185_vm2, %v1958_v19  ;;  %v5242_v37 = vld [vmem:[#allocation41_spill] sm:$0xff]  ;;  %v2390_v19 = vsel %vm210_vm0, %v3734_v53, 0 }
  0x84   :  { %3251 = vmatprep.mubr.msk.bf16.mxu1 %vm185_vm2, %v5236_v8  ;;  %3395 = vmatprep.mubr.msk.bf16.mxu0 %vm185_vm2, %v5237_v6  ;;  %v5252_v8 = vpack.c.bf16 %v4479_v36, %v4195_v32  ;;  %v5254_v32 = vpack.c.bf16 %v4490_v24, %v4217_v42  ;;  %v5258_v42 = vld [vmem:[#allocation31_spill] sm:$0xff] }
  0x8b   :  { %3252 = vmatmul.mubr.msk.bf16.vlgmr.msra.gmra.mrb[0].mxu1 %vm185_vm2, %v5237_v6  ;;  %3396 = vmatmul.mubr.msk.bf16.vlgmr.msra.gmra.mrb[0].mxu0 %vm185_vm2, %v5238_v1  ;;  %v5253_v6 = vpack.c.bf16 %v5204_v27, %v5203_v11  ;;  %v5256_v11 = vld [vmem:[#allocation11_spill] sm:$0xff]  ;;  %v1418_v27 = vsel %vm210_vm0, %v3735_v48, 0 }
  0x8c   :  { %3268 = vmatpush3.bf16.msra.mxu1 %v1090_v5  ;;  %3412 = vmatpush3.bf16.msra.mxu0 %v2250_v12 }
  0x8d   :  { %3255 = vmatprep.mubr.msk.bf16.mxu1 %vm185_vm2, %v5238_v1  ;;  %3399 = vmatprep.mubr.msk.bf16.mxu0 %vm185_vm2, %v5239_v61 }
  0x8e   :  { %3711 = vmatprep.subr.msk.bf16.mxu1 %vm210_vm0, %v3733_v46  ;;  %3719 = vmatprep.subr.msk.bf16.mxu0 %vm210_vm0, %v3734_v53 }
  0x93   :  { %3256 = vmatmul.mubr.msk.bf16.gmra.mrb[4].mxu1 %vm185_vm2, %v5239_v61  ;;  %3400 = vmatmul.mubr.msk.bf16.gmra.mrb[4].mxu0 %vm185_vm2, %v5240_v33 }
  0x94   :  { %3259 = vmatprep.mubr.msk.bf16.mxu1 %vm185_vm2, %v5241_v34  ;;  %3403 = vmatprep.mubr.msk.bf16.mxu0 %vm185_vm2, %v5242_v37 }
  0x9b   :  { %3260 = vmatmul.mubr.msk.bf16.gmra.mrb[8].mxu1 %vm185_vm2, %v5242_v37  ;;  %3404 = vmatmul.mubr.msk.bf16.gmra.mrb[8].mxu0 %vm185_vm2, %v5243_v49 }
  0x9c   :  { %3263 = vmatprep.mubr.msk.bf16.mxu1 %vm185_vm2, %v5243_v49  ;;  %3407 = vmatprep.mubr.msk.bf16.mxu0 %vm185_vm2, %v5244_v51 }
  0xa3   :  { %3264 = vmatmul.mubr.msk.bf16.gmra.mrb[12].mxu1 %vm185_vm2, %v5244_v51  ;;  %3408 = vmatmul.mubr.msk.bf16.gmra.mrb[12].mxu0 %vm185_vm2, %v5245_v58 }
  0xa4   :  { %3269 = vmatprep.mubr.msk.bf16.mxu1 %vm185_vm2, %v5248_v45  ;;  %3413 = vmatprep.mubr.msk.bf16.mxu0 %vm185_vm2, %v5249_v13 }
  0xab   :  { %3270 = vmatmul.mubr.msk.bf16.vlgmr.msra.gmra.mrb[0].mxu1 %vm185_vm2, %v5249_v13  ;;  %3414 = vmatmul.mubr.msk.bf16.vlgmr.msra.gmra.mrb[0].mxu0 %vm185_vm2, %v5250_v63 }
  0xac   :  { %3286 = vmatpush3.bf16.msra.mxu1 %v1254_v43  ;;  %3430 = vmatpush3.bf16.msra.mxu0 %v2390_v19 }
  0xad   :  { %3273 = vmatprep.mubr.msk.bf16.mxu1 %vm185_vm2, %v5250_v63  ;;  %3417 = vmatprep.mubr.msk.bf16.mxu0 %vm185_vm2, %v5251_v2 }
  0xae   :  { %3712 = vmatprep.subr.msk.bf16.mxu1 %vm210_vm0, %v3735_v48  ;;  %3720 = vmatprep.subr.msk.bf16.mxu0 %vm210_vm0, %v3736_v23 }
  0xb3   :  { %3274 = vmatmul.mubr.msk.bf16.gmra.mrb[4].mxu1 %vm185_vm2, %v5251_v2  ;;  %3418 = vmatmul.mubr.msk.bf16.gmra.mrb[4].mxu0 %vm185_vm2, %v5252_v8 }
  0xb4   :  { %3277 = vmatprep.mubr.msk.bf16.mxu1 %vm185_vm2, %v5253_v6  ;;  %3421 = vmatprep.mubr.msk.bf16.mxu0 %vm185_vm2, %v4456_v62 }
  0xbb   :  { %3278 = vmatmul.mubr.msk.bf16.gmra.mrb[8].mxu1 %vm185_vm2, %v4456_v62  ;;  %3422 = vmatmul.mubr.msk.bf16.gmra.mrb[8].mxu0 %vm185_vm2, %v4460_v39  ;;  %v5255_v62 = vpack.c.bf16 %v4262_v4, %v4236_v54  ;;  %v2514_v54 = vpack.c.bf16 %v4680_v52, %v5233_v15 }
  0xbc   :  { %3281 = vmatprep.mubr.msk.bf16.mxu1 %vm185_vm2, %v4460_v39  ;;  %3425 = vmatprep.mubr.msk.bf16.mxu0 %vm185_vm2, %v4470_v10  ;;  %v2530_v39 = vsel %vm210_vm0, %v3736_v23, 0 }
  0xc3   :  { %3282 = vmatmul.mubr.msk.bf16.gmra.mrb[12].mxu1 %vm185_vm2, %v4470_v10  ;;  %3426 = vmatmul.mubr.msk.bf16.gmra.mrb[12].mxu0 %vm185_vm2, %v5254_v32  ;;  %v5257_v10 = vld [vmem:[#allocation29_spill] sm:$0xff] }
  0xc4   :  { %3287 = vmatprep.mubr.msk.bf16.mxu1 %vm185_vm2, %v5255_v62  ;;  %3431 = vmatprep.mubr.msk.bf16.mxu0 %vm185_vm2, %v5256_v11 }
  0xcb   :  { %3288 = vmatmul.mubr.msk.bf16.vlgmr.msra.gmra.mrb[0].mxu1 %vm185_vm2, %v5256_v11  ;;  %3432 = vmatmul.mubr.msk.bf16.vlgmr.msra.gmra.mrb[0].mxu0 %vm185_vm2, %v5257_v10 }
  0xcc   :  { %3304 = vmatpush3.bf16.msra.mxu1 %v1418_v27  ;;  %3448 = vmatpush3.bf16.msra.mxu0 %v2530_v39 }
  0xcd   :  { %3291 = vmatprep.mubr.msk.bf16.mxu1 %vm185_vm2, %v5257_v10  ;;  %3435 = vmatprep.mubr.msk.bf16.mxu0 %vm185_vm2, %v4536_v28 }
  0xd3   :  { %3292 = vmatmul.mubr.msk.bf16.gmra.mrb[4].mxu1 %vm185_vm2, %v4536_v28  ;;  %3436 = vmatmul.mubr.msk.bf16.gmra.mrb[4].mxu0 %vm185_vm2, %v2373_v21 }
  0xd4   :  { %3295 = vmatprep.mubr.msk.bf16.mxu1 %vm185_vm2, %v1217_v41  ;;  %3439 = vmatprep.mubr.msk.bf16.mxu0 %vm185_vm2, %v4568_v55 }
  0xdb   :  { %3296 = vmatmul.mubr.msk.bf16.gmra.mrb[8].mxu1 %vm185_vm2, %v4568_v55  ;;  %3440 = vmatmul.mubr.msk.bf16.gmra.mrb[8].mxu0 %vm185_vm2, %v4576_v35 }
  0xdc   :  { %3299 = vmatprep.mubr.msk.bf16.mxu1 %vm185_vm2, %v4576_v35  ;;  %3443 = vmatprep.mubr.msk.bf16.mxu0 %vm185_vm2, %v4586_v44 }
  0xe3   :  { %3300 = vmatmul.mubr.msk.bf16.gmra.mrb[12].mxu1 %vm185_vm2, %v4586_v44  ;;  %3444 = vmatmul.mubr.msk.bf16.gmra.mrb[12].mxu0 %vm185_vm2, %v2374_v20 }
  0xe4   :  { %3305 = vmatprep.mubr.msk.bf16.mxu1 %vm185_vm2, %v1377_v7  ;;  %3449 = vmatprep.mubr.msk.bf16.mxu0 %vm185_vm2, %v4608_v57 }
  0xeb   :  { %3306 = vmatmul.mubr.msk.bf16.vlgmr.msra.gmra.mrb[0].mxu1 %vm185_vm2, %v4608_v57  ;;  %3450 = vmatmul.mubr.msk.bf16.vlgmr.msra.gmra.mrb[0].mxu0 %vm185_vm2, %v5258_v42 }
  0xec   :  { %3309 = vmatprep.mubr.msk.bf16.mxu1 %vm185_vm2, %v5258_v42  ;;  %3453 = vmatprep.mubr.msk.bf16.mxu0 %vm185_vm2, %v4626_v30 }
  0xf3   :  { %3310 = vmatmul.mubr.msk.bf16.gmra.mrb[4].mxu1 %vm185_vm2, %v4626_v30  ;;  %3454 = vmatmul.mubr.msk.bf16.gmra.mrb[4].mxu0 %vm185_vm2, %v2513_v3 }
  0xf4   :  { %3313 = vmatprep.mubr.msk.bf16.mxu1 %vm185_vm2, %v1381_v56  ;;  %3457 = vmatprep.mubr.msk.bf16.mxu0 %vm185_vm2, %v4657_v18 }
  0xfb   :  { %3314 = vmatmul.mubr.msk.bf16.gmra.mrb[8].mxu1 %vm185_vm2, %v4657_v18  ;;  %3458 = vmatmul.mubr.msk.bf16.gmra.mrb[8].mxu0 %vm185_vm2, %v4661_v47 }
  0xfc   :  { %3317 = vmatprep.mubr.msk.bf16.mxu1 %vm185_vm2, %v4661_v47  ;;  %3461 = vmatprep.mubr.msk.bf16.mxu0 %vm185_vm2, %v4673_v38 }
 0x103   :  { %3318 = vmatmul.mubr.msk.bf16.gmra.mrb[12].mxu1 %vm185_vm2, %v4673_v38  ;;  %3462 = vmatmul.mubr.msk.bf16.gmra.mrb[12].mxu0 %vm185_vm2, %v2514_v54 }
 0x1be   :  { %v3307_v29 = vpop.f32.mrb[0].mxu1  ;;  %v3451_v60 = vpop.f32.mrb[0].mxu0 }
 0x1bf   :  { %v4866_v4 = vadd.f32 %v3451_v60, %v3307_v29  ;;  %v1454_v36 = vpop.f32.mrb[1].mxu1  ;;  %v2566_v24 = vpop.f32.mrb[1].mxu0 }
 0x1c0   :  { %v4868_v59 = vadd.f32 %v2566_v24, %v1454_v36  ;;  %v3308_v14 = vpop.f32.mrb[2].mxu1  ;;  %v3452_v16 = vpop.f32.mrb[2].mxu0 }
 0x1c1   :  { %v4870_v28 = vadd.f32 %v3452_v16, %v3308_v14  ;;  %v1457_v17 = vpop.f32.mrb[3].mxu1  ;;  %v2569_v21 = vpop.f32.mrb[3].mxu0  ;;  %v2687_v35 = vmul.f32 %v4866_v4, %v4866_v4  ;;  %v2651_v57 = vsel %vm2647_vm4, %v4866_v4, 0.0 }
 0x1c2   :  { %v2685_v41 = vmul.f32 %v4868_v59, %v4868_v59  ;;  %v4874_v55 = vadd.f32 %v2569_v21, %v1457_v17  ;;  %v2648_v9 = vsel %vm2647_vm4, %v4868_v59, 0.0 }
 0x1c3   :  { %v2688_v20 = vmul.f32 %v4870_v28, %v4870_v28  ;;  %v2704_v38 = vsel %vm2647_vm4, %v2687_v35, 0.0  ;;  %v2653_v15 = vsel %vm2647_vm4, %v4870_v28, 0.0 }
 0x1c4   :  { %v2649_v44 = vsel %vm2647_vm4, %v4874_v55, 0.0  ;;  %v2686_v26 = vmul.f32 %v4874_v55, %v4874_v55  ;;  %v2701_v30 = vsel %vm2647_vm4, %v2685_v41, 0.0 }
 0x1c5   :  { %v2650_v7 = vadd.f32 %v2649_v44, %v2648_v9  ;;  %v2706_v46 = vsel %vm2647_vm4, %v2688_v20, 0.0 }
 0x1c6   :  { %v2702_v22 = vsel %vm2647_vm4, %v2686_v26, 0.0  ;;  %v3311_v40 = vpop.f32.mrb[4].mxu1  ;;  %v3455_v3 = vpop.f32.mrb[4].mxu0 }
 0x1c7   :  { %v2652_v25 = vadd.f32 %v2651_v57, %v2650_v7  ;;  %v2703_v50 = vadd.f32 %v2702_v22, %v2701_v30  ;;  %v4890_v56 = vadd.f32 %v3455_v3, %v3311_v40  ;;  %v1470_v18 = vpop.f32.mrb[5].mxu1  ;;  %v2582_v47 = vpop.f32.mrb[5].mxu0 }
 0x1c8   :  { %v4895_v52 = vadd.f32 %v2582_v47, %v1470_v18  ;;  %v3312_v5 = vpop.f32.mrb[6].mxu1  ;;  %v3456_v12 = vpop.f32.mrb[6].mxu0 }
 0x1c9   :  { %v2705_v53 = vadd.f32 %v2704_v38, %v2703_v50  ;;  %v2654_v1 = vadd.f32 %v2653_v15, %v2652_v25  ;;  %v1473_v61 = vpop.f32.mrb[7].mxu1  ;;  %v2585_v33 = vpop.f32.mrb[7].mxu0  ;;  %v4902_v49 = vadd.f32 %v3456_v12, %v3312_v5  ;;  %v2691_v13 = vmul.f32 %v4890_v56, %v4890_v56 }
 0x1ca   :  { %v2655_v34 = vsel %vm2647_vm4, %v4895_v52, 0.0  ;;  %v2689_v37 = vmul.f32 %v4895_v52, %v4895_v52  ;;  %v4904_v51 = vadd.f32 %v2585_v33, %v1473_v61  ;;  %v2659_v23 = vsel %vm2647_vm4, %v4890_v56, 0.0 }
 0x1cb   :  { %v2656_v58 = vadd.f32 %v2655_v34, %v2654_v1  ;;  %v2707_v0 = vadd.f32 %v2706_v46, %v2705_v53  ;;  %v2692_v8 = vmul.f32 %v4902_v49, %v4902_v49  ;;  %v2661_v39 = vsel %vm2647_vm4, %v4902_v49, 0.0 }
 0x1cc   :  { %v2708_v31 = vsel %vm2647_vm4, %v2689_v37, 0.0  ;;  %v2657_v45 = vsel %vm2647_vm4, %v4904_v51, 0.0  ;;  %v2690_v48 = vmul.f32 %v4904_v51, %v4904_v51  ;;  %v2712_v60 = vsel %vm2647_vm4, %v2691_v13, 0.0 }
 0x1cd   :  { %v2709_v43 = vadd.f32 %v2708_v31, %v2707_v0  ;;  %v2658_v19 = vadd.f32 %v2657_v45, %v2656_v58  ;;  %v2714_v9 = vsel %vm2647_vm4, %v2692_v8, 0.0 }
 0x1ce   :  { %v3315_v63 = vpop.f32.mrb[8].mxu1  ;;  %v3459_v2 = vpop.f32.mrb[8].mxu0  ;;  %v2710_v32 = vsel %vm2647_vm4, %v2690_v48, 0.0 }
 0x1cf   :  { %v2660_v6 = vadd.f32 %v2659_v23, %v2658_v19  ;;  %v4918_v62 = vadd.f32 %v3459_v2, %v3315_v63  ;;  %v1486_v11 = vpop.f32.mrb[9].mxu1  ;;  %v2598_v27 = vpop.f32.mrb[9].mxu0  ;;  %v2711_v10 = vadd.f32 %v2710_v32, %v2709_v43 }
 0x1d0   :  { %v4922_v42 = vadd.f32 %v2598_v27, %v1486_v11  ;;  %v3316_v54 = vpop.f32.mrb[10].mxu1  ;;  %v3460_v29 = vpop.f32.mrb[10].mxu0 }
 0x1d1   :  { %v2662_v36 = vadd.f32 %v2661_v39, %v2660_v6  ;;  %v4925_v24 = vadd.f32 %v3460_v29, %v3316_v54  ;;  %v1489_v14 = vpop.f32.mrb[11].mxu1  ;;  %v2601_v16 = vpop.f32.mrb[11].mxu0  ;;  %v2713_v17 = vadd.f32 %v2712_v60, %v2711_v10  ;;  %v2695_v30 = vmul.f32 %v4918_v62, %v4918_v62 }
 0x1d2   :  { %v2663_v21 = vsel %vm2647_vm4, %v4922_v42, 0.0  ;;  %v2693_v41 = vmul.f32 %v4922_v42, %v4922_v42  ;;  %v4931_v35 = vadd.f32 %v2601_v16, %v1489_v14  ;;  %v2667_v40 = vsel %vm2647_vm4, %v4918_v62, 0.0 }
 0x1d3   :  { %v2664_v44 = vadd.f32 %v2663_v21, %v2662_v36  ;;  %v2715_v26 = vadd.f32 %v2714_v9, %v2713_v17  ;;  %v2696_v47 = vmul.f32 %v4925_v24, %v4925_v24  ;;  %v2669_v46 = vsel %vm2647_vm4, %v4925_v24, 0.0 }
 0x1d4   :  { %v2716_v20 = vsel %vm2647_vm4, %v2693_v41, 0.0  ;;  %v2665_v7 = vsel %vm2647_vm4, %v4931_v35, 0.0  ;;  %v2694_v57 = vmul.f32 %v4931_v35, %v4931_v35  ;;  %v2720_v34 = vsel %vm2647_vm4, %v2695_v30, 0.0 }
 0x1d5   :  { %v2666_v22 = vadd.f32 %v2665_v7, %v2664_v44  ;;  %v2717_v3 = vadd.f32 %v2716_v20, %v2715_v26  ;;  %v2722_v48 = vsel %vm2647_vm4, %v2696_v47, 0.0 }
 0x1d6   :  { %v2718_v25 = vsel %vm2647_vm4, %v2694_v57, 0.0  ;;  %v3319_v50 = vpop.f32.mrb[12].mxu1  ;;  %v3463_v18 = vpop.f32.mrb[12].mxu0 }
 0x1d7   :  { %v2668_v38 = vadd.f32 %v2667_v40, %v2666_v22  ;;  %v4946_v15 = vadd.f32 %v3463_v18, %v3319_v50  ;;  %v1502_v5 = vpop.f32.mrb[13].mxu1  ;;  %v2614_v12 = vpop.f32.mrb[13].mxu0  ;;  %v2719_v53 = vadd.f32 %v2718_v25, %v2717_v3 }
 0x1d8   :  { %v4950_v1 = vadd.f32 %v2614_v12, %v1502_v5  ;;  %v3320_v61 = vpop.f32.mrb[14].mxu1  ;;  %v3464_v33 = vpop.f32.mrb[14].mxu0 }
 0x1d9   :  { %v2670_v37 = vadd.f32 %v2669_v46, %v2668_v38  ;;  %v4953_v58 = vadd.f32 %v3464_v33, %v3320_v61  ;;  %v1505_v0 = vpop.f32.mrb[15].mxu1  ;;  %v2617_v31 = vpop.f32.mrb[15].mxu0  ;;  %v2721_v45 = vadd.f32 %v2720_v34, %v2719_v53  ;;  %v2699_v32 = vmul.f32 %v4946_v15, %v4946_v15 }
 0x1da   :  { %v2671_v13 = vsel %vm2647_vm4, %v4950_v1, 0.0  ;;  %v2697_v43 = vmul.f32 %v4950_v1, %v4950_v1  ;;  %v4959_v19 = vadd.f32 %v2617_v31, %v1505_v0  ;;  %v2675_v27 = vsel %vm2647_vm4, %v4946_v15, 0.0 }
 0x1db   :  { %v2672_v23 = vadd.f32 %v2671_v13, %v2670_v37  ;;  %v2723_v63 = vadd.f32 %v2722_v48, %v2721_v45  ;;  %v2700_v54 = vmul.f32 %v4953_v58, %v4953_v58  ;;  %v2677_v60 = vsel %vm2647_vm4, %v4953_v58, 0.0 }
 0x1dc   :  { %v2724_v2 = vsel %vm2647_vm4, %v2697_v43, 0.0  ;;  %v2673_v8 = vsel %vm2647_vm4, %v4959_v19, 0.0  ;;  %v2698_v6 = vmul.f32 %v4959_v19, %v4959_v19  ;;  %v2728_v14 = vsel %vm2647_vm4, %v2699_v32, 0.0 }
 0x1dd   :  { %v2674_v11 = vadd.f32 %v2673_v8, %v2672_v23  ;;  %v2725_v39 = vadd.f32 %v2724_v2, %v2723_v63  ;;  %v2730_v21 = vsel %vm2647_vm4, %v2700_v54, 0.0 }
 0x1de   :  { %v2726_v10 = vsel %vm2647_vm4, %v2698_v6, 0.0 }
 0x1df   :  { %v2676_v29 = vadd.f32 %v2675_v27, %v2674_v11  ;;  %v2727_v36 = vadd.f32 %v2726_v10, %v2725_v39 }
 0x1e1   :  { %v2678_v16 = vadd.f32 %v2677_v60, %v2676_v29  ;;  %v2729_v17 = vadd.f32 %v2728_v14, %v2727_v36  ;;  %v3032_v29 = vld [vmem:[%s5067_s3] ss:$0 sm:$0xff] }
 0x1e3   :  { %v2679_v41 = vrot.slane %v2678_v16, 4  ;;  %v2731_v9 = vadd.f32 %v2730_v21, %v2729_v17 }
 0x1e5   :  { %v2680_v44 = vadd.f32 %v2679_v41, %v2678_v16  ;;  %v2732_v26 = vrot.slane %v2731_v9, 4 }
 0x1e7   :  { %v2681_v20 = vrot.slane %v2680_v44, 2  ;;  %v2733_v7 = vadd.f32 %v2732_v26, %v2731_v9 }
 0x1e9   :  { %v2682_v57 = vadd.f32 %v2681_v20, %v2680_v44  ;;  %v2734_v30 = vrot.slane %v2733_v7, 2 }
 0x1eb   :  { %v2683_v22 = vrot.slane %v2682_v57, 1  ;;  %v2735_v40 = vadd.f32 %v2734_v30, %v2733_v7 }
 0x1ed   :  { %v2684_v3 = vadd.f32 %v2683_v22, %v2682_v57  ;;  %v2736_v25 = vrot.slane %v2735_v40, 1 }
 0x1ef   :  { %v2738_v50 = vmul.f32 0.0078125, %v2684_v3  ;;  %v2737_v18 = vadd.f32 %v2736_v25, %v2735_v40 }
 0x1f1   :  { %v2740_v47 = vmul.f32 %v2738_v50, %v2738_v50  ;;  %v2743_v38 = vsub.f32 %v4868_v59, %v2738_v50  ;;  %v2744_v5 = vsub.f32 %v4874_v55, %v2738_v50  ;;  %v2745_v12 = vsub.f32 %v4866_v4, %v2738_v50 }
 0x1f2   :  { %v2739_v46 = vmul.f32 0.0078125, %v2737_v18  ;;  %v2746_v53 = vsub.f32 %v4870_v28, %v2738_v50  ;;  %v2747_v61 = vsub.f32 %v4895_v52, %v2738_v50  ;;  %v2748_v33 = vsub.f32 %v4904_v51, %v2738_v50 }
 0x1f3   :  { %v2749_v34 = vsub.f32 %v4890_v56, %v2738_v50  ;;  %v2750_v37 = vsub.f32 %v4902_v49, %v2738_v50  ;;  %v2751_v0 = vsub.f32 %v4922_v42, %v2738_v50  ;;  %v2752_v31 = vsub.f32 %v4931_v35, %v2738_v50 }
 0x1f4   :  { %v2741_v59 = vsub.f32 %v2739_v46, %v2740_v47  ;;  %v2753_v55 = vsub.f32 %v4918_v62, %v2738_v50  ;;  %v2754_v4 = vsub.f32 %v4925_v24, %v2738_v50  ;;  %v2755_v45 = vsub.f32 %v4950_v1, %v2738_v50  ;;  %v3031_v62 = vld [vmem:[%s5066_s2] ss:$0 sm:$0xff] }
 0x1f5   :  { %v2756_v28 = vsub.f32 %v4959_v19, %v2738_v50  ;;  %v2757_v52 = vsub.f32 %v4946_v15, %v2738_v50  ;;  %v2758_v51 = vsub.f32 %v4953_v58, %v2738_v50 }
 0x1f6   :  { %v2742_v56 = vmax.f32 %v2741_v59, 0.0 }
 0x1f8   :  { %v2759_v13 = vadd.f32 1e-05, %v2742_v56 }
 0x1fa   :  { %3737 = vrsqrt.f32 %v2759_v13 }
 0x204   :  { %v3738_v49 = vpop.eup %3737 }
 0x205   :  { %v2761_v42 = vmul.f32 %v3738_v49, %v2743_v38  ;;  %v2762_v43 = vmul.f32 %v3738_v49, %v2744_v5  ;;  %v2763_v35 = vmul.f32 %v3738_v49, %v2745_v12  ;;  %v2764_v48 = vmul.f32 %v3738_v49, %v2746_v53 }
 0x206   :  { %v2765_v24 = vmul.f32 %v3738_v49, %v2747_v61  ;;  %v2766_v1 = vmul.f32 %v3738_v49, %v2748_v33  ;;  %v2767_v23 = vmul.f32 %v3738_v49, %v2749_v34  ;;  %v2768_v19 = vmul.f32 %v3738_v49, %v2750_v37 }
 0x207   :  { %v2769_v63 = vmul.f32 %v3738_v49, %v2751_v0  ;;  %v2770_v15 = vmul.f32 %v3738_v49, %v2752_v31  ;;  %v2771_v2 = vmul.f32 %v3738_v49, %v2753_v55  ;;  %v2772_v58 = vmul.f32 %v3738_v49, %v2754_v4 }
 0x208   :  { %v2773_v8 = vmul.f32 %v3738_v49, %v2755_v45  ;;  %v2774_v6 = vmul.f32 %v3738_v49, %v2756_v28  ;;  %v2775_v32 = vmul.f32 %v3738_v49, %v2757_v52  ;;  %v2776_v11 = vmul.f32 %v3738_v49, %v2758_v51 }
 0x209   :  { %v2783_v27 = vmul.f32 %v3031_v62, %v2761_v42  ;;  %v2784_v39 = vmul.f32 %v3031_v62, %v2762_v43  ;;  %v2785_v10 = vmul.f32 %v3031_v62, %v2763_v35  ;;  %v2786_v54 = vmul.f32 %v3031_v62, %v2764_v48 }
 0x20a   :  { %v2787_v60 = vmul.f32 %v3031_v62, %v2765_v24  ;;  %v2788_v36 = vmul.f32 %v3031_v62, %v2766_v1  ;;  %v2789_v14 = vmul.f32 %v3031_v62, %v2767_v23  ;;  %v2790_v16 = vmul.f32 %v3031_v62, %v2768_v19 }
 0x20b   :  { %v2791_v17 = vmul.f32 %v3031_v62, %v2769_v63  ;;  %v2792_v21 = vmul.f32 %v3031_v62, %v2770_v15  ;;  %v2793_v41 = vmul.f32 %v3031_v62, %v2771_v2  ;;  %v2794_v9 = vmul.f32 %v3031_v62, %v2772_v58 }
 0x20c   :  { %v2795_v44 = vmul.f32 %v3031_v62, %v2773_v8  ;;  %v2796_v26 = vmul.f32 %v3031_v62, %v2774_v6  ;;  %v2797_v20 = vmul.f32 %v3031_v62, %v2775_v32  ;;  %v2798_v7 = vmul.f32 %v3031_v62, %v2776_v11 }
 0x20d   :  { %v2805_v57 = vadd.f32 %v3032_v29, %v2783_v27  ;;  %v2806_v30 = vadd.f32 %v3032_v29, %v2784_v39  ;;  %v2807_v22 = vadd.f32 %v3032_v29, %v2785_v10  ;;  %v2808_v40 = vadd.f32 %v3032_v29, %v2786_v54 }
 0x20e   :  { %v2809_v3 = vadd.f32 %v3032_v29, %v2787_v60  ;;  %v2810_v25 = vadd.f32 %v3032_v29, %v2788_v36  ;;  %v2811_v50 = vadd.f32 %v3032_v29, %v2789_v14  ;;  %v2812_v18 = vadd.f32 %v3032_v29, %v2790_v16 }
 0x20f   :  { %v2813_v47 = vadd.f32 %v3032_v29, %v2791_v17  ;;  %v2814_v38 = vadd.f32 %v3032_v29, %v2792_v21  ;;  %v2815_v5 = vadd.f32 %v3032_v29, %v2793_v41  ;;  %v2816_v12 = vadd.f32 %v3032_v29, %v2794_v9 }
 0x210   :  { %v2817_v46 = vadd.f32 %v3032_v29, %v2795_v44  ;;  %v2818_v53 = vadd.f32 %v3032_v29, %v2796_v26  ;;  %v2819_v61 = vadd.f32 %v3032_v29, %v2797_v20  ;;  %v2820_v33 = vadd.f32 %v3032_v29, %v2798_v7 }
 0x211   :  { %v2821_v34 = vmax.f32 %v2805_v57, 0.0  ;;  %v2822_v37 = vmax.f32 %v2806_v30, 0.0  ;;  %v2823_v0 = vmax.f32 %v2807_v22, 0.0  ;;  %v2824_v31 = vmax.f32 %v2808_v40, 0.0 }
 0x212   :  { %v2825_v59 = vmax.f32 %v2809_v3, 0.0  ;;  %v2826_v55 = vmax.f32 %v2810_v25, 0.0  ;;  %v2827_v4 = vmax.f32 %v2811_v50, 0.0  ;;  %v2828_v45 = vmax.f32 %v2812_v18, 0.0 }
 0x213   :  { %v2829_v28 = vmax.f32 %v2813_v47, 0.0  ;;  %v2830_v52 = vmax.f32 %v2814_v38, 0.0  ;;  %v2831_v51 = vmax.f32 %v2815_v5, 0.0  ;;  %v2832_v56 = vmax.f32 %v2816_v12, 0.0  ;;  %2837 = vst.msk [vmem:[%s5068_s4] sm:$0xff] %vm2647_vm4, %v2821_v34  ;;  %2838 = vst.msk [vmem:[%s5068_s4 + $0x8] sm:$0xff] %vm2647_vm4, %v2822_v37 }
 0x214   :  { %2839 = vst.msk [vmem:[%s5068_s4 + $0x10] sm:$0xff] %vm2647_vm4, %v2823_v0  ;;  %2840 = vst.msk [vmem:[%s5068_s4 + $0x18] sm:$0xff] %vm2647_vm4, %v2824_v31  ;;  %v2833_v13 = vmax.f32 %v2817_v46, 0.0  ;;  %v2834_v49 = vmax.f32 %v2818_v53, 0.0  ;;  %v2835_v42 = vmax.f32 %v2819_v61, 0.0  ;;  %v2836_v43 = vmax.f32 %v2820_v33, 0.0 }
 0x215   :  { %2841 = vst.msk [vmem:[%s5068_s4 + $0x20] sm:$0xff] %vm2647_vm4, %v2825_v59  ;;  %2842 = vst.msk [vmem:[%s5068_s4 + $0x28] sm:$0xff] %vm2647_vm4, %v2826_v55 }
 0x216   :  { %2843 = vst.msk [vmem:[%s5068_s4 + $0x30] sm:$0xff] %vm2647_vm4, %v2827_v4  ;;  %2844 = vst.msk [vmem:[%s5068_s4 + $0x38] sm:$0xff] %vm2647_vm4, %v2828_v45 }
 0x217   :  { %2845 = vst.msk [vmem:[%s5068_s4 + $0x40] sm:$0xff] %vm2647_vm4, %v2829_v28  ;;  %2846 = vst.msk [vmem:[%s5068_s4 + $0x48] sm:$0xff] %vm2647_vm4, %v2830_v52 }
 0x218   :  { %2847 = vst.msk [vmem:[%s5068_s4 + $0x50] sm:$0xff] %vm2647_vm4, %v2831_v51  ;;  %2848 = vst.msk [vmem:[%s5068_s4 + $0x58] sm:$0xff] %vm2647_vm4, %v2832_v56 }
 0x219   :  { %2849 = vst.msk [vmem:[%s5068_s4 + $0x60] sm:$0xff] %vm2647_vm4, %v2833_v13  ;;  %2850 = vst.msk [vmem:[%s5068_s4 + $0x68] sm:$0xff] %vm2647_vm4, %v2834_v49 }
 0x21a   :  { %2851 = vst.msk [vmem:[%s5068_s4 + $0x70] sm:$0xff] %vm2647_vm4, %v2835_v42  ;;  %2852 = vst.msk [vmem:[%s5068_s4 + $0x78] sm:$0xff] %vm2647_vm4, %v2836_v43 }

// kernel: resnet_forward.5
= control target key start
LH: loop header
LB: loop body
LE: loop exit
PB: predicated region body
PF: predicated region fallthrough
CT: control target
= control target key end

     0   :  { %vm208_vm0 = vcmask 1043456   ;;  %vm108_vm1 = vcmask 1046528   ;;  %vm183_vm2 = vcmask 64512   ;;  %vm433_vm3 = vcmask 1045504   ;;  %s6242_s1 = inlined_call_operand.vmem [shape: bf16[9,8,8], index: 1, kind: input, shape index: {}]   ;;  %s6243_s0 = inlined_call_operand.vmem [shape: f32[2,10,10,8], index: 0, kind: input, shape index: {}]   ;;  %s6244_s4 = inlined_call_operand.vmem [shape: bf16[9,8,8], index: 4, kind: input, shape index: {}]   ;;  %s6245_s2 = inlined_call_operand.vmem [shape: f32[1,8], index: 2, kind: input, shape index: {}]   ;;  %s6246_s3 = inlined_call_operand.vmem [shape: f32[1,8], index: 3, kind: input, shape index: {}]   ;;  %s6247_s5 = inlined_call_operand.vmem [shape: f32[1,8], index: 5, kind: input, shape index: {}]   ;;  %s6248_s6 = inlined_call_operand.vmem [shape: f32[1,8], index: 6, kind: input, shape index: {}]   ;;  %s6249_s7 = inlined_call_operand.vmem [shape: f32[128,8], index: 7, kind: output, shape index: {}]  }
   0x1   :  { %v3552_v0 = vld [vmem:[%s6242_s1 + $0x4] sm:$0xf]  ;;  %v4533_v2 = vld [vmem:[%s6243_s0 + $0x8] sm:$0x3]  ;;  %v4540_v4 = vld [vmem:[%s6243_s0 + $0x10] sm:$0xff]  ;;  %vm1891_vm4 = vcmask 1040384  }
   0x2   :  { %v4528_v1 = vld [vmem:[%s6243_s0] sm:$0xff]  ;;  %4458 = vmatprep.subr.msk.bf16.mxu0 %vm208_vm0, %v3552_v0  ;;  %v210_v3 = vsel %vm208_vm0, %v3552_v0, 0  ;;  %v4545_v5 = vld [vmem:[%s6243_s0 + $0x18] sm:$0x3]  ;;  %v4556_v8 = vld [vmem:[%s6243_s0 + $0x28] sm:$0x3] }
   0x3   :  { %v4550_v6 = vld [vmem:[%s6243_s0 + $0x20] sm:$0xff]  ;;  %v109_v7 = vrot.slane %v4528_v1, 1  ;;  %3879 = vmatpush3.bf16.msra.mxu0 %v210_v3  ;;  %v110_v9 = vrot.slane %v4533_v2, 1  ;;  %v112_v10 = vrot.slane %v4540_v4, 1  ;;  %v113_v11 = vrot.slane %v4545_v5, 1  ;;  %v4574_v17 = vld [vmem:[%s6243_s0 + $0x30] sm:$0xff] }
   0x4   :  { %v115_v12 = vrot.slane %v4550_v6, 1  ;;  %v116_v13 = vrot.slane %v4556_v8, 1  ;;  %v75_v14 = vld [vmem:[%s6242_s1] sm:$0xf]  ;;  %v4579_v18 = vld [vmem:[%s6243_s0 + $0x38] sm:$0x3] }
   0x5   :  { %v111_v15 = vsel %vm108_vm1, %v109_v7, %v110_v9  ;;  %v4568_v16 = vsel %vm108_vm1, %v112_v10, %v113_v11  ;;  %4459 = vmatprep.subr.msk.bf16.mxu0 %vm208_vm0, %v75_v14  ;;  %v4584_v19 = vld [vmem:[%s6243_s0 + $0x40] sm:$0xff]  ;;  %v118_v22 = vrot.slane %v4574_v17, 1  ;;  %v119_v23 = vrot.slane %v4579_v18, 1  ;;  %v4595_v24 = vld [vmem:[%s6243_s0 + $0x48] sm:$0x3]  ;;  %v4600_v25 = vld [vmem:[%s6243_s0 + $0x50] sm:$0xff] }
   0x6   :  { %6286 = vst [vmem:[#allocation3_spill] sm:$0xff] %v4568_v16  ;;  %v4587_v20 = vsel %vm108_vm1, %v115_v12, %v116_v13  ;;  %v173_v21 = vpack.c.bf16 %v4568_v16, %v111_v15  ;;  %v4605_v26 = vld [vmem:[%s6243_s0 + $0x60] sm:$0xff]  ;;  %v334_v27 = vsel %vm208_vm0, %v75_v14, 0  ;;  %v4611_v28 = vld [vmem:[%s6243_s0 + $0x58] sm:$0x3]  ;;  %v4616_v29 = vld [vmem:[%s6243_s0 + $0x70] sm:$0xff] }
   0x7   :  { %6287 = vst [vmem:[#allocation4_spill] sm:$0xff] %v4587_v20  ;;  %v4620_v30 = vsel %vm108_vm1, %v118_v22, %v119_v23  ;;  %v121_v31 = vrot.slane %v4584_v19, 1  ;;  %v122_v32 = vrot.slane %v4595_v24, 1  ;;  %v124_v33 = vrot.slane %v4600_v25, 1  ;;  %v4628_v34 = vld [vmem:[%s6243_s0 + $0x68] sm:$0x3] }
   0x8   :  { %3880 = vmatprep.mubr.msk.bf16.mxu0 %vm183_vm2, %v173_v21  ;;  %6288 = vst [vmem:[#allocation5_spill] sm:$0xff] %v4620_v30  ;;  %v4633_v35 = vld [vmem:[%s6243_s0 + $0xa0] sm:$0xff]  ;;  %v4637_v36 = vpack.c.bf16 %v4620_v30, %v4587_v20  ;;  %v125_v37 = vrot.slane %v4611_v28, 1  ;;  %v4643_v38 = vld [vmem:[%s6243_s0 + $0x78] sm:$0x3]  ;;  %v127_v39 = vrot.slane %v4605_v26, 1 }
   0x9   :  { %v128_v40 = vrot.slane %v4628_v34, 1  ;;  %v4650_v41 = vld [vmem:[%s6243_s0 + $0xb0] sm:$0xff]  ;;  %v4653_v42 = vsel %vm108_vm1, %v121_v31, %v122_v32  ;;  %v130_v43 = vrot.slane %v4616_v29, 1  ;;  %v131_v44 = vrot.slane %v4643_v38, 1  ;;  %v4660_v45 = vld [vmem:[%s6243_s0 + $0xa8] sm:$0x3] }
   0xa   :  { %6289 = vst [vmem:[#allocation6_spill] sm:$0xff] %v4637_v36  ;;  %6290 = vst [vmem:[#allocation7_spill] sm:$0xff] %v4653_v42  ;;  %v4665_v46 = vld [vmem:[%s6243_s0 + $0xb8] sm:$0x3]  ;;  %3881 = vmatmul.mubr.msk.bf16.vlgmr.msra.gmra.mrb[0].mxu0 %vm183_vm2, %v4637_v36  ;;  %v4670_v47 = vsel %vm108_vm1, %v124_v33, %v125_v37  ;;  %v133_v49 = vrot.slane %v4633_v35, 1  ;;  %v4679_v50 = vld [vmem:[%s6243_s0 + $0xc0] sm:$0xff] }
   0xb   :  { %6291 = vst [vmem:[#allocation8_spill] sm:$0xff] %v4670_v47  ;;  %v4673_v48 = vsel %vm108_vm1, %v127_v39, %v128_v40  ;;  %v4684_v51 = vld [vmem:[%s6243_s0 + $0xc8] sm:$0x3]  ;;  %v4689_v52 = vld [vmem:[%s6243_s0 + $0xd0] sm:$0xff]  ;;  %3897 = vmatpush3.bf16.msra.mxu0 %v334_v27  ;;  %v4693_v53 = vpack.c.bf16 %v4670_v47, %v4653_v42  ;;  %v4696_v54 = vsel %vm108_vm1, %v130_v43, %v131_v44  ;;  %v134_v55 = vrot.slane %v4660_v45, 1  ;;  %v4711_v61 = vld [vmem:[%s6243_s0 + $0xe0] sm:$0xff] }
   0xc   :  { %6292 = vst [vmem:[#allocation9_spill] sm:$0xff] %v4673_v48  ;;  %6294 = vst [vmem:[#allocation11_spill] sm:$0xff] %v4696_v54  ;;  %v136_v56 = vrot.slane %v4650_v41, 1  ;;  %v4703_v57 = vld [vmem:[%s6243_s0 + $0xd8] sm:$0x3]  ;;  %v137_v58 = vrot.slane %v4665_v46, 1  ;;  %v4737_v12 = vpack.c.bf16 %v4696_v54, %v4673_v48 }
   0xd   :  { %6293 = vst [vmem:[#allocation10_spill] sm:$0xff] %v4693_v53  ;;  %v139_v59 = vrot.slane %v4679_v50, 1  ;;  %v140_v60 = vrot.slane %v4684_v51, 1  ;;  %v4716_v62 = vld [vmem:[%s6243_s0 + $0xf0] sm:$0xff]  ;;  %3884 = vmatprep.mubr.msk.bf16.mxu0 %vm183_vm2, %v4693_v53  ;;  %v135_v63 = vsel %vm108_vm1, %v133_v49, %v134_v55  ;;  %v142_v0 = vrot.slane %v4689_v52, 1  ;;  %v4745_v14 = vld [vmem:[%s6243_s0 + $0x100] sm:$0xff] }
   0xe   :  { %v143_v3 = vrot.slane %v4703_v57, 1  ;;  %v4726_v7 = vld [vmem:[%s6243_s0 + $0xe8] sm:$0x3]  ;;  %v4731_v9 = vld [vmem:[%s6243_s0 + $0xf8] sm:$0x3]  ;;  %v440_v10 = vrot.slane %v4550_v6, 2  ;;  %v4740_v13 = vsel %vm108_vm1, %v136_v56, %v137_v58 }
   0xf   :  { %v441_v11 = vrot.slane %v4556_v8, 2  ;;  %6295 = vst [vmem:[#allocation12_spill] sm:$0xff] %v4737_v12  ;;  %6296 = vst [vmem:[#allocation13_spill] sm:$0xff] %v4740_v13  ;;  %v4750_v15 = vld [vmem:[%s6243_s0 + $0x110] sm:$0xff]  ;;  %v177_v21 = vpack.c.bf16 %v4740_v13, %v135_v63  ;;  %v4756_v8 = vld [vmem:[%s6243_s0 + $0x108] sm:$0x3]  ;;  %v4777_v40 = vsel %vm108_vm1, %v139_v59, %v140_v60 }
  0x10   :  { %v4761_v22 = vld [vmem:[%s6243_s0 + $0x118] sm:$0x3]  ;;  %v4766_v23 = vld [vmem:[%s6242_s1 + $0x8] sm:$0xf]  ;;  %v145_v27 = vrot.slane %v4711_v61, 1  ;;  %v146_v31 = vrot.slane %v4726_v7, 1  ;;  %v4780_v43 = vsel %vm108_vm1, %v142_v0, %v143_v3 }
  0x11   :  { %v148_v32 = vrot.slane %v4716_v62, 1  ;;  %v149_v33 = vrot.slane %v4731_v9, 1  ;;  %4460 = vmatprep.subr.msk.bf16.mxu0 %vm208_vm0, %v4766_v23  ;;  %v443_v37 = vrot.slane %v4574_v17, 2  ;;  %v444_v39 = vrot.slane %v4579_v18, 2  ;;  %6297 = vst [vmem:[#allocation14_spill] sm:$0xff] %v4777_v40  ;;  %6298 = vst [vmem:[#allocation15_spill] sm:$0xff] %v4780_v43 }
  0x12   :  { %3885 = vmatmul.mubr.msk.bf16.gmra.mrb[4].mxu0 %vm183_vm2, %v4737_v12  ;;  %v151_v44 = vrot.slane %v4745_v14, 1  ;;  %v152_v49 = vrot.slane %v4756_v8, 1  ;;  %v154_v55 = vrot.slane %v4750_v15, 1  ;;  %v155_v56 = vrot.slane %v4761_v22, 1 }
  0x13   :  { %3888 = vmatprep.mubr.msk.bf16.mxu0 %vm183_vm2, %v177_v21  ;;  %v4791_v58 = vsel %vm108_vm1, %v145_v27, %v146_v31  ;;  %v4794_v59 = vsel %vm108_vm1, %v148_v32, %v149_v33  ;;  %v4798_v60 = vpack.c.bf16 %v4780_v43, %v4777_v40  ;;  %v4801_v63 = vsel %vm433_vm3, %v440_v10, %v441_v11 }
  0x14   :  { %6299 = vst [vmem:[#allocation16_spill] sm:$0xff] %v4791_v58  ;;  %6300 = vst [vmem:[#allocation17_spill] sm:$0xff] %v4794_v59  ;;  %v4804_v0 = vsel %vm433_vm3, %v443_v37, %v444_v39  ;;  %v446_v3 = vrot.slane %v4584_v19, 2  ;;  %v4808_v21 = vsel %vm108_vm1, %v151_v44, %v152_v49  ;;  %v4811_v27 = vsel %vm108_vm1, %v154_v55, %v155_v56 }
  0x15   :  { %6301 = vst [vmem:[#allocation18_spill] sm:$0xff] %v4798_v60  ;;  %6302 = vst [vmem:[#allocation19_spill] sm:$0xff] %v4808_v21  ;;  %v4815_v31 = vpack.c.bf16 %v4804_v0, %v4801_v63  ;;  %v447_v32 = vrot.slane %v4595_v24, 2  ;;  %v4820_v10 = vpack.c.bf16 %v4794_v59, %v4791_v58  ;;  %v67_v11 = vpack.c.bf16 %v4540_v4, %v4528_v1 }
  0x16   :  { %6303 = vst [vmem:[#allocation20_spill] sm:$0xff] %v4811_v27  ;;  %v452_v33 = vrot.slane %v4605_v26, 2  ;;  %v453_v37 = vrot.slane %v4628_v34, 2  ;;  %v455_v44 = vrot.slane %v4616_v29, 2  ;;  %v456_v49 = vrot.slane %v4643_v38, 2 }
  0x17   :  { %6304 = vst [vmem:[#allocation21_spill] sm:$0xff] %v4820_v10  ;;  %v4827_v39 = vsel %vm433_vm3, %v446_v3, %v447_v32  ;;  %v458_v24 = vrot.slane %v4633_v35, 2  ;;  %v4834_v55 = vpack.c.bf16 %v4811_v27, %v4808_v21  ;;  %v459_v34 = vrot.slane %v4660_v45, 2 }
  0x18   :  { %v4839_v18 = vsel %vm433_vm3, %v452_v33, %v453_v37  ;;  %v437_v3 = vrot.slane %v4540_v4, 2  ;;  %v4846_v38 = vsel %vm433_vm3, %v455_v44, %v456_v49  ;;  %v461_v32 = vrot.slane %v4650_v41, 2 }
  0x19   :  { %6305 = vst [vmem:[#allocation22_spill] sm:$0xff] %v4834_v55  ;;  %v462_v12 = vrot.slane %v4665_v46, 2  ;;  %v4854_v33 = vpack.c.bf16 %v4846_v38, %v4839_v18  ;;  %v4857_v45 = vsel %vm433_vm3, %v458_v24, %v459_v34  ;;  %v464_v37 = vrot.slane %v4679_v50, 2 }
  0x1a   :  { %3889 = vmatmul.mubr.msk.bf16.gmra.mrb[8].mxu0 %vm183_vm2, %v4798_v60  ;;  %v465_v56 = vrot.slane %v4684_v51, 2  ;;  %v467_v49 = vrot.slane %v4689_v52, 2  ;;  %v468_v46 = vrot.slane %v4703_v57, 2  ;;  %v471_v24 = vrot.slane %v4726_v7, 2 }
  0x1b   :  { %3892 = vmatprep.mubr.msk.bf16.mxu0 %vm183_vm2, %v4820_v10  ;;  %v4862_v44 = vsel %vm433_vm3, %v461_v32, %v462_v12  ;;  %v470_v10 = vrot.slane %v4711_v61, 2  ;;  %v473_v34 = vrot.slane %v4716_v62, 2  ;;  %v474_v12 = vrot.slane %v4731_v9, 2 }
  0x1c   :  { %v4870_v53 = vsel %vm433_vm3, %v464_v37, %v465_v56  ;;  %v4875_v51 = vsel %vm433_vm3, %v467_v49, %v468_v46  ;;  %v476_v32 = vrot.slane %v4745_v14, 2  ;;  %v477_v57 = vrot.slane %v4756_v8, 2 }
  0x1d   :  { %v4882_v36 = vpack.c.bf16 %v4875_v51, %v4870_v53  ;;  %v4885_v56 = vsel %vm433_vm3, %v470_v10, %v471_v24  ;;  %v479_v7 = vrot.slane %v4750_v15, 2  ;;  %v480_v37 = vrot.slane %v4761_v22, 2 }
  0x1e   :  { %v4890_v49 = vsel %vm433_vm3, %v473_v34, %v474_v12  ;;  %v4893_v9 = vsel %vm433_vm3, %v476_v32, %v477_v57  ;;  %v648_v8 = vpack.c.bf16 %v4550_v6, %v4540_v4  ;;  %v649_v46 = vpack.c.bf16 %v4584_v19, %v4574_v17 }
  0x1f   :  { %v4901_v10 = vpack.c.bf16 %v4890_v49, %v4885_v56  ;;  %v4904_v24 = vsel %vm433_vm3, %v479_v7, %v480_v37  ;;  %v650_v22 = vpack.c.bf16 %v4605_v26, %v4600_v25  ;;  %v652_v4 = vpack.c.bf16 %v4679_v50, %v4650_v41 }
  0x20   :  { %6306 = vst [vmem:[#allocation23_spill] sm:$0xff] %v4904_v24  ;;  %v4912_v34 = vpack.c.bf16 %v4904_v24, %v4893_v9  ;;  %v653_v12 = vpack.c.bf16 %v4711_v61, %v4689_v52  ;;  %v654_v32 = vpack.c.bf16 %v4745_v14, %v4716_v62  ;;  %v6307_v57 = vrot.slane %v4545_v5, 2 }
  0x21   :  { %v4930_v60 = vpack.c.bf16 %v4574_v17, %v4550_v6  ;;  %v450_v24 = vrot.slane %v4611_v28, 2  ;;  %v533_v5 = vsel %vm208_vm0, %v4766_v23, 0  ;;  %v972_v28 = vpack.c.bf16 %v4870_v53, %v4862_v44 }
  0x22   :  { %3893 = vmatmul.mubr.msk.bf16.gmra.mrb[12].mxu0 %vm183_vm2, %v4834_v55  ;;  %v4924_v7 = vsel %vm433_vm3, %v437_v3, %v6307_v57  ;;  %v449_v55 = vrot.slane %v4600_v25, 2  ;;  %v3578_v3 = vld [vmem:[%s6242_s1 + $0xc] sm:$0xf]  ;;  %v973_v23 = vpack.c.bf16 %v4885_v56, %v4875_v51  ;;  %v45_v51 = vld [vmem:[%s6243_s0 + $0x90] sm:$0xff] }
  0x23   :  { %3898 = vmatprep.mubr.msk.bf16.mxu0 %vm183_vm2, %v67_v11  ;;  %v968_v37 = vpack.c.bf16 %v4801_v63, %v4924_v7  ;;  %v4936_v11 = vpack.c.bf16 %v4600_v25, %v4584_v19  ;;  %v4955_v19 = vpack.c.bf16 %v4616_v29, %v4605_v26  ;;  %v71_v25 = vpack.c.bf16 %v4650_v41, %v4633_v35  ;;  %v65_v56 = vld [vmem:[%s6243_s0 + $0x130] sm:$0xff] }
  0x24   :  { %v4946_v6 = vsel %vm433_vm3, %v449_v55, %v450_v24  ;;  %v4968_v55 = vpack.c.bf16 %v4689_v52, %v4679_v50  ;;  %v4972_v26 = vpack.c.bf16 %v4716_v62, %v4711_v61  ;;  %v434_v35 = vrot.slane %v4528_v1, 2  ;;  %v3587_v62 = vld [vmem:[%s6242_s1 + $0x10] sm:$0xf] }
  0x25   :  { %v970_v17 = vpack.c.bf16 %v4839_v18, %v4946_v6  ;;  %v435_v41 = vrot.slane %v4533_v2, 2  ;;  %v974_v24 = vpack.c.bf16 %v4893_v9, %v4890_v49  ;;  %v4985_v52 = vpack.c.bf16 %v4750_v15, %v4745_v14  ;;  %v6313_v9 = vld [vmem:[#allocation6_spill] sm:$0xff] }
  0x26   :  { %v4993_v1 = vpack.c.bf16 %v4946_v6, %v4827_v39  ;;  %v683_v2 = vsel %vm208_vm0, %v3578_v3, 0  ;;  %v6308_v14 = vpack.c.bf16 %v4862_v44, %v4857_v45  ;;  %v845_v57 = vsel %vm208_vm0, %v3587_v62, 0  ;;  %v5026_v45 = vld [vmem:[%s6243_s0 + $0x80] sm:$0xff] }
  0x27   :  { %v436_v50 = vsel %vm433_vm3, %v434_v35, %v435_v41  ;;  %v3605_v35 = vld [vmem:[%s6242_s1 + $0x18] sm:$0xf]  ;;  %v3623_v44 = vld [vmem:[%s6242_s1 + $0x20] sm:$0xf]  ;;  %v1248_v6 = vrot.slane %v45_v51, 1 }
  0x28   :  { %v498_v61 = vpack.c.bf16 %v4924_v7, %v436_v50 }
  0x2a   :  { %3899 = vmatmul.mubr.msk.bf16.vlgmr.msra.gmra.mrb[0].mxu0 %vm183_vm2, %v4930_v60 }
  0x2b   :  { %3915 = vmatpush3.bf16.msra.mxu0 %v533_v5  ;;  %3902 = vmatprep.mubr.msk.bf16.mxu0 %vm183_vm2, %v4936_v11  ;;  %v3596_v5 = vld [vmem:[%s6242_s1 + $0x14] sm:$0xf] }
  0x2c   :  { %4461 = vmatprep.subr.msk.bf16.mxu0 %vm208_vm0, %v3578_v3  ;;  %v810_v3 = vpack.c.bf16 %v4587_v20, %v4568_v16 }
  0x32   :  { %3903 = vmatmul.mubr.msk.bf16.gmra.mrb[4].mxu0 %vm183_vm2, %v4955_v19 }
  0x33   :  { %3906 = vmatprep.mubr.msk.bf16.mxu0 %vm183_vm2, %v71_v25  ;;  %v1003_v25 = vsel %vm208_vm0, %v3596_v5, 0 }
  0x3a   :  { %3907 = vmatmul.mubr.msk.bf16.gmra.mrb[8].mxu0 %vm183_vm2, %v4968_v55 }
  0x3b   :  { %3910 = vmatprep.mubr.msk.bf16.mxu0 %vm183_vm2, %v4972_v26 }
  0x42   :  { %3911 = vmatmul.mubr.msk.bf16.gmra.mrb[12].mxu0 %vm183_vm2, %v4985_v52 }
  0x43   :  { %3916 = vmatprep.mubr.msk.bf16.mxu0 %vm183_vm2, %v498_v61  ;;  %v814_v61 = vpack.c.bf16 %v4777_v40, %v4740_v13 }
  0x4a   :  { %3917 = vmatmul.mubr.msk.bf16.vlgmr.msra.gmra.mrb[0].mxu0 %vm183_vm2, %v4815_v31 }
  0x4b   :  { %3933 = vmatpush3.bf16.msra.mxu0 %v683_v2  ;;  %3920 = vmatprep.mubr.msk.bf16.mxu0 %vm183_vm2, %v4993_v1  ;;  %v64_v2 = vld [vmem:[%s6243_s0 + $0x128] sm:$0x3] }
  0x4c   :  { %4462 = vmatprep.subr.msk.bf16.mxu0 %vm208_vm0, %v3587_v62  ;;  %v815_v62 = vpack.c.bf16 %v4791_v58, %v4780_v43 }
  0x52   :  { %3921 = vmatmul.mubr.msk.bf16.gmra.mrb[4].mxu0 %vm183_vm2, %v4854_v33 }
  0x53   :  { %3924 = vmatprep.mubr.msk.bf16.mxu0 %vm183_vm2, %v6308_v14  ;;  %v816_v14 = vpack.c.bf16 %v4808_v21, %v4794_v59 }
  0x5a   :  { %3925 = vmatmul.mubr.msk.bf16.gmra.mrb[8].mxu0 %vm183_vm2, %v4882_v36 }
  0x5b   :  { %3928 = vmatprep.mubr.msk.bf16.mxu0 %vm183_vm2, %v4901_v10 }
  0x62   :  { %3929 = vmatmul.mubr.msk.bf16.gmra.mrb[12].mxu0 %vm183_vm2, %v4912_v34 }
  0x63   :  { %3934 = vmatprep.mubr.msk.bf16.mxu0 %vm183_vm2, %v648_v8  ;;  %v651_v8 = vpack.c.bf16 %v5026_v45, %v4616_v29  ;;  %v44_v29 = vld [vmem:[%s6243_s0 + $0x88] sm:$0x3] }
  0x6a   :  { %3935 = vmatmul.mubr.msk.bf16.vlgmr.msra.gmra.mrb[0].mxu0 %vm183_vm2, %v649_v46  ;;  %v5038_v46 = vld [vmem:[%s6243_s0 + $0x120] sm:$0xff] }
  0x6b   :  { %3951 = vmatpush3.bf16.msra.mxu0 %v845_v57  ;;  %3938 = vmatprep.mubr.msk.bf16.mxu0 %vm183_vm2, %v650_v22  ;;  %v655_v22 = vpack.c.bf16 %v5038_v46, %v4750_v15  ;;  %v803_v15 = vrot.slane %v44_v29, 1  ;;  %v805_v57 = vrot.slane %v5038_v46, 1  ;;  %v1119_v49 = vpack.c.bf16 %v65_v56, %v5038_v46 }
  0x6c   :  { %4463 = vmatprep.subr.msk.bf16.mxu0 %vm208_vm0, %v3596_v5  ;;  %v806_v5 = vrot.slane %v64_v2, 1 }
  0x72   :  { %3939 = vmatmul.mubr.msk.bf16.gmra.mrb[4].mxu0 %vm183_vm2, %v651_v8  ;;  %v5081_v8 = vsel %vm108_vm1, %v805_v57, %v806_v5  ;;  %v1385_v57 = vrot.slane %v65_v56, 2 }
  0x73   :  { %3942 = vmatprep.mubr.msk.bf16.mxu0 %vm183_vm2, %v652_v4  ;;  %v811_v4 = vpack.c.bf16 %v4653_v42, %v4620_v30  ;;  %6310 = vst [vmem:[#allocation25_spill] sm:$0xff] %v5081_v8 }
  0x7a   :  { %3943 = vmatmul.mubr.msk.bf16.gmra.mrb[8].mxu0 %vm183_vm2, %v653_v12  ;;  %v812_v12 = vpack.c.bf16 %v4673_v48, %v4670_v47 }
  0x7b   :  { %3946 = vmatprep.mubr.msk.bf16.mxu0 %vm183_vm2, %v654_v32  ;;  %v802_v32 = vrot.slane %v5026_v45, 1 }
  0x7d   :  { %v5061_v41 = vsel %vm108_vm1, %v802_v32, %v803_v15  ;;  %v3614_v32 = vld [vmem:[%s6242_s1 + $0x1c] sm:$0xf]  ;;  %v6311_v15 = vpack.c.bf16 %v4827_v39, %v4804_v0  ;;  %v963_v0 = vrot.slane %v5038_v46, 2  ;;  %v964_v39 = vrot.slane %v64_v2, 2 }
  0x7e   :  { %6309 = vst [vmem:[#allocation24_spill] sm:$0xff] %v5061_v41  ;;  %v813_v50 = vpack.c.bf16 %v5061_v41, %v4696_v54  ;;  %v1267_v53 = vsel %vm208_vm0, %v3614_v32, 0 }
  0x7f   :  { %v965_v18 = vsel %vm433_vm3, %v963_v0, %v964_v39 }
  0x82   :  { %3947 = vmatmul.mubr.msk.bf16.gmra.mrb[12].mxu0 %vm183_vm2, %v655_v22  ;;  %v817_v22 = vpack.c.bf16 %v5081_v8, %v4811_v27 }
  0x83   :  { %3952 = vmatprep.mubr.msk.bf16.mxu0 %vm183_vm2, %v810_v3  ;;  %v960_v3 = vrot.slane %v5026_v45, 2 }
  0x8a   :  { %3953 = vmatmul.mubr.msk.bf16.vlgmr.msra.gmra.mrb[0].mxu0 %vm183_vm2, %v811_v4  ;;  %v961_v4 = vrot.slane %v44_v29, 2  ;;  %v6317_v29 = vld [vmem:[#allocation21_spill] sm:$0xff] }
  0x8b   :  { %3969 = vmatpush3.bf16.msra.mxu0 %v1003_v25  ;;  %3956 = vmatprep.mubr.msk.bf16.mxu0 %vm183_vm2, %v812_v12  ;;  %v1129_v12 = vsel %vm208_vm0, %v3605_v35, 0  ;;  %v6318_v25 = vld [vmem:[#allocation22_spill] sm:$0xff] }
  0x8c   :  { %4464 = vmatprep.subr.msk.bf16.mxu0 %vm208_vm0, %v3605_v35  ;;  %v962_v63 = vsel %vm433_vm3, %v960_v3, %v961_v4 }
  0x8d   :  { %v971_v7 = vpack.c.bf16 %v962_v63, %v4846_v38  ;;  %v6312_v38 = vld [vmem:[#allocation23_spill] sm:$0xff] }
  0x92   :  { %3957 = vmatmul.mubr.msk.bf16.gmra.mrb[4].mxu0 %vm183_vm2, %v813_v50 }
  0x93   :  { %3960 = vmatprep.mubr.msk.bf16.mxu0 %vm183_vm2, %v814_v61  ;;  %v1382_v61 = vrot.slane %v45_v51, 2 }
  0x9a   :  { %3961 = vmatmul.mubr.msk.bf16.gmra.mrb[8].mxu0 %vm183_vm2, %v815_v62 }
  0x9b   :  { %3964 = vmatprep.mubr.msk.bf16.mxu0 %vm183_vm2, %v816_v14 }
  0xa2   :  { %3965 = vmatmul.mubr.msk.bf16.gmra.mrb[12].mxu0 %vm183_vm2, %v817_v22 }
  0xa3   :  { %3970 = vmatprep.mubr.msk.bf16.mxu0 %vm183_vm2, %v968_v37  ;;  %v975_v37 = vpack.c.bf16 %v965_v18, %v6312_v38 }
  0xaa   :  { %3971 = vmatmul.mubr.msk.bf16.vlgmr.msra.gmra.mrb[0].mxu0 %vm183_vm2, %v6311_v15 }
  0xab   :  { %3987 = vmatpush3.bf16.msra.mxu0 %v1129_v12  ;;  %3974 = vmatprep.mubr.msk.bf16.mxu0 %vm183_vm2, %v970_v17 }
  0xac   :  { %4465 = vmatprep.subr.msk.bf16.mxu0 %vm208_vm0, %v3614_v32 }
  0xb2   :  { %3975 = vmatmul.mubr.msk.bf16.gmra.mrb[4].mxu0 %vm183_vm2, %v971_v7 }
  0xb3   :  { %3978 = vmatprep.mubr.msk.bf16.mxu0 %vm183_vm2, %v972_v28  ;;  %v6314_v28 = vld [vmem:[#allocation10_spill] sm:$0xff] }
  0xba   :  { %3979 = vmatmul.mubr.msk.bf16.gmra.mrb[8].mxu0 %vm183_vm2, %v973_v23  ;;  %v6315_v23 = vld [vmem:[#allocation12_spill] sm:$0xff] }
  0xbb   :  { %3982 = vmatprep.mubr.msk.bf16.mxu0 %vm183_vm2, %v974_v24  ;;  %v6316_v24 = vld [vmem:[#allocation18_spill] sm:$0xff] }
  0xc2   :  { %3983 = vmatmul.mubr.msk.bf16.gmra.mrb[12].mxu0 %vm183_vm2, %v975_v37 }
  0xc3   :  { %3988 = vmatprep.mubr.msk.bf16.mxu0 %vm183_vm2, %v4930_v60  ;;  %v1118_v60 = vpack.c.bf16 %v45_v51, %v5026_v45  ;;  %v1251_v45 = vrot.slane %v65_v56, 1 }
  0xca   :  { %3989 = vmatmul.mubr.msk.bf16.vlgmr.msra.gmra.mrb[0].mxu0 %vm183_vm2, %v4936_v11  ;;  %v46_v11 = vld [vmem:[%s6243_s0 + $0x98] sm:$0x3] }
  0xcb   :  { %4005 = vmatpush3.bf16.msra.mxu0 %v1267_v53  ;;  %3992 = vmatprep.mubr.msk.bf16.mxu0 %vm183_vm2, %v4955_v19  ;;  %v1249_v17 = vrot.slane %v46_v11, 1  ;;  %v1401_v19 = vsel %vm208_vm0, %v3623_v44, 0  ;;  %v1383_v2 = vrot.slane %v46_v11, 2 }
  0xcc   :  { %4466 = vmatprep.subr.msk.bf16.mxu0 %vm208_vm0, %v3623_v44 }
  0xcd   :  { %v1384_v62 = vsel %vm433_vm3, %v1382_v61, %v1383_v2 }
  0xce   :  { %v1390_v14 = vpack.c.bf16 %v1384_v62, %v962_v63 }
  0xd2   :  { %3993 = vmatmul.mubr.msk.bf16.gmra.mrb[4].mxu0 %vm183_vm2, %v1118_v60 }
  0xd3   :  { %3996 = vmatprep.mubr.msk.bf16.mxu0 %vm183_vm2, %v4968_v55  ;;  %v1250_v55 = vsel %vm108_vm1, %v1248_v6, %v1249_v17 }
  0xda   :  { %3997 = vmatmul.mubr.msk.bf16.gmra.mrb[8].mxu0 %vm183_vm2, %v4972_v26  ;;  %v1256_v26 = vpack.c.bf16 %v1250_v55, %v5061_v41 }
  0xdb   :  { %4000 = vmatprep.mubr.msk.bf16.mxu0 %vm183_vm2, %v4985_v52  ;;  %v66_v52 = vld [vmem:[%s6243_s0 + $0x138] sm:$0x3] }
  0xdc   :  { %v1252_v46 = vrot.slane %v66_v52, 1  ;;  %v1386_v5 = vrot.slane %v66_v52, 2 }
  0xde   :  { %v1253_v35 = vsel %vm108_vm1, %v1251_v45, %v1252_v46 }
  0xdf   :  { %v1257_v50 = vpack.c.bf16 %v1253_v35, %v5081_v8 }
  0xe2   :  { %4001 = vmatmul.mubr.msk.bf16.gmra.mrb[12].mxu0 %vm183_vm2, %v1119_v49 }
  0xe3   :  { %4006 = vmatprep.mubr.msk.bf16.mxu0 %vm183_vm2, %v6313_v9 }
  0xea   :  { %4007 = vmatmul.mubr.msk.bf16.vlgmr.msra.gmra.mrb[0].mxu0 %vm183_vm2, %v6314_v28 }
  0xeb   :  { %4023 = vmatpush3.bf16.msra.mxu0 %v1401_v19  ;;  %4010 = vmatprep.mubr.msk.bf16.mxu0 %vm183_vm2, %v6315_v23 }
  0xf2   :  { %4011 = vmatmul.mubr.msk.bf16.gmra.mrb[4].mxu0 %vm183_vm2, %v1256_v26 }
  0xf3   :  { %4014 = vmatprep.mubr.msk.bf16.mxu0 %vm183_vm2, %v6316_v24 }
  0xfa   :  { %4015 = vmatmul.mubr.msk.bf16.gmra.mrb[8].mxu0 %vm183_vm2, %v6317_v29 }
  0xfb   :  { %4018 = vmatprep.mubr.msk.bf16.mxu0 %vm183_vm2, %v6318_v25 }
 0x102   :  { %4019 = vmatmul.mubr.msk.bf16.gmra.mrb[12].mxu0 %vm183_vm2, %v1257_v50 }
 0x103   :  { %4024 = vmatprep.mubr.msk.bf16.mxu0 %vm183_vm2, %v4815_v31  ;;  %v1387_v31 = vsel %vm433_vm3, %v1385_v57, %v1386_v5 }
 0x10a   :  { %4025 = vmatmul.mubr.msk.bf16.vlgmr.msra.gmra.mrb[0].mxu0 %vm183_vm2, %v4993_v1  ;;  %v1391_v1 = vpack.c.bf16 %v1387_v31, %v965_v18 }
 0x10b   :  { %4028 = vmatprep.mubr.msk.bf16.mxu0 %vm183_vm2, %v4854_v33  ;;  %v4481_v33 = vmov 0.0  }
 0x10c   :  { %1756 = vst.msk [vmem:[#allocation2 + $0x188] sm:$0xff] %vm183_vm2, %v4481_v33  ;;  %1707 = vst.msk [vmem:[#allocation2] sm:$0xff] %vm183_vm2, %v4481_v33 }
 0x10d   :  { %1708 = vst.msk [vmem:[#allocation2 + $0x8] sm:$0xff] %vm183_vm2, %v4481_v33  ;;  %1709 = vst.msk [vmem:[#allocation2 + $0x10] sm:$0xff] %vm183_vm2, %v4481_v33 }
 0x10e   :  { %1710 = vst.msk [vmem:[#allocation2 + $0x18] sm:$0xff] %vm183_vm2, %v4481_v33  ;;  %1711 = vst.msk [vmem:[#allocation2 + $0x20] sm:$0xff] %vm183_vm2, %v4481_v33 }
 0x10f   :  { %1712 = vst.msk [vmem:[#allocation2 + $0x28] sm:$0xff] %vm183_vm2, %v4481_v33  ;;  %1713 = vst.msk [vmem:[#allocation2 + $0x30] sm:$0xff] %vm183_vm2, %v4481_v33 }
 0x110   :  { %1714 = vst.msk [vmem:[#allocation2 + $0x38] sm:$0xff] %vm183_vm2, %v4481_v33  ;;  %1715 = vst.msk [vmem:[#allocation2 + $0x40] sm:$0xff] %vm183_vm2, %v4481_v33 }
 0x111   :  { %1716 = vst.msk [vmem:[#allocation2 + $0x48] sm:$0xff] %vm183_vm2, %v4481_v33  ;;  %1717 = vst.msk [vmem:[#allocation2 + $0x50] sm:$0xff] %vm183_vm2, %v4481_v33 }
 0x112   :  { %4029 = vmatmul.mubr.msk.bf16.gmra.mrb[4].mxu0 %vm183_vm2, %v1390_v14  ;;  %1718 = vst.msk [vmem:[#allocation2 + $0x58] sm:$0xff] %vm183_vm2, %v4481_v33  ;;  %1719 = vst.msk [vmem:[#allocation2 + $0x60] sm:$0xff] %vm183_vm2, %v4481_v33 }
 0x113   :  { %4032 = vmatprep.mubr.msk.bf16.mxu0 %vm183_vm2, %v4882_v36  ;;  %1720 = vst.msk [vmem:[#allocation2 + $0x68] sm:$0xff] %vm183_vm2, %v4481_v33  ;;  %1721 = vst.msk [vmem:[#allocation2 + $0x70] sm:$0xff] %vm183_vm2, %v4481_v33  ;;  %v3634_v36 = vld [vmem:[%s6244_s4 + $0x4] sm:$0xf] }
 0x114   :  { %1722 = vst.msk [vmem:[#allocation2 + $0x78] sm:$0xff] %vm183_vm2, %v4481_v33  ;;  %1723 = vst.msk [vmem:[#allocation2 + $0x80] sm:$0xff] %vm183_vm2, %v4481_v33  ;;  %4467 = vmatprep.subr.msk.bf16.mxu1 %vm208_vm0, %v3634_v36 }
 0x115   :  { %1724 = vst.msk [vmem:[#allocation2 + $0x88] sm:$0xff] %vm183_vm2, %v4481_v33  ;;  %1725 = vst.msk [vmem:[#allocation2 + $0x90] sm:$0xff] %vm183_vm2, %v4481_v33 }
 0x116   :  { %1726 = vst.msk [vmem:[#allocation2 + $0x98] sm:$0xff] %vm183_vm2, %v4481_v33  ;;  %1727 = vst.msk [vmem:[#allocation2 + $0xa0] sm:$0xff] %vm183_vm2, %v4481_v33 }
 0x117   :  { %1728 = vst.msk [vmem:[#allocation2 + $0xa8] sm:$0xff] %vm183_vm2, %v4481_v33  ;;  %1729 = vst.msk [vmem:[#allocation2 + $0xb0] sm:$0xff] %vm183_vm2, %v4481_v33 }
 0x118   :  { %1730 = vst.msk [vmem:[#allocation2 + $0xb8] sm:$0xff] %vm183_vm2, %v4481_v33  ;;  %1731 = vst.msk [vmem:[#allocation2 + $0xc0] sm:$0xff] %vm183_vm2, %v4481_v33 }
 0x119   :  { %1732 = vst.msk [vmem:[#allocation2 + $0xc8] sm:$0xff] %vm183_vm2, %v4481_v33  ;;  %1733 = vst.msk [vmem:[#allocation2 + $0xd0] sm:$0xff] %vm183_vm2, %v4481_v33 }
 0x11a   :  { %4033 = vmatmul.mubr.msk.bf16.gmra.mrb[8].mxu0 %vm183_vm2, %v4901_v10  ;;  %1734 = vst.msk [vmem:[#allocation2 + $0xd8] sm:$0xff] %vm183_vm2, %v4481_v33  ;;  %1735 = vst.msk [vmem:[#allocation2 + $0xe0] sm:$0xff] %vm183_vm2, %v4481_v33  ;;  %v2000_v10 = vsel %vm208_vm0, %v3634_v36, 0 }
 0x11b   :  { %4036 = vmatprep.mubr.msk.bf16.mxu0 %vm183_vm2, %v4912_v34  ;;  %1736 = vst.msk [vmem:[#allocation2 + $0xe8] sm:$0xff] %vm183_vm2, %v4481_v33  ;;  %1737 = vst.msk [vmem:[#allocation2 + $0xf0] sm:$0xff] %vm183_vm2, %v4481_v33  ;;  %4041 = vmatpush3.bf16.msra.mxu1 %v2000_v10  ;;  %v5259_v34 = vld [vmem:[%s6244_s4] sm:$0xf] }
 0x11c   :  { %1738 = vst.msk [vmem:[#allocation2 + $0xf8] sm:$0xff] %vm183_vm2, %v4481_v33  ;;  %1739 = vst.msk [vmem:[#allocation2 + $0x100] sm:$0xff] %vm183_vm2, %v4481_v33  ;;  %4468 = vmatprep.subr.msk.bf16.mxu1 %vm208_vm0, %v5259_v34 }
 0x11d   :  { %1740 = vst.msk [vmem:[#allocation2 + $0x108] sm:$0xff] %vm183_vm2, %v4481_v33  ;;  %1741 = vst.msk [vmem:[#allocation2 + $0x110] sm:$0xff] %vm183_vm2, %v4481_v33 }
 0x11e   :  { %1742 = vst.msk [vmem:[#allocation2 + $0x118] sm:$0xff] %vm183_vm2, %v4481_v33  ;;  %1743 = vst.msk [vmem:[#allocation2 + $0x120] sm:$0xff] %vm183_vm2, %v4481_v33 }
 0x11f   :  { %1744 = vst.msk [vmem:[#allocation2 + $0x128] sm:$0xff] %vm183_vm2, %v4481_v33  ;;  %1745 = vst.msk [vmem:[#allocation2 + $0x130] sm:$0xff] %vm183_vm2, %v4481_v33 }
 0x120   :  { %1746 = vst.msk [vmem:[#allocation2 + $0x138] sm:$0xff] %vm183_vm2, %v4481_v33  ;;  %1747 = vst.msk [vmem:[#allocation2 + $0x140] sm:$0xff] %vm183_vm2, %v4481_v33 }
 0x121   :  { %1748 = vst.msk [vmem:[#allocation2 + $0x148] sm:$0xff] %vm183_vm2, %v4481_v33  ;;  %1749 = vst.msk [vmem:[#allocation2 + $0x150] sm:$0xff] %vm183_vm2, %v4481_v33 }
 0x122   :  { %4037 = vmatmul.mubr.msk.bf16.gmra.mrb[12].mxu0 %vm183_vm2, %v1391_v1  ;;  %1750 = vst.msk [vmem:[#allocation2 + $0x158] sm:$0xff] %vm183_vm2, %v4481_v33  ;;  %1751 = vst.msk [vmem:[#allocation2 + $0x160] sm:$0xff] %vm183_vm2, %v4481_v33 }
 0x123   :  { %1752 = vst.msk [vmem:[#allocation2 + $0x168] sm:$0xff] %vm183_vm2, %v4481_v33  ;;  %1753 = vst.msk [vmem:[#allocation2 + $0x170] sm:$0xff] %vm183_vm2, %v4481_v33 }
 0x124   :  { %1754 = vst.msk [vmem:[#allocation2 + $0x178] sm:$0xff] %vm183_vm2, %v4481_v33  ;;  %1755 = vst.msk [vmem:[#allocation2 + $0x180] sm:$0xff] %vm183_vm2, %v4481_v33 }
 0x125   :  { %1757 = vst.msk [vmem:[#allocation2 + $0x190] sm:$0xff] %vm183_vm2, %v4481_v33  ;;  %1758 = vst.msk [vmem:[#allocation2 + $0x198] sm:$0xff] %vm183_vm2, %v4481_v33 }
 0x126   :  { %1759 = vst.msk [vmem:[#allocation2 + $0x1a0] sm:$0xff] %vm183_vm2, %v4481_v33  ;;  %1760 = vst.msk [vmem:[#allocation2 + $0x1a8] sm:$0xff] %vm183_vm2, %v4481_v33 }
 0x127   :  { %1761 = vst.msk [vmem:[#allocation2 + $0x1b0] sm:$0xff] %vm183_vm2, %v4481_v33  ;;  %1762 = vst.msk [vmem:[#allocation2 + $0x1b8] sm:$0xff] %vm183_vm2, %v4481_v33 }
 0x128   :  { %1763 = vst.msk [vmem:[#allocation2 + $0x1c0] sm:$0xff] %vm183_vm2, %v4481_v33  ;;  %1764 = vst.msk [vmem:[#allocation2 + $0x1c8] sm:$0xff] %vm183_vm2, %v4481_v33 }
 0x129   :  { %1765 = vst.msk [vmem:[#allocation2 + $0x1d0] sm:$0xff] %vm183_vm2, %v4481_v33  ;;  %1766 = vst.msk [vmem:[#allocation2 + $0x1d8] sm:$0xff] %vm183_vm2, %v4481_v33 }
 0x1dd   :  { %v5263_v22 = vpop.f32.mrb[0].mxu0 }
 0x1de   :  { %v5265_v3 = vpop.f32.mrb[1].mxu0  ;;  %v1557_v15 = vmul.f32 %v5263_v22, %v5263_v22  ;;  %v1521_v18 = vsel %vm183_vm2, %v5263_v22, 0.0 }
 0x1df   :  { %v1555_v4 = vmul.f32 %v5265_v3, %v5265_v3  ;;  %v5269_v12 = vpop.f32.mrb[2].mxu0  ;;  %v1518_v63 = vsel %vm183_vm2, %v5265_v3, 0.0 }
 0x1e0   :  { %v5271_v32 = vpop.f32.mrb[3].mxu0  ;;  %v1558_v37 = vmul.f32 %v5269_v12, %v5269_v12  ;;  %v1574_v60 = vsel %vm183_vm2, %v1557_v15, 0.0  ;;  %v1523_v56 = vsel %vm183_vm2, %v5269_v12, 0.0 }
 0x1e1   :  { %v1519_v7 = vsel %vm183_vm2, %v5271_v32, 0.0  ;;  %v1556_v0 = vmul.f32 %v5271_v32, %v5271_v32  ;;  %v1571_v38 = vsel %vm183_vm2, %v1555_v4, 0.0 }
 0x1e2   :  { %v1520_v39 = vadd.f32 %v1519_v7, %v1518_v63  ;;  %v1576_v17 = vsel %vm183_vm2, %v1558_v37, 0.0 }
 0x1e3   :  { %v1572_v53 = vsel %vm183_vm2, %v1556_v0, 0.0 }
 0x1e4   :  { %v1522_v44 = vadd.f32 %v1521_v18, %v1520_v39  ;;  %v1573_v51 = vadd.f32 %v1572_v53, %v1571_v38 }
 0x1e5   :  { %v5290_v49 = vpop.f32.mrb[4].mxu0 }
 0x1e6   :  { %v1575_v9 = vadd.f32 %v1574_v60, %v1573_v51  ;;  %v5292_v11 = vpop.f32.mrb[5].mxu0  ;;  %v1524_v6 = vadd.f32 %v1523_v56, %v1522_v44  ;;  %v1561_v52 = vmul.f32 %v5290_v49, %v5290_v49  ;;  %v1529_v50 = vsel %vm183_vm2, %v5290_v49, 0.0 }
 0x1e7   :  { %v1525_v19 = vsel %vm183_vm2, %v5292_v11, 0.0  ;;  %v1559_v28 = vmul.f32 %v5292_v11, %v5292_v11  ;;  %v5299_v23 = vpop.f32.mrb[6].mxu0 }
 0x1e8   :  { %v1526_v55 = vadd.f32 %v1525_v19, %v1524_v6  ;;  %v1577_v26 = vadd.f32 %v1576_v17, %v1575_v9  ;;  %v5301_v24 = vpop.f32.mrb[7].mxu0  ;;  %v1562_v61 = vmul.f32 %v5299_v23, %v5299_v23  ;;  %v1582_v57 = vsel %vm183_vm2, %v1561_v52, 0.0 }
 0x1e9   :  { %v1578_v45 = vsel %vm183_vm2, %v1559_v28, 0.0  ;;  %v1527_v46 = vsel %vm183_vm2, %v5301_v24, 0.0  ;;  %v1560_v29 = vmul.f32 %v5301_v24, %v5301_v24  ;;  %v1531_v5 = vsel %vm183_vm2, %v5299_v23, 0.0 }
 0x1ea   :  { %v1579_v25 = vadd.f32 %v1578_v45, %v1577_v26  ;;  %v1528_v35 = vadd.f32 %v1527_v46, %v1526_v55  ;;  %v1584_v10 = vsel %vm183_vm2, %v1562_v61, 0.0 }
 0x1eb   :  { %v1580_v2 = vsel %vm183_vm2, %v1560_v29, 0.0 }
 0x1ec   :  { %v1530_v62 = vadd.f32 %v1529_v50, %v1528_v35  ;;  %v1581_v14 = vadd.f32 %v1580_v2, %v1579_v25 }
 0x1ed   :  { %v5318_v31 = vpop.f32.mrb[8].mxu0 }
 0x1ee   :  { %v1583_v1 = vadd.f32 %v1582_v57, %v1581_v14  ;;  %v5320_v33 = vpop.f32.mrb[9].mxu0  ;;  %v1532_v36 = vadd.f32 %v1531_v5, %v1530_v62  ;;  %v1565_v18 = vmul.f32 %v5318_v31, %v5318_v31  ;;  %v1537_v60 = vsel %vm183_vm2, %v5318_v31, 0.0 }
 0x1ef   :  { %v1533_v4 = vsel %vm183_vm2, %v5320_v33, 0.0  ;;  %v1563_v15 = vmul.f32 %v5320_v33, %v5320_v33  ;;  %v5327_v63 = vpop.f32.mrb[10].mxu0 }
 0x1f0   :  { %v1534_v7 = vadd.f32 %v1533_v4, %v1532_v36  ;;  %v1585_v0 = vadd.f32 %v1584_v10, %v1583_v1  ;;  %v5329_v39 = vpop.f32.mrb[11].mxu0  ;;  %v1566_v56 = vmul.f32 %v5327_v63, %v5327_v63  ;;  %v1590_v19 = vsel %vm183_vm2, %v1565_v18, 0.0 }
 0x1f1   :  { %v1586_v38 = vsel %vm183_vm2, %v1563_v15, 0.0  ;;  %v1535_v37 = vsel %vm183_vm2, %v5329_v39, 0.0  ;;  %v1564_v53 = vmul.f32 %v5329_v39, %v5329_v39  ;;  %v1539_v28 = vsel %vm183_vm2, %v5327_v63, 0.0 }
 0x1f2   :  { %v1587_v44 = vadd.f32 %v1586_v38, %v1585_v0  ;;  %v1536_v51 = vadd.f32 %v1535_v37, %v1534_v7  ;;  %v1592_v46 = vsel %vm183_vm2, %v1566_v56, 0.0 }
 0x1f3   :  { %v1588_v9 = vsel %vm183_vm2, %v1564_v53, 0.0 }
 0x1f4   :  { %v1538_v6 = vadd.f32 %v1537_v60, %v1536_v51  ;;  %v1589_v17 = vadd.f32 %v1588_v9, %v1587_v44 }
 0x1f5   :  { %v5346_v55 = vpop.f32.mrb[12].mxu0 }
 0x1f6   :  { %v1591_v26 = vadd.f32 %v1590_v19, %v1589_v17  ;;  %v5348_v52 = vpop.f32.mrb[13].mxu0  ;;  %v1540_v45 = vadd.f32 %v1539_v28, %v1538_v6  ;;  %v1569_v62 = vmul.f32 %v5346_v55, %v5346_v55  ;;  %v1545_v10 = vsel %vm183_vm2, %v5346_v55, 0.0 }
 0x1f7   :  { %v1541_v29 = vsel %vm183_vm2, %v5348_v52, 0.0  ;;  %v1567_v25 = vmul.f32 %v5348_v52, %v5348_v52  ;;  %v5355_v35 = vpop.f32.mrb[14].mxu0 }
 0x1f8   :  { %v1542_v50 = vadd.f32 %v1541_v29, %v1540_v45  ;;  %v1593_v61 = vadd.f32 %v1592_v46, %v1591_v26  ;;  %v1488_v2 = vpop.f32.mrb[15].mxu0  ;;  %v1570_v4 = vmul.f32 %v5355_v35, %v5355_v35  ;;  %v1598_v18 = vsel %vm183_vm2, %v1569_v62, 0.0 }
 0x1f9   :  { %v1594_v14 = vsel %vm183_vm2, %v1567_v25, 0.0  ;;  %v1543_v57 = vsel %vm183_vm2, %v1488_v2, 0.0  ;;  %v1568_v5 = vmul.f32 %v1488_v2, %v1488_v2  ;;  %v1547_v38 = vsel %vm183_vm2, %v5355_v35, 0.0 }
 0x1fa   :  { %v1595_v1 = vadd.f32 %v1594_v14, %v1593_v61  ;;  %v1544_v36 = vadd.f32 %v1543_v57, %v1542_v50  ;;  %v1600_v44 = vsel %vm183_vm2, %v1570_v4, 0.0 }
 0x1fb   :  { %v1596_v15 = vsel %vm183_vm2, %v1568_v5, 0.0 }
 0x1fc   :  { %v1546_v7 = vadd.f32 %v1545_v10, %v1544_v36  ;;  %v1597_v0 = vadd.f32 %v1596_v15, %v1595_v1 }
 0x1fe   :  { %v1548_v37 = vadd.f32 %v1547_v38, %v1546_v7  ;;  %v1599_v53 = vadd.f32 %v1598_v18, %v1597_v0 }
 0x200   :  { %v1549_v51 = vrot.slane %v1548_v37, 4  ;;  %v1601_v60 = vadd.f32 %v1600_v44, %v1599_v53 }
 0x202   :  { %v1550_v56 = vadd.f32 %v1549_v51, %v1548_v37  ;;  %v1602_v9 = vrot.slane %v1601_v60, 4 }
 0x204   :  { %v1551_v6 = vrot.slane %v1550_v56, 2  ;;  %v1603_v17 = vadd.f32 %v1602_v9, %v1601_v60 }
 0x206   :  { %v1552_v19 = vadd.f32 %v1551_v6, %v1550_v56  ;;  %v1604_v28 = vrot.slane %v1603_v17, 2 }
 0x208   :  { %v1553_v26 = vrot.slane %v1552_v19, 1  ;;  %v1605_v45 = vadd.f32 %v1604_v28, %v1603_v17 }
 0x20a   :  { %v1554_v46 = vadd.f32 %v1553_v26, %v1552_v19  ;;  %v1606_v29 = vrot.slane %v1605_v45, 1 }
 0x20c   :  { %v1607_v25 = vadd.f32 %v1606_v29, %v1605_v45  ;;  %v5370_v50 = vmul.f32 0.0078125, %v1554_v46 }
 0x20e   :  { %v1609_v61 = vmul.f32 0.0078125, %v1607_v25  ;;  %v1610_v62 = vmul.f32 %v5370_v50, %v5370_v50  ;;  %v1626_v14 = vsub.f32 %v1488_v2, %v5370_v50  ;;  %v1613_v57 = vsub.f32 %v5265_v3, %v5370_v50 }
 0x20f   :  { %v1614_v5 = vsub.f32 %v5271_v32, %v5370_v50  ;;  %v1615_v1 = vsub.f32 %v5263_v22, %v5370_v50  ;;  %v1616_v36 = vsub.f32 %v5269_v12, %v5370_v50  ;;  %v1617_v10 = vsub.f32 %v5292_v11, %v5370_v50 }
 0x210   :  { %v1611_v4 = vsub.f32 %v1609_v61, %v1610_v62  ;;  %v1618_v15 = vsub.f32 %v5301_v24, %v5370_v50  ;;  %v1619_v2 = vsub.f32 %v5290_v49, %v5370_v50  ;;  %v1621_v3 = vsub.f32 %v5320_v33, %v5370_v50 }
 0x211   :  { %v1622_v32 = vsub.f32 %v5329_v39, %v5370_v50  ;;  %v1623_v22 = vsub.f32 %v5318_v31, %v5370_v50  ;;  %v1624_v12 = vsub.f32 %v5327_v63, %v5370_v50  ;;  %v1625_v11 = vsub.f32 %v5348_v52, %v5370_v50  ;;  %v5408_v31 = vld [vmem:[%s6245_s2] ss:$0 sm:$0xff] }
 0x212   :  { %v1612_v7 = vmax.f32 %v1611_v4, 0.0  ;;  %v1627_v24 = vsub.f32 %v5346_v55, %v5370_v50  ;;  %v1620_v49 = vsub.f32 %v5299_v23, %v5370_v50  ;;  %v1628_v33 = vsub.f32 %v5355_v35, %v5370_v50  ;;  %v5413_v55 = vld [vmem:[%s6246_s3] ss:$0 sm:$0xff] }
 0x214   :  { %v1629_v39 = vadd.f32 1e-05, %v1612_v7 }
 0x216   :  { %4477 = vrsqrt.f32 %v1629_v39 }
 0x220   :  { %v4478_v0 = vpop.eup %4477 }
 0x221   :  { %v1644_v63 = vmul.f32 %v4478_v0, %v1626_v14  ;;  %v1631_v52 = vmul.f32 %v4478_v0, %v1613_v57  ;;  %v1632_v18 = vmul.f32 %v4478_v0, %v1614_v5  ;;  %v1633_v38 = vmul.f32 %v4478_v0, %v1615_v1 }
 0x222   :  { %v1634_v23 = vmul.f32 %v4478_v0, %v1616_v36  ;;  %v1635_v37 = vmul.f32 %v4478_v0, %v1617_v10  ;;  %v1636_v35 = vmul.f32 %v4478_v0, %v1618_v15  ;;  %v1637_v53 = vmul.f32 %v4478_v0, %v1619_v2 }
 0x223   :  { %v1666_v44 = vmul.f32 %v5408_v31, %v1644_v63  ;;  %v1653_v51 = vmul.f32 %v5408_v31, %v1631_v52  ;;  %v1654_v60 = vmul.f32 %v5408_v31, %v1632_v18  ;;  %v1655_v56 = vmul.f32 %v5408_v31, %v1633_v38 }
 0x224   :  { %v1656_v9 = vmul.f32 %v5408_v31, %v1634_v23  ;;  %v1657_v6 = vmul.f32 %v5408_v31, %v1635_v37  ;;  %v1658_v17 = vmul.f32 %v5408_v31, %v1636_v35  ;;  %v1659_v19 = vmul.f32 %v5408_v31, %v1637_v53 }
 0x225   :  { %v1688_v28 = vadd.f32 %v5413_v55, %v1666_v44  ;;  %v1675_v26 = vadd.f32 %v5413_v55, %v1653_v51  ;;  %v1676_v45 = vadd.f32 %v5413_v55, %v1654_v60  ;;  %v1677_v46 = vadd.f32 %v5413_v55, %v1655_v56 }
 0x226   :  { %v1678_v29 = vadd.f32 %v5413_v55, %v1656_v9  ;;  %v1679_v25 = vadd.f32 %v5413_v55, %v1657_v6  ;;  %v1680_v50 = vadd.f32 %v5413_v55, %v1658_v17  ;;  %v1681_v61 = vadd.f32 %v5413_v55, %v1659_v19 }
 0x227   :  { %v1704_v62 = vmax.f32 %v1688_v28, 0.0  ;;  %v1691_v14 = vmax.f32 %v1675_v26, 0.0  ;;  %v1692_v57 = vmax.f32 %v1676_v45, 0.0  ;;  %v1693_v5 = vmax.f32 %v1677_v46, 0.0 }
 0x228   :  { %v1694_v1 = vmax.f32 %v1678_v29, 0.0  ;;  %v1695_v36 = vmax.f32 %v1679_v25, 0.0  ;;  %v1696_v10 = vmax.f32 %v1680_v50, 0.0  ;;  %v1697_v4 = vmax.f32 %v1681_v61, 0.0 }
 0x229   :  { %1794 = vst.msk [vmem:[#allocation2 + $0x188] sm:$0xff] %vm183_vm2, %v1704_v62  ;;  %1768 = vst.msk [vmem:[#allocation2 + $0x20] sm:$0xff] %vm183_vm2, %v1691_v14  ;;  %v1639_v15 = vmul.f32 %v4478_v0, %v1621_v3  ;;  %v1640_v2 = vmul.f32 %v4478_v0, %v1622_v32  ;;  %v1641_v7 = vmul.f32 %v4478_v0, %v1623_v22  ;;  %v2124_v62 = vsel %vm208_vm0, %v5259_v34, 0  ;;  %v1799_v34 = vld [vmem:[#allocation2] sm:$0xff] }
 0x22a   :  { %1770 = vst.msk [vmem:[#allocation2 + $0x38] sm:$0xff] %vm183_vm2, %v1692_v57  ;;  %1772 = vst.msk [vmem:[#allocation2 + $0x50] sm:$0xff] %vm183_vm2, %v1693_v5  ;;  %v1642_v39 = vmul.f32 %v4478_v0, %v1624_v12  ;;  %v1643_v63 = vmul.f32 %v4478_v0, %v1625_v11  ;;  %v1645_v52 = vmul.f32 %v4478_v0, %v1627_v24  ;;  %v5492_v5 = vld [vmem:[%s6244_s4 + $0x8] sm:$0xf]  ;;  %v5554_v57 = vld [vmem:[#allocation2 + $0xd0] sm:$0xff] }
 0x22b   :  { %1774 = vst.msk [vmem:[#allocation2 + $0x68] sm:$0xff] %vm183_vm2, %v1694_v1  ;;  %1776 = vst.msk [vmem:[#allocation2 + $0x80] sm:$0xff] %vm183_vm2, %v1695_v36  ;;  %v1638_v18 = vmul.f32 %v4478_v0, %v1620_v49  ;;  %v5439_v38 = vmul.f32 %v4478_v0, %v1628_v33  ;;  %v1661_v23 = vmul.f32 %v5408_v31, %v1639_v15  ;;  %v5452_v0 = vld [vmem:[#allocation2 + $0x8] sm:$0xff]  ;;  %v5498_v1 = vld [vmem:[#allocation2 + $0x18] sm:$0xff] }
 0x22c   :  { %1778 = vst.msk [vmem:[#allocation2 + $0x98] sm:$0xff] %vm183_vm2, %v1696_v10  ;;  %1780 = vst.msk [vmem:[#allocation2 + $0xb0] sm:$0xff] %vm183_vm2, %v1697_v4  ;;  %v1662_v3 = vmul.f32 %v5408_v31, %v1640_v2  ;;  %v1663_v32 = vmul.f32 %v5408_v31, %v1641_v7  ;;  %v1664_v22 = vmul.f32 %v5408_v31, %v1642_v39  ;;  %v5500_v36 = vld [vmem:[#allocation2 + $0xf8] sm:$0xff]  ;;  %v5504_v10 = vld [vmem:[#allocation2 + $0x30] sm:$0xff] }
 0x22d   :  { %v1665_v12 = vmul.f32 %v5408_v31, %v1643_v63  ;;  %v1667_v37 = vmul.f32 %v5408_v31, %v1645_v52  ;;  %v1660_v35 = vmul.f32 %v5408_v31, %v1638_v18  ;;  %v1683_v11 = vadd.f32 %v5413_v55, %v1661_v23  ;;  %v5506_v4 = vld [vmem:[#allocation2 + $0x48] sm:$0xff]  ;;  %v5508_v15 = vld [vmem:[#allocation2 + $0x60] sm:$0xff]  ;;  %v1810_v39 = vld [vmem:[#allocation2 + $0x58] sm:$0xff] }
 0x22e   :  { %v1684_v24 = vadd.f32 %v5413_v55, %v1662_v3  ;;  %v1685_v49 = vadd.f32 %v5413_v55, %v1663_v32  ;;  %v1686_v33 = vadd.f32 %v5413_v55, %v1664_v22  ;;  %v1893_v63 = vrot.slane %v5452_v0, 7  ;;  %v5517_v23 = vld [vmem:[#allocation2 + $0x28] sm:$0xff]  ;;  %v5519_v3 = vld [vmem:[#allocation2 + $0x40] sm:$0xff]  ;;  %v1813_v22 = vld [vmem:[#allocation2 + $0x70] sm:$0xff] }
 0x22f   :  { %v1687_v53 = vadd.f32 %v5413_v55, %v1665_v12  ;;  %v1689_v44 = vadd.f32 %v5413_v55, %v1667_v37  ;;  %v1682_v51 = vadd.f32 %v5413_v55, %v1660_v35  ;;  %v1699_v60 = vmax.f32 %v1683_v11, 0.0  ;;  %v5522_v12 = vld [vmem:[#allocation2 + $0x88] sm:$0xff]  ;;  %v5524_v37 = vld [vmem:[#allocation2 + $0xa0] sm:$0xff] }
 0x230   :  { %v1700_v56 = vmax.f32 %v1684_v24, 0.0  ;;  %v1701_v9 = vmax.f32 %v1685_v49, 0.0  ;;  %v1702_v6 = vmax.f32 %v1686_v33, 0.0  ;;  %v5457_v17 = vld [vmem:[#allocation2 + $0x20] sm:$0xff]  ;;  %v1892_v18 = vrot.slane %v1799_v34, 7  ;;  %v5532_v33 = vld [vmem:[#allocation2 + $0xb8] sm:$0xff] }
 0x231   :  { %v5459_v19 = vld [vmem:[#allocation2 + $0x38] sm:$0xff]  ;;  %v5461_v28 = vld [vmem:[#allocation2 + $0x50] sm:$0xff]  ;;  %v1703_v26 = vmax.f32 %v1687_v53, 0.0  ;;  %v1705_v45 = vmax.f32 %v1689_v44, 0.0  ;;  %v1698_v46 = vmax.f32 %v1682_v51, 0.0  ;;  %v1965_v29 = vpack.c.bf16 %v5457_v17, %v5452_v0  ;;  %1784 = vst.msk [vmem:[#allocation2 + $0x110] sm:$0xff] %vm183_vm2, %v1699_v60 }
 0x232   :  { %v5465_v25 = vld [vmem:[#allocation2 + $0x68] sm:$0xff]  ;;  %v5467_v50 = vld [vmem:[#allocation2 + $0x80] sm:$0xff]  ;;  %1786 = vst.msk [vmem:[#allocation2 + $0x128] sm:$0xff] %vm183_vm2, %v1700_v56  ;;  %1788 = vst.msk [vmem:[#allocation2 + $0x140] sm:$0xff] %vm183_vm2, %v1701_v9  ;;  %v5475_v61 = vpack.c.bf16 %v5461_v28, %v5459_v19  ;;  %v2248_v35 = vrot.slane %v5461_v28, 1  ;;  %v2249_v49 = vrot.slane %v1810_v39, 1 }
 0x233   :  { %1790 = vst.msk [vmem:[#allocation2 + $0x158] sm:$0xff] %vm183_vm2, %v1702_v6  ;;  %1792 = vst.msk [vmem:[#allocation2 + $0x170] sm:$0xff] %vm183_vm2, %v1703_v26  ;;  %4042 = vmatprep.mubr.msk.bf16.mxu1 %vm183_vm2, %v1965_v29  ;;  %v5485_v14 = vpack.c.bf16 %v5467_v50, %v5465_v25  ;;  %v5510_v2 = vld [vmem:[#allocation2 + $0x98] sm:$0xff]  ;;  %v5512_v7 = vld [vmem:[#allocation2 + $0xb0] sm:$0xff]  ;;  %v2243_v9 = vrot.slane %v5517_v23, 1  ;;  %v2252_v29 = vrot.slane %v1813_v22, 1 }
 0x234   :  { %6319 = vst [vmem:[#allocation23_spill] sm:$0xff] %v5475_v61  ;;  %1796 = vst.msk [vmem:[#allocation2 + $0x1a0] sm:$0xff] %vm183_vm2, %v1705_v45  ;;  %4043 = vmatmul.mubr.msk.bf16.vlgmr.msra.gmra.mrb[0].mxu1 %vm183_vm2, %v5475_v61  ;;  %v5529_v11 = vpack.c.bf16 %v5512_v7, %v5510_v2  ;;  %v5534_v53 = vld [vmem:[#allocation2 + $0x118] sm:$0xff]  ;;  %v5536_v44 = vld [vmem:[#allocation2 + $0x130] sm:$0xff]  ;;  %v5550_v45 = vsel %vm1891_vm4, %v1892_v18, %v1893_v63  ;;  %v2258_v23 = vrot.slane %v5524_v37, 1  ;;  %v2261_v56 = vrot.slane %v5532_v33, 1 }
 0x235   :  { %1782 = vst.msk [vmem:[#allocation2 + $0xc8] sm:$0xff] %vm183_vm2, %v1698_v46  ;;  %6320 = vst [vmem:[#allocation6_spill] sm:$0xff] %v5485_v14  ;;  %4059 = vmatpush3.bf16.msra.mxu1 %v2124_v62  ;;  %4046 = vmatprep.mubr.msk.bf16.mxu1 %vm183_vm2, %v5485_v14  ;;  %v5543_v6 = vld [vmem:[#allocation2 + $0x148] sm:$0xff]  ;;  %v5545_v26 = vld [vmem:[#allocation2 + $0x160] sm:$0xff]  ;;  %v2246_v46 = vrot.slane %v5519_v3, 1  ;;  %v2255_v62 = vrot.slane %v5522_v12, 1  ;;  %v5568_v24 = vsel %vm108_vm1, %v2248_v35, %v2249_v49 }
 0x236   :  { %4469 = vmatprep.subr.msk.bf16.mxu1 %vm208_vm0, %v5492_v5  ;;  %6321 = vst [vmem:[#allocation10_spill] sm:$0xff] %v5529_v11  ;;  %v1846_v34 = vld [vmem:[#allocation2 + $0x178] sm:$0xff]  ;;  %v1849_v39 = vld [vmem:[#allocation2 + $0x190] sm:$0xff]  ;;  %v2267_v60 = vrot.slane %v5534_v53, 1  ;;  %v2270_v63 = vrot.slane %v5536_v44, 1  ;;  %v5561_v18 = vld [vmem:[#allocation2 + $0xe0] sm:$0xff]  ;;  %v1668_v44 = vmul.f32 %v5408_v31, %v5439_v38 }
 0x237   :  { %v1828_v3 = vld [vmem:[#allocation2 + $0xe8] sm:$0xff]  ;;  %v2273_v37 = vrot.slane %v5543_v6, 1  ;;  %v2276_v33 = vrot.slane %v5545_v26, 1  ;;  %v2279_v32 = vrot.slane %v1846_v34, 1  ;;  %v2282_v53 = vrot.slane %v1849_v39, 1 }
 0x238   :  { %v5515_v52 = vld [vmem:[#allocation2 + $0x110] sm:$0xff]  ;;  %v1896_v27 = vrot.slane %v5457_v17, 7  ;;  %v3191_v49 = vrot.slane %v5561_v18, 1  ;;  %v3192_v6 = vrot.slane %v1828_v3, 1  ;;  %v2242_v26 = vrot.slane %v5457_v17, 1  ;;  %v5591_v38 = vld [vmem:[#allocation2 + $0x188] sm:$0xff] }
 0x239   :  { %v1969_v51 = vpack.c.bf16 %v5515_v52, %v5500_v36  ;;  %v5563_v22 = vld [vmem:[#allocation2 + $0x128] sm:$0xff]  ;;  %v5565_v12 = vld [vmem:[#allocation2 + $0x140] sm:$0xff]  ;;  %v2245_v34 = vrot.slane %v5459_v19, 1  ;;  %v2266_v3 = vrot.slane %v5515_v52, 1  ;;  %v1690_v39 = vadd.f32 %v5413_v55, %v1668_v44 }
 0x23a   :  { %v5577_v21 = vld [vmem:[#allocation2 + $0x158] sm:$0xff]  ;;  %v5579_v59 = vld [vmem:[#allocation2 + $0x170] sm:$0xff]  ;;  %v5589_v31 = vpack.c.bf16 %v5565_v12, %v5563_v22  ;;  %v2269_v58 = vrot.slane %v5563_v22, 1  ;;  %v2272_v40 = vrot.slane %v5565_v12, 1  ;;  %v2260_v41 = vrot.slane %v5512_v7, 1 }
 0x23b   :  { %v5595_v8 = vld [vmem:[#allocation2 + $0x1a0] sm:$0xff]  ;;  %v5603_v43 = vpack.c.bf16 %v5579_v59, %v5577_v21  ;;  %v2275_v13 = vrot.slane %v5577_v21, 1  ;;  %v2278_v54 = vrot.slane %v5579_v59, 1  ;;  %v2281_v48 = vrot.slane %v5591_v38, 1 }
 0x23c   :  { %4047 = vmatmul.mubr.msk.bf16.gmra.mrb[4].mxu1 %vm183_vm2, %v5529_v11  ;;  %6322 = vst [vmem:[#allocation12_spill] sm:$0xff] %v5589_v31  ;;  %v5614_v47 = vsel %vm108_vm1, %v3191_v49, %v3192_v6  ;;  %v5620_v42 = vpack.c.bf16 %v5595_v8, %v5591_v38  ;;  %v6326_v55 = vrot.slane %v5498_v1, 7  ;;  %v5628_v30 = vsel %vm108_vm1, %v2242_v26, %v2243_v9  ;;  %v1844_v11 = vld [vmem:[#allocation2 + $0x168] sm:$0xff] }
 0x23d   :  { %4050 = vmatprep.mubr.msk.bf16.mxu1 %vm183_vm2, %v1969_v51  ;;  %v2251_v51 = vrot.slane %v5465_v25, 1  ;;  %6323 = vst [vmem:[#allocation18_spill] sm:$0xff] %v5603_v43  ;;  %6324 = vst [vmem:[#allocation21_spill] sm:$0xff] %v5614_v47  ;;  %v5631_v20 = vsel %vm108_vm1, %v2245_v34, %v2246_v46  ;;  %v5640_v16 = vsel %vm108_vm1, %v2266_v3, %v2267_v60  ;;  %v5651_v46 = vld [vmem:[#allocation2 + $0xc8] sm:$0xff]  ;;  %v1706_v26 = vmax.f32 %v1690_v39, 0.0  ;;  %v5688_v3 = vld [vmem:[#allocation2 + $0x1d0] sm:$0xff] }
 0x23e   :  { %6325 = vst [vmem:[#allocation22_spill] sm:$0xff] %v5620_v42  ;;  %v5625_v44 = vsel %vm1891_vm4, %v6326_v55, %v1896_v27  ;;  %v5643_v1 = vsel %vm108_vm1, %v2269_v58, %v2270_v63  ;;  %v5646_v27 = vsel %vm108_vm1, %v2272_v40, %v2273_v37  ;;  %v5649_v9 = vsel %vm108_vm1, %v2275_v13, %v2276_v33  ;;  %v1814_v13 = vld [vmem:[#allocation2 + $0x78] sm:$0xff] }
 0x23f   :  { %v5582_v35 = vsel %vm108_vm1, %v2251_v51, %v2252_v29  ;;  %v2254_v29 = vrot.slane %v5467_v50, 1  ;;  %v2257_v51 = vrot.slane %v5510_v2, 1  ;;  %v5659_v60 = vsel %vm108_vm1, %v2278_v54, %v2279_v32  ;;  %1798 = vst.msk [vmem:[#allocation2 + $0x1b8] sm:$0xff] %vm183_vm2, %v1706_v26  ;;  %6327 = vst [vmem:[#allocation26_spill] sm:$0xff] %v5688_v3  ;;  %v1858_v55 = vld [vmem:[#allocation2 + $0x1d8] sm:$0xff] }
 0x240   :  { %v5662_v58 = vsel %vm108_vm1, %v2281_v48, %v2282_v53  ;;  %v1852_v48 = vld [vmem:[#allocation2 + $0x1a8] sm:$0xff]  ;;  %v1899_v34 = vrot.slane %v5459_v19, 7  ;;  %v1902_v39 = vrot.slane %v5461_v28, 7  ;;  %v1905_v26 = vrot.slane %v5465_v25, 7 }
 0x241   :  { %v5634_v49 = vsel %vm108_vm1, %v2254_v29, %v2255_v62  ;;  %v5637_v6 = vsel %vm108_vm1, %v2257_v51, %v2258_v23  ;;  %v5656_v23 = vsel %vm108_vm1, %v2260_v41, %v2261_v56  ;;  %v2767_v56 = vrot.slane %v5651_v46, 1 }
 0x242   :  { %v1956_v29 = vpack.c.bf16 %v5625_v44, %v5550_v45  ;;  %v1907_v33 = vrot.slane %v1814_v13, 7  ;;  %v1908_v53 = vrot.slane %v5467_v50, 7  ;;  %v6328_v32 = vrot.slane %v5554_v57, 1  ;;  %v1855_v45 = vld [vmem:[#allocation2 + $0x1c0] sm:$0xff]  ;;  %v1817_v13 = vld [vmem:[#allocation2 + $0x90] sm:$0xff] }
 0x243   :  { %v2284_v51 = vrot.slane %v5595_v8, 1  ;;  %v2285_v41 = vrot.slane %v1852_v48, 1  ;;  %v3194_v40 = vrot.slane %v5688_v3, 1  ;;  %v3195_v62 = vrot.slane %v1858_v55, 1  ;;  %v1820_v48 = vld [vmem:[#allocation2 + $0xa8] sm:$0xff]  ;;  %v1801_v3 = vld [vmem:[#allocation2 + $0x10] sm:$0xff] }
 0x244   :  { %4051 = vmatmul.mubr.msk.bf16.gmra.mrb[8].mxu1 %vm183_vm2, %v5589_v31  ;;  %v5697_v54 = vsel %vm108_vm1, %v2767_v56, %v6328_v32  ;;  %v6329_v57 = vrot.slane %v5504_v10, 7  ;;  %v6330_v56 = vrot.slane %v5506_v4, 7  ;;  %v6331_v37 = vrot.slane %v5508_v15, 7  ;;  %v1832_v4 = vld [vmem:[#allocation2 + $0x108] sm:$0xff]  ;;  %v1841_v31 = vld [vmem:[#allocation2 + $0x150] sm:$0xff] }
 0x245   :  { %4054 = vmatprep.mubr.msk.bf16.mxu1 %vm183_vm2, %v5603_v43  ;;  %v5722_v47 = vsel %vm1891_vm4, %v1907_v33, %v1908_v53  ;;  %v1917_v10 = vrot.slane %v5500_v36, 7  ;;  %v1913_v33 = vrot.slane %v1820_v48, 7  ;;  %v5738_v53 = vsel %vm108_vm1, %v3194_v40, %v3195_v62 }
 0x246   :  { %v5709_v32 = vsel %vm1891_vm4, %v6329_v57, %v1899_v34  ;;  %v5719_v63 = vsel %vm1891_vm4, %v6331_v37, %v1905_v26  ;;  %v5724_v55 = vld [vmem:[#allocation2 + $0x1b8] sm:$0xff]  ;;  %v1910_v34 = vrot.slane %v1817_v13, 7  ;;  %v1829_v57 = vld [vmem:[#allocation2 + $0xf0] sm:$0xff]  ;;  %v2338_v37 = vsel %vm208_vm0, %v5492_v5, 0  ;;  %6332 = vst [vmem:[#allocation27_spill] sm:$0xff] %v5738_v53 }
 0x247   :  { %v5742_v26 = vpack.c.bf16 %v5722_v47, %v5719_v63  ;;  %v3660_v13 = vld [vmem:[%s6244_s4 + $0xc] sm:$0xf]  ;;  %v1916_v5 = vrot.slane %v1829_v57, 7  ;;  %v1919_v62 = vrot.slane %v1832_v4, 7  ;;  %v1920_v40 = vrot.slane %v5515_v52, 7  ;;  %v1835_v4 = vld [vmem:[#allocation2 + $0x120] sm:$0xff] }
 0x248   :  { %v1922_v53 = vrot.slane %v1835_v4, 7 }
 0x249   :  { %v5770_v48 = vsel %vm1891_vm4, %v1919_v62, %v1920_v40  ;;  %v1931_v62 = vrot.slane %v1844_v11, 7  ;;  %v1932_v40 = vrot.slane %v5579_v59, 7 }
 0x24b   :  { %v5794_v61 = vsel %vm1891_vm4, %v1931_v62, %v1932_v40 }
 0x24c   :  { %4055 = vmatmul.mubr.msk.bf16.gmra.mrb[12].mxu1 %vm183_vm2, %v5620_v42  ;;  %v2771_v42 = vrot.slane %v1855_v45, 1  ;;  %v2770_v45 = vrot.slane %v5724_v55, 1 }
 0x24d   :  { %4060 = vmatprep.mubr.msk.bf16.mxu1 %vm183_vm2, %v1956_v29  ;;  %v5714_v29 = vsel %vm1891_vm4, %v6330_v56, %v1902_v39  ;;  %v5728_v39 = vsel %vm108_vm1, %v2284_v51, %v2285_v41  ;;  %v1911_v41 = vrot.slane %v5510_v2, 7  ;;  %v1914_v51 = vrot.slane %v5512_v7, 7 }
 0x24e   :  { %v5733_v15 = vpack.c.bf16 %v5714_v29, %v5709_v32  ;;  %v5750_v56 = vsel %vm108_vm1, %v2770_v45, %v2771_v42  ;;  %v1918_v45 = vsel %vm1891_vm4, %v1916_v5, %v1917_v10  ;;  %v1928_v10 = vrot.slane %v1841_v31, 7  ;;  %v1850_v31 = vld [vmem:[#allocation2 + $0x198] sm:$0xff] }
 0x24f   :  { %v5763_v42 = vsel %vm1891_vm4, %v1910_v34, %v1911_v41  ;;  %v5766_v57 = vsel %vm1891_vm4, %v1913_v33, %v1914_v51  ;;  %v1960_v34 = vpack.c.bf16 %v5770_v48, %v1918_v45  ;;  %v1923_v41 = vrot.slane %v5563_v22, 7 }
 0x250   :  { %v5774_v43 = vpack.c.bf16 %v5766_v57, %v5763_v42  ;;  %v1926_v51 = vrot.slane %v5565_v12, 7  ;;  %v1929_v5 = vrot.slane %v5577_v21, 7 }
 0x251   :  { %v5785_v4 = vsel %vm1891_vm4, %v1922_v53, %v1923_v41  ;;  %v1935_v41 = vrot.slane %v5591_v38, 7 }
 0x252   :  { %6333 = vst [vmem:[#allocation28_spill] sm:$0xff] %v5774_v43  ;;  %v5791_v14 = vsel %vm1891_vm4, %v1928_v10, %v1929_v5  ;;  %v2239_v10 = vrot.slane %v5452_v0, 1  ;;  %v2240_v5 = vrot.slane %v1801_v3, 1  ;;  %v1831_v0 = vld [vmem:[#allocation2 + $0x100] sm:$0xff]  ;;  %v5822_v3 = vpack.c.bf16 %v5568_v24, %v5631_v20 }
 0x253   :  { %v5802_v53 = vpack.c.bf16 %v5794_v61, %v5791_v14 }
 0x254   :  { %4061 = vmatmul.mubr.msk.bf16.vlgmr.msra.gmra.mrb[0].mxu1 %vm183_vm2, %v5733_v15 }
 0x255   :  { %4077 = vmatpush3.bf16.msra.mxu1 %v2338_v37  ;;  %4064 = vmatprep.mubr.msk.bf16.mxu1 %vm183_vm2, %v5742_v26  ;;  %v1838_v37 = vld [vmem:[#allocation2 + $0x138] sm:$0xff] }
 0x256   :  { %4470 = vmatprep.subr.msk.bf16.mxu1 %vm208_vm0, %v3660_v13  ;;  %v1925_v33 = vrot.slane %v1838_v37, 7  ;;  %v1847_v37 = vld [vmem:[#allocation2 + $0x180] sm:$0xff] }
 0x258   :  { %v5788_v45 = vsel %vm1891_vm4, %v1925_v33, %v1926_v51  ;;  %v1937_v33 = vrot.slane %v1850_v31, 7  ;;  %v1938_v51 = vrot.slane %v5595_v8, 7 }
 0x259   :  { %v5798_v11 = vpack.c.bf16 %v5788_v45, %v5785_v4 }
 0x25a   :  { %v1939_v40 = vsel %vm1891_vm4, %v1937_v33, %v1938_v51  ;;  %v3669_v33 = vld [vmem:[%s6244_s4 + $0x10] sm:$0xf]  ;;  %v2263_v51 = vrot.slane %v5500_v36, 1  ;;  %v5849_v36 = vpack.c.bf16 %v5646_v27, %v5643_v1 }
 0x25c   :  { %4065 = vmatmul.mubr.msk.bf16.gmra.mrb[4].mxu1 %vm183_vm2, %v5774_v43  ;;  %6334 = vst [vmem:[#allocation29_spill] sm:$0xff] %v5849_v36 }
 0x25d   :  { %4068 = vmatprep.mubr.msk.bf16.mxu1 %vm183_vm2, %v1960_v34  ;;  %v1934_v34 = vrot.slane %v1847_v37, 7  ;;  %v2241_v37 = vsel %vm108_vm1, %v2239_v10, %v2240_v5  ;;  %v2264_v10 = vrot.slane %v1831_v0, 1  ;;  %v5841_v5 = vpack.c.bf16 %v5656_v23, %v5637_v6 }
 0x25e   :  { %v2303_v31 = vpack.c.bf16 %v5628_v30, %v2241_v37  ;;  %v5861_v0 = vpack.c.bf16 %v5728_v39, %v5662_v58 }
 0x25f   :  { %v1936_v62 = vsel %vm1891_vm4, %v1934_v34, %v1935_v41  ;;  %v2500_v34 = vsel %vm208_vm0, %v3660_v13, 0  ;;  %v5827_v41 = vpack.c.bf16 %v5634_v49, %v5582_v35  ;;  %v2265_v13 = vsel %vm108_vm1, %v2263_v51, %v2264_v10  ;;  %v1823_v51 = vld [vmem:[#allocation2 + $0xc0] sm:$0xff] }
 0x260   :  { %v5814_v43 = vpack.c.bf16 %v1939_v40, %v1936_v62  ;;  %v2307_v37 = vpack.c.bf16 %v5640_v16, %v2265_v13  ;;  %v2466_v10 = vpack.c.bf16 %v5719_v63, %v5714_v29  ;;  %v2650_v13 = vsel %vm208_vm0, %v3669_v33, 0  ;;  %v1853_v29 = vld [vmem:[#allocation2 + $0x1b0] sm:$0xff] }
 0x264   :  { %4069 = vmatmul.mubr.msk.bf16.gmra.mrb[8].mxu1 %vm183_vm2, %v5798_v11 }
 0x265   :  { %4072 = vmatprep.mubr.msk.bf16.mxu1 %vm183_vm2, %v5802_v53 }
 0x26c   :  { %4073 = vmatmul.mubr.msk.bf16.gmra.mrb[12].mxu1 %vm183_vm2, %v5814_v43 }
 0x26d   :  { %4078 = vmatprep.mubr.msk.bf16.mxu1 %vm183_vm2, %v2303_v31  ;;  %v5853_v31 = vpack.c.bf16 %v5659_v60, %v5649_v9 }
 0x26f   :  { %6335 = vst [vmem:[#allocation30_spill] sm:$0xff] %v5853_v31 }
 0x274   :  { %4079 = vmatmul.mubr.msk.bf16.vlgmr.msra.gmra.mrb[0].mxu1 %vm183_vm2, %v5822_v3 }
 0x275   :  { %4095 = vmatpush3.bf16.msra.mxu1 %v2500_v34  ;;  %4082 = vmatprep.mubr.msk.bf16.mxu1 %vm183_vm2, %v5827_v41  ;;  %v2465_v34 = vpack.c.bf16 %v5709_v32, %v5625_v44  ;;  %v3678_v44 = vld [vmem:[%s6244_s4 + $0x14] sm:$0xf] }
 0x276   :  { %4471 = vmatprep.subr.msk.bf16.mxu1 %vm208_vm0, %v3669_v33  ;;  %v2471_v33 = vpack.c.bf16 %v1936_v62, %v5794_v61  ;;  %v3687_v61 = vld [vmem:[%s6244_s4 + $0x18] sm:$0xf]  ;;  %v6338_v62 = vpack.c.bf16 %v5510_v2, %v5467_v50  ;;  %v2622_v50 = vpack.c.bf16 %v5724_v55, %v5595_v8  ;;  %v6342_v2 = vpack.c.bf16 %v5631_v20, %v5628_v30 }
 0x277   :  { %v6344_v8 = vpack.c.bf16 %v5637_v6, %v5634_v49  ;;  %v6345_v20 = vpack.c.bf16 %v5697_v54, %v5656_v23  ;;  %v6346_v30 = vpack.c.bf16 %v5643_v1, %v5640_v16  ;;  %v1826_v16 = vld [vmem:[#allocation2 + $0xd8] sm:$0xff]  ;;  %v3705_v49 = vld [vmem:[%s6244_s4 + $0x20] sm:$0xf]  ;;  %v6350_v6 = vld [vmem:[#allocation28_spill] sm:$0xff] }
 0x27c   :  { %4083 = vmatmul.mubr.msk.bf16.gmra.mrb[4].mxu1 %vm183_vm2, %v5841_v5 }
 0x27d   :  { %4086 = vmatprep.mubr.msk.bf16.mxu1 %vm183_vm2, %v2307_v37  ;;  %v2467_v37 = vpack.c.bf16 %v5763_v42, %v5722_v47  ;;  %v2469_v47 = vpack.c.bf16 %v5785_v4, %v5770_v48  ;;  %v2470_v42 = vpack.c.bf16 %v5791_v14, %v5788_v45  ;;  %v6336_v4 = vpack.c.bf16 %v5459_v19, %v5457_v17 }
 0x27e   :  { %v2810_v14 = vsel %vm208_vm0, %v3678_v44, 0  ;;  %v6337_v45 = vpack.c.bf16 %v5465_v25, %v5461_v28  ;;  %v2618_v17 = vpack.c.bf16 %v5651_v46, %v5512_v7  ;;  %v6339_v19 = vpack.c.bf16 %v5563_v22, %v5515_v52 }
 0x27f   :  { %v6340_v28 = vpack.c.bf16 %v5577_v21, %v5565_v12  ;;  %v6341_v25 = vpack.c.bf16 %v5591_v38, %v5579_v59  ;;  %v2948_v7 = vsel %vm208_vm0, %v3687_v61, 0  ;;  %v3696_v21 = vld [vmem:[%s6244_s4 + $0x1c] sm:$0xf]  ;;  %v6343_v59 = vpack.c.bf16 %v5582_v35, %v5568_v24 }
 0x280   :  { %v6347_v52 = vpack.c.bf16 %v5649_v9, %v5646_v27  ;;  %v6348_v24 = vpack.c.bf16 %v5662_v58, %v5659_v60  ;;  %v6349_v22 = vpack.c.bf16 %v5750_v56, %v5728_v39  ;;  %v3074_v12 = vsel %vm208_vm0, %v3696_v21, 0  ;;  %v1856_v9 = vld [vmem:[#allocation2 + $0x1c8] sm:$0xff]  ;;  %v6351_v60 = vld [vmem:[#allocation26_spill] sm:$0xff] }
 0x281   :  { %v2929_v35 = vrot.slane %v1826_v16, 7  ;;  %v2930_v38 = vrot.slane %v5561_v18, 7  ;;  %v2932_v23 = vrot.slane %v1856_v9, 7  ;;  %v2933_v58 = vrot.slane %v6351_v60, 7 }
 0x283   :  { %v2931_v1 = vsel %vm1891_vm4, %v2929_v35, %v2930_v38  ;;  %v2934_v39 = vsel %vm1891_vm4, %v2932_v23, %v2933_v58 }
 0x284   :  { %4087 = vmatmul.mubr.msk.bf16.gmra.mrb[8].mxu1 %vm183_vm2, %v5849_v36  ;;  %v2458_v36 = vrot.slane %v5651_v46, 7 }
 0x285   :  { %4090 = vmatprep.mubr.msk.bf16.mxu1 %vm183_vm2, %v5853_v31  ;;  %v2457_v31 = vrot.slane %v1823_v51, 7  ;;  %v2461_v51 = vrot.slane %v5724_v55, 7 }
 0x287   :  { %v2459_v63 = vsel %vm1891_vm4, %v2457_v31, %v2458_v36  ;;  %v6354_v36 = vld [vmem:[#allocation10_spill] sm:$0xff] }
 0x288   :  { %v2468_v32 = vpack.c.bf16 %v2459_v63, %v5766_v57  ;;  %v2937_v27 = vpack.c.bf16 %v2931_v1, %v2459_v63  ;;  %v6356_v31 = vld [vmem:[#allocation18_spill] sm:$0xff] }
 0x28c   :  { %4091 = vmatmul.mubr.msk.bf16.gmra.mrb[12].mxu1 %vm183_vm2, %v5861_v0 }
 0x28d   :  { %4096 = vmatprep.mubr.msk.bf16.mxu1 %vm183_vm2, %v2465_v34  ;;  %v2460_v34 = vrot.slane %v1853_v29, 7 }
 0x28f   :  { %v2462_v57 = vsel %vm1891_vm4, %v2460_v34, %v2461_v51 }
 0x290   :  { %v2472_v48 = vpack.c.bf16 %v2462_v57, %v1939_v40  ;;  %v6353_v40 = vld [vmem:[#allocation6_spill] sm:$0xff] }
 0x294   :  { %4097 = vmatmul.mubr.msk.bf16.vlgmr.msra.gmra.mrb[0].mxu1 %vm183_vm2, %v2466_v10  ;;  %v6357_v10 = vld [vmem:[#allocation22_spill] sm:$0xff] }
 0x295   :  { %4113 = vmatpush3.bf16.msra.mxu1 %v2650_v13  ;;  %4100 = vmatprep.mubr.msk.bf16.mxu1 %vm183_vm2, %v2467_v37  ;;  %v3064_v13 = vpack.c.bf16 %v6351_v60, %v5724_v55  ;;  %v6360_v37 = vld [vmem:[#allocation29_spill] sm:$0xff]  ;;  %v6361_v55 = vld [vmem:[#allocation30_spill] sm:$0xff] }
 0x296   :  { %4472 = vmatprep.subr.msk.bf16.mxu1 %vm208_vm0, %v3678_v44 }
 0x29c   :  { %4101 = vmatmul.mubr.msk.bf16.gmra.mrb[4].mxu1 %vm183_vm2, %v2468_v32 }
 0x29d   :  { %4104 = vmatprep.mubr.msk.bf16.mxu1 %vm183_vm2, %v2469_v47 }
 0x2a4   :  { %4105 = vmatmul.mubr.msk.bf16.gmra.mrb[8].mxu1 %vm183_vm2, %v2470_v42 }
 0x2a5   :  { %4108 = vmatprep.mubr.msk.bf16.mxu1 %vm183_vm2, %v2471_v33 }
 0x2ac   :  { %4109 = vmatmul.mubr.msk.bf16.gmra.mrb[12].mxu1 %vm183_vm2, %v2472_v48 }
 0x2ad   :  { %4114 = vmatprep.mubr.msk.bf16.mxu1 %vm183_vm2, %v6336_v4 }
 0x2b4   :  { %4115 = vmatmul.mubr.msk.bf16.vlgmr.msra.gmra.mrb[0].mxu1 %vm183_vm2, %v6337_v45 }
 0x2b5   :  { %4131 = vmatpush3.bf16.msra.mxu1 %v2810_v14  ;;  %4118 = vmatprep.mubr.msk.bf16.mxu1 %vm183_vm2, %v6338_v62 }
 0x2b6   :  { %4473 = vmatprep.subr.msk.bf16.mxu1 %vm208_vm0, %v3687_v61 }
 0x2bc   :  { %4119 = vmatmul.mubr.msk.bf16.gmra.mrb[4].mxu1 %vm183_vm2, %v2618_v17 }
 0x2bd   :  { %4122 = vmatprep.mubr.msk.bf16.mxu1 %vm183_vm2, %v6339_v19 }
 0x2c4   :  { %4123 = vmatmul.mubr.msk.bf16.gmra.mrb[8].mxu1 %vm183_vm2, %v6340_v28 }
 0x2c5   :  { %4126 = vmatprep.mubr.msk.bf16.mxu1 %vm183_vm2, %v6341_v25 }
 0x2cc   :  { %4127 = vmatmul.mubr.msk.bf16.gmra.mrb[12].mxu1 %vm183_vm2, %v2622_v50 }
 0x2cd   :  { %4132 = vmatprep.mubr.msk.bf16.mxu1 %vm183_vm2, %v6342_v2 }
 0x2d4   :  { %4133 = vmatmul.mubr.msk.bf16.vlgmr.msra.gmra.mrb[0].mxu1 %vm183_vm2, %v6343_v59 }
 0x2d5   :  { %4149 = vmatpush3.bf16.msra.mxu1 %v2948_v7  ;;  %4136 = vmatprep.mubr.msk.bf16.mxu1 %vm183_vm2, %v6344_v8 }
 0x2d6   :  { %4474 = vmatprep.subr.msk.bf16.mxu1 %vm208_vm0, %v3696_v21 }
 0x2dc   :  { %4137 = vmatmul.mubr.msk.bf16.gmra.mrb[4].mxu1 %vm183_vm2, %v6345_v20 }
 0x2dd   :  { %4140 = vmatprep.mubr.msk.bf16.mxu1 %vm183_vm2, %v6346_v30 }
 0x2e4   :  { %4141 = vmatmul.mubr.msk.bf16.gmra.mrb[8].mxu1 %vm183_vm2, %v6347_v52 }
 0x2e5   :  { %4144 = vmatprep.mubr.msk.bf16.mxu1 %vm183_vm2, %v6348_v24 }
 0x2ec   :  { %4145 = vmatmul.mubr.msk.bf16.gmra.mrb[12].mxu1 %vm183_vm2, %v6349_v22 }
 0x2ed   :  { %4150 = vmatprep.mubr.msk.bf16.mxu1 %vm183_vm2, %v5733_v15  ;;  %v2938_v15 = vpack.c.bf16 %v2934_v39, %v2462_v57 }
 0x2f4   :  { %4151 = vmatmul.mubr.msk.bf16.vlgmr.msra.gmra.mrb[0].mxu1 %vm183_vm2, %v5742_v26  ;;  %v6352_v26 = vld [vmem:[#allocation23_spill] sm:$0xff] }
 0x2f5   :  { %4167 = vmatpush3.bf16.msra.mxu1 %v3074_v12  ;;  %4154 = vmatprep.mubr.msk.bf16.mxu1 %vm183_vm2, %v6350_v6 }
 0x2f6   :  { %4475 = vmatprep.subr.msk.bf16.mxu1 %vm208_vm0, %v3705_v49 }
 0x2fc   :  { %4155 = vmatmul.mubr.msk.bf16.gmra.mrb[4].mxu1 %vm183_vm2, %v2937_v27 }
 0x2fd   :  { %4158 = vmatprep.mubr.msk.bf16.mxu1 %vm183_vm2, %v5798_v11  ;;  %v3210_v11 = vsel %vm208_vm0, %v3705_v49, 0 }
 0x304   :  { %4159 = vmatmul.mubr.msk.bf16.gmra.mrb[8].mxu1 %vm183_vm2, %v5802_v53  ;;  %v6355_v53 = vld [vmem:[#allocation12_spill] sm:$0xff] }
 0x305   :  { %4162 = vmatprep.mubr.msk.bf16.mxu1 %vm183_vm2, %v5814_v43  ;;  %v3063_v43 = vpack.c.bf16 %v5561_v18, %v5651_v46  ;;  %v6358_v18 = vld [vmem:[#allocation21_spill] sm:$0xff] }
 0x306   :  { %v6359_v46 = vpack.c.bf16 %v6358_v18, %v5697_v54 }
 0x30c   :  { %4163 = vmatmul.mubr.msk.bf16.gmra.mrb[12].mxu1 %vm183_vm2, %v2938_v15 }
 0x30d   :  { %4168 = vmatprep.mubr.msk.bf16.mxu1 %vm183_vm2, %v6352_v26 }
 0x314   :  { %4169 = vmatmul.mubr.msk.bf16.vlgmr.msra.gmra.mrb[0].mxu1 %vm183_vm2, %v6353_v40 }
 0x315   :  { %4185 = vmatpush3.bf16.msra.mxu1 %v3210_v11  ;;  %4172 = vmatprep.mubr.msk.bf16.mxu1 %vm183_vm2, %v6354_v36 }
 0x31c   :  { %4173 = vmatmul.mubr.msk.bf16.gmra.mrb[4].mxu1 %vm183_vm2, %v3063_v43 }
 0x31d   :  { %4176 = vmatprep.mubr.msk.bf16.mxu1 %vm183_vm2, %v6355_v53 }
 0x324   :  { %4177 = vmatmul.mubr.msk.bf16.gmra.mrb[8].mxu1 %vm183_vm2, %v6356_v31 }
 0x325   :  { %4180 = vmatprep.mubr.msk.bf16.mxu1 %vm183_vm2, %v6357_v10 }
 0x32c   :  { %4181 = vmatmul.mubr.msk.bf16.gmra.mrb[12].mxu1 %vm183_vm2, %v3064_v13 }
 0x32d   :  { %4186 = vmatprep.mubr.msk.bf16.mxu1 %vm183_vm2, %v5822_v3  ;;  %v6362_v3 = vld [vmem:[#allocation27_spill] sm:$0xff] }
 0x334   :  { %4187 = vmatmul.mubr.msk.bf16.vlgmr.msra.gmra.mrb[0].mxu1 %vm183_vm2, %v5827_v41  ;;  %v6363_v41 = vpack.c.bf16 %v6362_v3, %v5750_v56 }
 0x335   :  { %4190 = vmatprep.mubr.msk.bf16.mxu1 %vm183_vm2, %v5841_v5 }
 0x33c   :  { %4191 = vmatmul.mubr.msk.bf16.gmra.mrb[4].mxu1 %vm183_vm2, %v6359_v46 }
 0x33d   :  { %4194 = vmatprep.mubr.msk.bf16.mxu1 %vm183_vm2, %v6360_v37 }
 0x344   :  { %4195 = vmatmul.mubr.msk.bf16.gmra.mrb[8].mxu1 %vm183_vm2, %v6361_v55 }
 0x345   :  { %4198 = vmatprep.mubr.msk.bf16.mxu1 %vm183_vm2, %v5861_v0 }
 0x34c   :  { %4199 = vmatmul.mubr.msk.bf16.gmra.mrb[12].mxu1 %vm183_vm2, %v6363_v41 }
 0x407   :  { %v6028_v5 = vpop.f32.mrb[0].mxu1 }
 0x408   :  { %v6030_v44 = vpop.f32.mrb[1].mxu1  ;;  %v3366_v47 = vmul.f32 %v6028_v5, %v6028_v5  ;;  %v3330_v33 = vsel %vm183_vm2, %v6028_v5, 0.0 }
 0x409   :  { %v3364_v54 = vmul.f32 %v6030_v44, %v6030_v44  ;;  %v6034_v63 = vpop.f32.mrb[2].mxu1  ;;  %v3327_v0 = vsel %vm183_vm2, %v6030_v44, 0.0 }
 0x40a   :  { %v6036_v32 = vpop.f32.mrb[3].mxu1  ;;  %v3367_v51 = vmul.f32 %v6034_v63, %v6034_v63  ;;  %v3383_v14 = vsel %vm183_vm2, %v3366_v47, 0.0  ;;  %v3332_v61 = vsel %vm183_vm2, %v6034_v63, 0.0 }
 0x40b   :  { %v3328_v56 = vsel %vm183_vm2, %v6036_v32, 0.0  ;;  %v3365_v29 = vmul.f32 %v6036_v32, %v6036_v32  ;;  %v3380_v34 = vsel %vm183_vm2, %v3364_v54, 0.0 }
 0x40c   :  { %v3329_v42 = vadd.f32 %v3328_v56, %v3327_v0  ;;  %v3385_v28 = vsel %vm183_vm2, %v3367_v51, 0.0 }
 0x40d   :  { %v3381_v57 = vsel %vm183_vm2, %v3365_v29, 0.0 }
 0x40e   :  { %v3331_v48 = vadd.f32 %v3330_v33, %v3329_v42  ;;  %v3382_v4 = vadd.f32 %v3381_v57, %v3380_v34 }
 0x40f   :  { %v6055_v45 = vpop.f32.mrb[4].mxu1 }
 0x410   :  { %v3384_v62 = vadd.f32 %v3383_v14, %v3382_v4  ;;  %v6057_v17 = vpop.f32.mrb[5].mxu1  ;;  %v3333_v19 = vadd.f32 %v3332_v61, %v3331_v48  ;;  %v3370_v8 = vmul.f32 %v6055_v45, %v6055_v45  ;;  %v3338_v16 = vsel %vm183_vm2, %v6055_v45, 0.0 }
 0x411   :  { %v3334_v25 = vsel %vm183_vm2, %v6057_v17, 0.0  ;;  %v3368_v50 = vmul.f32 %v6057_v17, %v6057_v17  ;;  %v6064_v2 = vpop.f32.mrb[6].mxu1 }
 0x412   :  { %v3335_v7 = vadd.f32 %v3334_v25, %v3333_v19  ;;  %v3386_v21 = vadd.f32 %v3385_v28, %v3384_v62  ;;  %v6066_v59 = vpop.f32.mrb[7].mxu1  ;;  %v3371_v12 = vmul.f32 %v6064_v2, %v6064_v2  ;;  %v3391_v6 = vsel %vm183_vm2, %v3370_v8, 0.0 }
 0x413   :  { %v3387_v20 = vsel %vm183_vm2, %v3368_v50, 0.0  ;;  %v3336_v30 = vsel %vm183_vm2, %v6066_v59, 0.0  ;;  %v3369_v52 = vmul.f32 %v6066_v59, %v6066_v59  ;;  %v3340_v1 = vsel %vm183_vm2, %v6064_v2, 0.0 }
 0x414   :  { %v3388_v24 = vadd.f32 %v3387_v20, %v3386_v21  ;;  %v3337_v22 = vadd.f32 %v3336_v30, %v3335_v7  ;;  %v3393_v58 = vsel %vm183_vm2, %v3371_v12, 0.0 }
 0x415   :  { %v3389_v35 = vsel %vm183_vm2, %v3369_v52, 0.0 }
 0x416   :  { %v3339_v38 = vadd.f32 %v3338_v16, %v3337_v22  ;;  %v3390_v49 = vadd.f32 %v3389_v35, %v3388_v24 }
 0x417   :  { %v6083_v27 = vpop.f32.mrb[8].mxu1 }
 0x418   :  { %v3392_v9 = vadd.f32 %v3391_v6, %v3390_v49  ;;  %v6085_v23 = vpop.f32.mrb[9].mxu1  ;;  %v3341_v60 = vadd.f32 %v3340_v1, %v3339_v38  ;;  %v3374_v43 = vmul.f32 %v6083_v27, %v6083_v27  ;;  %v3346_v46 = vsel %vm183_vm2, %v6083_v27, 0.0 }
 0x419   :  { %v3342_v39 = vsel %vm183_vm2, %v6085_v23, 0.0  ;;  %v3372_v15 = vmul.f32 %v6085_v23, %v6085_v23  ;;  %v6092_v26 = vpop.f32.mrb[10].mxu1 }
 0x41a   :  { %v3343_v11 = vadd.f32 %v3342_v39, %v3341_v60  ;;  %v3394_v40 = vadd.f32 %v3393_v58, %v3392_v9  ;;  %v6094_v36 = vpop.f32.mrb[11].mxu1  ;;  %v3375_v37 = vmul.f32 %v6092_v26, %v6092_v26  ;;  %v3399_v54 = vsel %vm183_vm2, %v3374_v43, 0.0 }
 0x41b   :  { %v3395_v53 = vsel %vm183_vm2, %v3372_v15, 0.0  ;;  %v3344_v31 = vsel %vm183_vm2, %v6094_v36, 0.0  ;;  %v3373_v10 = vmul.f32 %v6094_v36, %v6094_v36  ;;  %v3348_v47 = vsel %vm183_vm2, %v6092_v26, 0.0 }
 0x41c   :  { %v3396_v13 = vadd.f32 %v3395_v53, %v3394_v40  ;;  %v3345_v18 = vadd.f32 %v3344_v31, %v3343_v11  ;;  %v3401_v33 = vsel %vm183_vm2, %v3375_v37, 0.0 }
 0x41d   :  { %v3397_v55 = vsel %vm183_vm2, %v3373_v10, 0.0 }
 0x41e   :  { %v3347_v3 = vadd.f32 %v3346_v46, %v3345_v18  ;;  %v3398_v41 = vadd.f32 %v3397_v55, %v3396_v13 }
 0x41f   :  { %v6111_v0 = vpop.f32.mrb[12].mxu1 }
 0x420   :  { %v3400_v56 = vadd.f32 %v3399_v54, %v3398_v41  ;;  %v6113_v29 = vpop.f32.mrb[13].mxu1  ;;  %v3349_v42 = vadd.f32 %v3348_v47, %v3347_v3  ;;  %v3378_v61 = vmul.f32 %v6111_v0, %v6111_v0  ;;  %v3354_v7 = vsel %vm183_vm2, %v6111_v0, 0.0 }
 0x421   :  { %v3350_v34 = vsel %vm183_vm2, %v6113_v29, 0.0  ;;  %v3376_v51 = vmul.f32 %v6113_v29, %v6113_v29  ;;  %v6120_v57 = vpop.f32.mrb[14].mxu1 }
 0x422   :  { %v3351_v48 = vadd.f32 %v3350_v34, %v3349_v42  ;;  %v3402_v4 = vadd.f32 %v3401_v33, %v3400_v56  ;;  %v6122_v14 = vpop.f32.mrb[15].mxu1  ;;  %v3379_v21 = vmul.f32 %v6120_v57, %v6120_v57  ;;  %v3407_v52 = vsel %vm183_vm2, %v3378_v61, 0.0 }
 0x423   :  { %v3403_v62 = vsel %vm183_vm2, %v3376_v51, 0.0  ;;  %v3352_v19 = vsel %vm183_vm2, %v6122_v14, 0.0  ;;  %v3377_v28 = vmul.f32 %v6122_v14, %v6122_v14  ;;  %v3356_v24 = vsel %vm183_vm2, %v6120_v57, 0.0 }
 0x424   :  { %v3404_v25 = vadd.f32 %v3403_v62, %v3402_v4  ;;  %v3353_v50 = vadd.f32 %v3352_v19, %v3351_v48  ;;  %v3409_v12 = vsel %vm183_vm2, %v3379_v21, 0.0 }
 0x425   :  { %v3405_v8 = vsel %vm183_vm2, %v3377_v28, 0.0 }
 0x426   :  { %v3355_v20 = vadd.f32 %v3354_v7, %v3353_v50  ;;  %v3406_v30 = vadd.f32 %v3405_v8, %v3404_v25 }
 0x428   :  { %v3357_v22 = vadd.f32 %v3356_v24, %v3355_v20  ;;  %v3408_v16 = vadd.f32 %v3407_v52, %v3406_v30  ;;  %v3715_v20 = vld [vmem:[%s6248_s6] ss:$0 sm:$0xff] }
 0x42a   :  { %v3358_v35 = vrot.slane %v3357_v22, 4  ;;  %v3410_v38 = vadd.f32 %v3409_v12, %v3408_v16 }
 0x42c   :  { %v3359_v49 = vadd.f32 %v3358_v35, %v3357_v22  ;;  %v3411_v6 = vrot.slane %v3410_v38, 4 }
 0x42e   :  { %v3360_v1 = vrot.slane %v3359_v49, 2  ;;  %v3412_v9 = vadd.f32 %v3411_v6, %v3410_v38 }
 0x430   :  { %v3361_v60 = vadd.f32 %v3360_v1, %v3359_v49  ;;  %v3413_v58 = vrot.slane %v3412_v9, 2 }
 0x432   :  { %v3362_v39 = vrot.slane %v3361_v60, 1  ;;  %v3414_v15 = vadd.f32 %v3413_v58, %v3412_v9 }
 0x434   :  { %v3363_v11 = vadd.f32 %v3362_v39, %v3361_v60  ;;  %v3415_v40 = vrot.slane %v3414_v15, 1 }
 0x436   :  { %v3416_v43 = vadd.f32 %v3415_v40, %v3414_v15  ;;  %v3417_v53 = vmul.f32 0.0078125, %v3363_v11 }
 0x438   :  { %v3418_v31 = vmul.f32 0.0078125, %v3416_v43  ;;  %v3419_v10 = vmul.f32 %v3417_v53, %v3417_v53  ;;  %v3422_v13 = vsub.f32 %v6030_v44, %v3417_v53  ;;  %v3423_v18 = vsub.f32 %v6036_v32, %v3417_v53 }
 0x439   :  { %v3424_v46 = vsub.f32 %v6028_v5, %v3417_v53  ;;  %v3425_v37 = vsub.f32 %v6034_v63, %v3417_v53  ;;  %v3426_v55 = vsub.f32 %v6057_v17, %v3417_v53  ;;  %v3427_v3 = vsub.f32 %v6066_v59, %v3417_v53 }
 0x43a   :  { %v3420_v41 = vsub.f32 %v3418_v31, %v3419_v10  ;;  %v3428_v54 = vsub.f32 %v6055_v45, %v3417_v53  ;;  %v3429_v47 = vsub.f32 %v6064_v2, %v3417_v53  ;;  %v3430_v56 = vsub.f32 %v6085_v23, %v3417_v53 }
 0x43b   :  { %v3431_v42 = vsub.f32 %v6094_v36, %v3417_v53  ;;  %v3432_v44 = vsub.f32 %v6083_v27, %v3417_v53  ;;  %v3433_v32 = vsub.f32 %v6092_v26, %v3417_v53  ;;  %v3434_v5 = vsub.f32 %v6113_v29, %v3417_v53  ;;  %v3714_v27 = vld [vmem:[%s6247_s5] ss:$0 sm:$0xff] }
 0x43c   :  { %v3421_v63 = vmax.f32 %v3420_v41, 0.0  ;;  %v3435_v17 = vsub.f32 %v6122_v14, %v3417_v53  ;;  %v3436_v59 = vsub.f32 %v6111_v0, %v3417_v53  ;;  %v3437_v33 = vsub.f32 %v6120_v57, %v3417_v53  ;;  %v6364_v41 = vld [vmem:[#allocation3_spill] sm:$0xff] }
 0x43e   :  { %v3438_v45 = vadd.f32 1e-05, %v3421_v63  ;;  %v6368_v63 = vld [vmem:[#allocation8_spill] sm:$0xff] }
 0x440   :  { %4479 = vrsqrt.f32 %v3438_v45  ;;  %v6370_v45 = vld [vmem:[#allocation11_spill] sm:$0xff] }
 0x44a   :  { %v4480_v2 = vpop.eup %4479 }
 0x44b   :  { %v3440_v34 = vmul.f32 %v4480_v2, %v3422_v13  ;;  %v3441_v23 = vmul.f32 %v4480_v2, %v3423_v18  ;;  %v3442_v51 = vmul.f32 %v4480_v2, %v3424_v46  ;;  %v3443_v36 = vmul.f32 %v4480_v2, %v3425_v37 }
 0x44c   :  { %v3444_v26 = vmul.f32 %v4480_v2, %v3426_v55  ;;  %v3445_v29 = vmul.f32 %v4480_v2, %v3427_v3  ;;  %v3446_v48 = vmul.f32 %v4480_v2, %v3428_v54  ;;  %v3447_v4 = vmul.f32 %v4480_v2, %v3429_v47  ;;  %v6365_v47 = vld [vmem:[#allocation4_spill] sm:$0xff] }
 0x44d   :  { %v3448_v14 = vmul.f32 %v4480_v2, %v3430_v56  ;;  %v3449_v61 = vmul.f32 %v4480_v2, %v3431_v42  ;;  %v3450_v0 = vmul.f32 %v4480_v2, %v3432_v44  ;;  %v3451_v62 = vmul.f32 %v4480_v2, %v3433_v32  ;;  %v6366_v42 = vld [vmem:[#allocation5_spill] sm:$0xff]  ;;  %v6367_v32 = vld [vmem:[#allocation7_spill] sm:$0xff] }
 0x44e   :  { %v3452_v57 = vmul.f32 %v4480_v2, %v3434_v5  ;;  %v3453_v19 = vmul.f32 %v4480_v2, %v3435_v17  ;;  %v3454_v28 = vmul.f32 %v4480_v2, %v3436_v59  ;;  %v3455_v25 = vmul.f32 %v4480_v2, %v3437_v33  ;;  %v6369_v59 = vld [vmem:[#allocation9_spill] sm:$0xff] }
 0x44f   :  { %v3462_v50 = vmul.f32 %v3714_v27, %v3440_v34  ;;  %v3463_v7 = vmul.f32 %v3714_v27, %v3441_v23  ;;  %v3464_v21 = vmul.f32 %v3714_v27, %v3442_v51  ;;  %v3465_v8 = vmul.f32 %v3714_v27, %v3443_v36  ;;  %v6371_v34 = vld [vmem:[#allocation24_spill] sm:$0xff]  ;;  %v6372_v51 = vld [vmem:[#allocation13_spill] sm:$0xff] }
 0x450   :  { %v3466_v30 = vmul.f32 %v3714_v27, %v3444_v26  ;;  %v3467_v52 = vmul.f32 %v3714_v27, %v3445_v29  ;;  %v3468_v24 = vmul.f32 %v3714_v27, %v3446_v48  ;;  %v3469_v22 = vmul.f32 %v3714_v27, %v3447_v4  ;;  %v6374_v29 = vld [vmem:[#allocation15_spill] sm:$0xff]  ;;  %v6375_v4 = vld [vmem:[#allocation16_spill] sm:$0xff] }
 0x451   :  { %v3470_v16 = vmul.f32 %v3714_v27, %v3448_v14  ;;  %v3471_v12 = vmul.f32 %v3714_v27, %v3449_v61  ;;  %v3472_v35 = vmul.f32 %v3714_v27, %v3450_v0  ;;  %v3473_v38 = vmul.f32 %v3714_v27, %v3451_v62  ;;  %v6376_v61 = vld [vmem:[#allocation17_spill] sm:$0xff]  ;;  %v6377_v62 = vld [vmem:[#allocation19_spill] sm:$0xff] }
 0x452   :  { %v3474_v49 = vmul.f32 %v3714_v27, %v3452_v57  ;;  %v3475_v6 = vmul.f32 %v3714_v27, %v3453_v19  ;;  %v3476_v1 = vmul.f32 %v3714_v27, %v3454_v28  ;;  %v3477_v9 = vmul.f32 %v3714_v27, %v3455_v25  ;;  %v6373_v27 = vld [vmem:[#allocation14_spill] sm:$0xff]  ;;  %v6378_v19 = vld [vmem:[#allocation20_spill] sm:$0xff]  ;;  %v6379_v25 = vld [vmem:[#allocation25_spill] sm:$0xff] }
 0x453   :  { %v3484_v60 = vadd.f32 %v3715_v20, %v3462_v50  ;;  %v3485_v58 = vadd.f32 %v3715_v20, %v3463_v7  ;;  %v3486_v39 = vadd.f32 %v3715_v20, %v3464_v21  ;;  %v3487_v15 = vadd.f32 %v3715_v20, %v3465_v8 }
 0x454   :  { %v3488_v11 = vadd.f32 %v3715_v20, %v3466_v30  ;;  %v3489_v40 = vadd.f32 %v3715_v20, %v3467_v52  ;;  %v3490_v43 = vadd.f32 %v3715_v20, %v3468_v24  ;;  %v3491_v53 = vadd.f32 %v3715_v20, %v3469_v22 }
 0x455   :  { %v3492_v31 = vadd.f32 %v3715_v20, %v3470_v16  ;;  %v3493_v10 = vadd.f32 %v3715_v20, %v3471_v12  ;;  %v3494_v13 = vadd.f32 %v3715_v20, %v3472_v35  ;;  %v3495_v18 = vadd.f32 %v3715_v20, %v3473_v38 }
 0x456   :  { %v3496_v46 = vadd.f32 %v3715_v20, %v3474_v49  ;;  %v3497_v37 = vadd.f32 %v3715_v20, %v3475_v6  ;;  %v3498_v55 = vadd.f32 %v3715_v20, %v3476_v1  ;;  %v3499_v3 = vadd.f32 %v3715_v20, %v3477_v9 }
 0x457   :  { %v3500_v54 = vadd.f32 %v3484_v60, %v6364_v41  ;;  %v3501_v56 = vadd.f32 %v3485_v58, %v6365_v47  ;;  %v3502_v44 = vadd.f32 %v3486_v39, %v6366_v42  ;;  %v3503_v5 = vadd.f32 %v3487_v15, %v6367_v32 }
 0x458   :  { %v3504_v17 = vadd.f32 %v3488_v11, %v6368_v63  ;;  %v3505_v33 = vadd.f32 %v3489_v40, %v6369_v59  ;;  %v3506_v2 = vadd.f32 %v3490_v43, %v6370_v45  ;;  %v3507_v23 = vadd.f32 %v3491_v53, %v6371_v34 }
 0x459   :  { %v3508_v36 = vadd.f32 %v3492_v31, %v6372_v51  ;;  %v3509_v26 = vadd.f32 %v3493_v10, %v6373_v27  ;;  %v3510_v48 = vadd.f32 %v3494_v13, %v6374_v29  ;;  %v3511_v14 = vadd.f32 %v3495_v18, %v6375_v4 }
 0x45a   :  { %v3512_v0 = vadd.f32 %v3496_v46, %v6376_v61  ;;  %v3513_v57 = vadd.f32 %v3497_v37, %v6377_v62  ;;  %v3514_v28 = vadd.f32 %v3498_v55, %v6378_v19  ;;  %v3515_v50 = vadd.f32 %v3499_v3, %v6379_v25 }
 0x45b   :  { %v3516_v7 = vmax.f32 %v3500_v54, 0.0  ;;  %v3517_v21 = vmax.f32 %v3501_v56, 0.0  ;;  %v3518_v8 = vmax.f32 %v3502_v44, 0.0  ;;  %v3519_v20 = vmax.f32 %v3503_v5, 0.0 }
 0x45c   :  { %v3520_v30 = vmax.f32 %v3504_v17, 0.0  ;;  %v3521_v52 = vmax.f32 %v3505_v33, 0.0  ;;  %v3522_v24 = vmax.f32 %v3506_v2, 0.0  ;;  %v3523_v22 = vmax.f32 %v3507_v23, 0.0 }
 0x45d   :  { %v3524_v16 = vmax.f32 %v3508_v36, 0.0  ;;  %v3525_v12 = vmax.f32 %v3509_v26, 0.0  ;;  %v3526_v35 = vmax.f32 %v3510_v48, 0.0  ;;  %v3527_v38 = vmax.f32 %v3511_v14, 0.0  ;;  %3532 = vst.msk [vmem:[%s6249_s7] sm:$0xff] %vm183_vm2, %v3516_v7  ;;  %3533 = vst.msk [vmem:[%s6249_s7 + $0x8] sm:$0xff] %vm183_vm2, %v3517_v21 }
 0x45e   :  { %3534 = vst.msk [vmem:[%s6249_s7 + $0x10] sm:$0xff] %vm183_vm2, %v3518_v8  ;;  %3535 = vst.msk [vmem:[%s6249_s7 + $0x18] sm:$0xff] %vm183_vm2, %v3519_v20  ;;  %v3528_v49 = vmax.f32 %v3512_v0, 0.0  ;;  %v3529_v6 = vmax.f32 %v3513_v57, 0.0  ;;  %v3530_v1 = vmax.f32 %v3514_v28, 0.0  ;;  %v3531_v9 = vmax.f32 %v3515_v50, 0.0 }
 0x45f   :  { %3536 = vst.msk [vmem:[%s6249_s7 + $0x20] sm:$0xff] %vm183_vm2, %v3520_v30  ;;  %3537 = vst.msk [vmem:[%s6249_s7 + $0x28] sm:$0xff] %vm183_vm2, %v3521_v52 }
 0x460   :  { %3538 = vst.msk [vmem:[%s6249_s7 + $0x30] sm:$0xff] %vm183_vm2, %v3522_v24  ;;  %3539 = vst.msk [vmem:[%s6249_s7 + $0x38] sm:$0xff] %vm183_vm2, %v3523_v22 }
 0x461   :  { %3540 = vst.msk [vmem:[%s6249_s7 + $0x40] sm:$0xff] %vm183_vm2, %v3524_v16  ;;  %3541 = vst.msk [vmem:[%s6249_s7 + $0x48] sm:$0xff] %vm183_vm2, %v3525_v12 }
 0x462   :  { %3542 = vst.msk [vmem:[%s6249_s7 + $0x50] sm:$0xff] %vm183_vm2, %v3526_v35  ;;  %3543 = vst.msk [vmem:[%s6249_s7 + $0x58] sm:$0xff] %vm183_vm2, %v3527_v38 }
 0x463   :  { %3544 = vst.msk [vmem:[%s6249_s7 + $0x60] sm:$0xff] %vm183_vm2, %v3528_v49  ;;  %3545 = vst.msk [vmem:[%s6249_s7 + $0x68] sm:$0xff] %vm183_vm2, %v3529_v6 }
 0x464   :  { %3546 = vst.msk [vmem:[%s6249_s7 + $0x70] sm:$0xff] %vm183_vm2, %v3530_v1  ;;  %3547 = vst.msk [vmem:[%s6249_s7 + $0x78] sm:$0xff] %vm183_vm2, %v3531_v9 }

// kernel: resnet_forward.7
= control target key start
LH: loop header
LB: loop body
LE: loop exit
PB: predicated region body
PF: predicated region fallthrough
CT: control target
= control target key end

     0   :  { %vm69_vm0 = vcmask 293888   ;;  %vm76_vm1 = vcmask 1041408   ;;  %s801_s0 = inlined_call_operand.vmem [shape: f32[32,36], index: 0, kind: input, shape index: {}]   ;;  %s802_s1 = inlined_call_operand.vmem [shape: bf16[36,4], index: 1, kind: input, shape index: {}]   ;;  %s803_s2 = inlined_call_operand.vmem [shape: f32[1,4], index: 2, kind: input, shape index: {}]   ;;  %s804_s3 = inlined_call_operand.vmem [shape: f32[1,4], index: 3, kind: input, shape index: {}]   ;;  %s805_s4 = inlined_call_operand.vmem [shape: bf16[4,16], index: 4, kind: input, shape index: {}]   ;;  %s806_s5 = inlined_call_operand.vmem [shape: f32[1,16], index: 5, kind: input, shape index: {}]   ;;  %s807_s6 = inlined_call_operand.vmem [shape: f32[1,16], index: 6, kind: input, shape index: {}]   ;;  %s808_s7 = inlined_call_operand.vmem [shape: f32[32,8], index: 7, kind: input, shape index: {}]   ;;  %s809_s8 = inlined_call_operand.vmem [shape: bf16[8,16], index: 8, kind: input, shape index: {}]   ;;  %s810_s9 = inlined_call_operand.vmem [shape: bf16[2,32], index: 9, kind: input, shape index: {}]   ;;  %s811_s10 = inlined_call_operand.vmem [shape: bf16[16,10], index: 10, kind: input, shape index: {}]   ;;  %s812_s11 = inlined_call_operand.vmem [shape: f32[1,10], index: 11, kind: input, shape index: {}]   ;;  %s813_s12 = inlined_call_operand.hbm [shape: f32[2,10], index: 12, kind: output, shape index: {}]  }
   0x1   :  { %v602_v0 = vld [vmem:[%s802_s1] sm:$0xff]   ;;  %v603_v1 = vld [vmem:[%s802_s1 + $0x8] sm:$0xff]   ;;  %v604_v3 = vld [vmem:[%s802_s1 + $0x10] ss:$0 sps:$4 sm:$0x33]  }
   0x2   :  { %560 = vmatprep.subr.bf16.mxu0 %v602_v0  ;;  %v43_v2 = vld [vmem:[%s801_s0] sm:$0xff]  ;;  %v44_v4 = vld [vmem:[%s801_s0 + $0x8] sm:$0xff] }
   0x3   :  { %561 = vmatpush3.bf16.msra.mxu0 %v602_v0  ;;  %v47_v5 = vpack.c.bf16 %v44_v4, %v43_v2 }
   0x4   :  { %562 = vmatprep.subr.bf16.mxu0 %v603_v1 }
   0x5   :  { %17 = vsyncpa [#allocation3], 0  ;;  %566 = vmatprep.mubr.msk.bf16.mxu0 %vm69_vm0, %v47_v5  ;;  %v45_v6 = vld [vmem:[%s801_s0 + $0x10] sm:$0xff]  ;;  %v46_v7 = vld [vmem:[%s801_s0 + $0x18] sm:$0xff]  ;;  %v78_v8 = vsel %vm76_vm1, %v604_v3, 0  ;;  %vm276_vm2 = vcmask 1043456  }
   0x6   :  { %v48_v9 = vpack.c.bf16 %v46_v7, %v45_v6  ;;  %v203_v10 = vld [vmem:[%s805_s4] sm:$0x3]  ;;  %vm131_vm3 = vcmask 31744   ;;  %vm269_vm4 = vcmask 64512   ;;  %vm635_vm5 = vmmov 0   ;;  %s636_s15 = smov [#allocation2]  }
   0x7   :  { %563 = vmatpush3.bf16.msra.mxu0 %v603_v1  ;;  %597 = vmatprep.subr.msk.bf16.mxu1 %vm76_vm1, %v203_v10  ;;  %v211_v11 = vsel %vm76_vm1, %v203_v10, 0  ;;  %v268_v12 = vld [vmem:[%s809_s8] sm:$0xf]  ;;  %v263_v10 = vld [vmem:[%s808_s7 + $0x8] sm:$0xff]  ;;  %vm331_vm6 = vcmask 130048   ;;  %vm408_vm7 = vcmask 261120  }
   0x8   :  { %596 = vmatprep.subr.msk.bf16.mxu0 %vm76_vm1, %v604_v3  ;;  %571 = vmatpush3.bf16.msra.mxu1 %v211_v11  ;;  %v729_v13 = vsel %vm276_vm2, %v268_v12, 0  ;;  %v532_v59 = vld [vmem:[%s803_s2] ss:$0 sm:$0xff]  ;;  %s519_s16 = sshll.u32 %s636_s15, 4  ;;  %vm511_vm8 = vcmask 74752   ;;  %s520_s16 = int_to_ptr.vmem [resolvable:$true] %s519_s16 }
   0x9   :  { %598 = vmatprep.subr.msk.bf16.mxu1 %vm276_vm2, %v268_v12  ;;  %v533_v0 = vld [vmem:[%s804_s3] ss:$0 sm:$0xff]  ;;  %p615_p1 = scmp.lt.s32.totalorder %s520_s16, %s520_s16 }
   0xb   :  { %565 = vmatpush3.bf16.msra.mxu0 %v78_v8 }
   0xe   :  { %567 = vmatmul.mubr.msk.bf16.vlgmr.msra.gmra.mrb[0].mxu0 %vm69_vm0, %v48_v9  ;;  %v262_v9 = vld [vmem:[%s808_s7] sm:$0xff] }
  0xe1   :  { %v568_v14 = vpop.f32.mrb[0].mxu0 }
  0xe2   :  { %v114_v15 = vpop.f32.mrb[1].mxu0  ;;  %v147_v19 = vmul.f32 %v568_v14, %v568_v14  ;;  %v135_v24 = vsel %vm131_vm3, %v568_v14, 0.0 }
  0xe3   :  { %v145_v16 = vmul.f32 %v114_v15, %v114_v15  ;;  %v569_v17 = vpop.f32.mrb[2].mxu0  ;;  %v132_v20 = vsel %vm131_vm3, %v114_v15, 0.0 }
  0xe4   :  { %v117_v18 = vpop.f32.mrb[3].mxu0  ;;  %v148_v26 = vmul.f32 %v569_v17, %v569_v17  ;;  %v152_v30 = vsel %vm131_vm3, %v147_v19, 0.0  ;;  %v137_v31 = vsel %vm131_vm3, %v569_v17, 0.0  ;;  %v264_v19 = vld [vmem:[%s808_s7 + $0x10] sm:$0xff] }
  0xe5   :  { %v133_v21 = vsel %vm131_vm3, %v117_v18, 0.0  ;;  %v146_v22 = vmul.f32 %v117_v18, %v117_v18  ;;  %v149_v25 = vsel %vm131_vm3, %v145_v16, 0.0 }
  0xe6   :  { %v134_v23 = vadd.f32 %v133_v21, %v132_v20  ;;  %v154_v34 = vsel %vm131_vm3, %v148_v26, 0.0  ;;  %v265_v20 = vld [vmem:[%s808_s7 + $0x18] sm:$0xff] }
  0xe7   :  { %v150_v27 = vsel %vm131_vm3, %v146_v22, 0.0  ;;  %v267_v21 = vpack.c.bf16 %v265_v20, %v264_v19  ;;  %v634_v22 = vmov 0.0  }
  0xe8   :  { %v136_v28 = vadd.f32 %v135_v24, %v134_v23  ;;  %v151_v29 = vadd.f32 %v150_v27, %v149_v25  ;;  %582 = vmatprep.subr.bf16.mxu0 %v634_v22  ;;  %586 = vmatprep.mubr.msk.bf16.mxu0 %vm635_vm5, %v634_v22 }
  0xea   :  { %v138_v32 = vadd.f32 %v137_v31, %v136_v28  ;;  %v153_v33 = vadd.f32 %v152_v30, %v151_v29 }
  0xec   :  { %v139_v35 = vrot.slane %v138_v32, 4  ;;  %v155_v36 = vadd.f32 %v154_v34, %v153_v33 }
  0xee   :  { %v140_v37 = vadd.f32 %v139_v35, %v138_v32  ;;  %v156_v38 = vrot.slane %v155_v36, 4 }
  0xf0   :  { %v141_v39 = vrot.slane %v140_v37, 2  ;;  %v157_v40 = vadd.f32 %v156_v38, %v155_v36 }
  0xf2   :  { %v142_v41 = vadd.f32 %v141_v39, %v140_v37  ;;  %v158_v42 = vrot.slane %v157_v40, 2 }
  0xf4   :  { %v143_v43 = vrot.slane %v142_v41, 1  ;;  %v159_v44 = vadd.f32 %v158_v42, %v157_v40 }
  0xf6   :  { %v144_v45 = vadd.f32 %v143_v43, %v142_v41  ;;  %v160_v46 = vrot.slane %v159_v44, 1 }
  0xf8   :  { %v161_v47 = vadd.f32 %v160_v46, %v159_v44  ;;  %v162_v48 = vmul.f32 0.03125, %v144_v45 }
  0xfa   :  { %v163_v49 = vmul.f32 0.03125, %v161_v47  ;;  %v164_v50 = vmul.f32 %v162_v48, %v162_v48  ;;  %v168_v51 = vsub.f32 %v117_v18, %v162_v48  ;;  %v167_v52 = vsub.f32 %v114_v15, %v162_v48 }
  0xfb   :  { %v169_v53 = vsub.f32 %v568_v14, %v162_v48  ;;  %v170_v54 = vsub.f32 %v569_v17, %v162_v48  ;;  %v266_v18 = vpack.c.bf16 %v263_v10, %v262_v9 }
  0xfc   :  { %v165_v55 = vsub.f32 %v163_v49, %v164_v50 }
  0xfe   :  { %v166_v56 = vmax.f32 %v165_v55, 0.0 }
 0x100   :  { %v171_v57 = vadd.f32 1e-05, %v166_v56 }
 0x102   :  { %606 = vrsqrt.f32 %v171_v57 }
 0x10c   :  { %v607_v58 = vpop.eup %606 }
 0x10d   :  { %v174_v60 = vmul.f32 %v607_v58, %v168_v51  ;;  %v173_v61 = vmul.f32 %v607_v58, %v167_v52  ;;  %v175_v62 = vmul.f32 %v607_v58, %v169_v53  ;;  %v176_v63 = vmul.f32 %v607_v58, %v170_v54 }
 0x10f   :  { %v183_v1 = vmul.f32 %v532_v59, %v173_v61  ;;  %v184_v2 = vmul.f32 %v532_v59, %v174_v60  ;;  %v185_v3 = vmul.f32 %v532_v59, %v175_v62  ;;  %v186_v4 = vmul.f32 %v532_v59, %v176_v63 }
 0x111   :  { %v193_v5 = vadd.f32 %v533_v0, %v183_v1  ;;  %v194_v6 = vadd.f32 %v533_v0, %v184_v2  ;;  %v195_v7 = vadd.f32 %v533_v0, %v185_v3  ;;  %v196_v8 = vadd.f32 %v533_v0, %v186_v4 }
 0x113   :  { %v197_v11 = vmax.f32 %v193_v5, 0.0  ;;  %v198_v12 = vmax.f32 %v194_v6, 0.0  ;;  %v199_v14 = vmax.f32 %v195_v7, 0.0  ;;  %v200_v15 = vmax.f32 %v196_v8, 0.0  ;;  %v538_v8 = vld [vmem:[%s806_s5] ss:$0 sm:$0xff] }
 0x115   :  { %v201_v16 = vpack.c.bf16 %v198_v12, %v197_v11  ;;  %v202_v17 = vpack.c.bf16 %v200_v15, %v199_v14  ;;  %v539_v14 = vld [vmem:[%s807_s6] ss:$0 sm:$0xff] }
 0x117   :  { %572 = vmatprep.mubr.msk.bf16.mxu1 %vm131_vm3, %v201_v16 }
 0x118   :  { %573 = vmatmul.mubr.msk.bf16.vlgmr.msra.gmra.mrb[0].mxu1 %vm131_vm3, %v202_v17 }
 0x119   :  { %577 = vmatpush3.bf16.msra.mxu1 %v729_v13  ;;  %578 = vmatprep.mubr.msk.bf16.mxu1 %vm269_vm4, %v266_v18  ;;  %v605_v13 = vld [vmem:[%s811_s10] sm:$0xff]  }
 0x11a   :  { %590 = vmatprep.subr.bf16.mxu1 %v634_v22 }
 0x120   :  { %579 = vmatmul.mubr.msk.bf16.vlgmr.msra.gmra.mrb[4].mxu1 %vm269_vm4, %v267_v21 }
 0x121   :  { %592 = vmatprep.mubr.msk.bf16.mxu1 %vm635_vm5, %v634_v22  ;;  %591 = vmatpush3.bf16.msra.mxu1 %v605_v13 }
 0x1eb   :  { %v574_v23 = vpop.f32.mrb[0].mxu1 }
 0x1ec   :  { %v247_v24 = vpop.f32.mrb[1].mxu1  ;;  %v347_v28 = vmul.f32 %v574_v23, %v574_v23  ;;  %v335_v33 = vsel %vm331_vm6, %v574_v23, 0.0 }
 0x1ed   :  { %v345_v25 = vmul.f32 %v247_v24, %v247_v24  ;;  %v575_v26 = vpop.f32.mrb[2].mxu1  ;;  %v332_v29 = vsel %vm331_vm6, %v247_v24, 0.0 }
 0x1ee   :  { %v250_v27 = vpop.f32.mrb[3].mxu1  ;;  %v348_v35 = vmul.f32 %v575_v26, %v575_v26  ;;  %v352_v39 = vsel %vm331_vm6, %v347_v28, 0.0  ;;  %v337_v40 = vsel %vm331_vm6, %v575_v26, 0.0 }
 0x1ef   :  { %v333_v30 = vsel %vm331_vm6, %v250_v27, 0.0  ;;  %v346_v31 = vmul.f32 %v250_v27, %v250_v27  ;;  %v349_v34 = vsel %vm331_vm6, %v345_v25, 0.0 }
 0x1f0   :  { %v334_v32 = vadd.f32 %v333_v30, %v332_v29  ;;  %v354_v45 = vsel %vm331_vm6, %v348_v35, 0.0 }
 0x1f1   :  { %v350_v36 = vsel %vm331_vm6, %v346_v31, 0.0 }
 0x1f2   :  { %v336_v37 = vadd.f32 %v335_v33, %v334_v32  ;;  %v351_v38 = vadd.f32 %v350_v36, %v349_v34  ;;  %v405_v33 = vld [vmem:[%s810_s9] sm:$0x1]  ;;  %s610_s9 = scalar_lea.vmem %s520_s16, 32 }
 0x1f3   :  { %v580_v41 = vpop.f32.mrb[4].mxu1  ;;  %p611_p0 = scmp.ne.s32.totalorder %s520_s16, %s610_s9  ;;  %p616_p2 = scmp.lt.s32.totalorder %s610_s9, %s610_s9 }
 0x1f4   :  { %v338_v42 = vadd.f32 %v337_v40, %v336_v37  ;;  %v353_v43 = vadd.f32 %v352_v39, %v351_v38  ;;  %v314_v44 = vpop.f32.mrb[5].mxu1  ;;  %v541_v39 = vld [vmem:[%s812_s11] ss:$0 sm:$0xff] }
 0x1f5   :  { %v581_v46 = vpop.f32.mrb[6].mxu1  ;;  %p617_p3 = por %p616_p2, %p615_p1 }
 0x1f6   :  { %v339_v47 = vrot.slane %v338_v42, 4  ;;  %v355_v48 = vadd.f32 %v354_v45, %v353_v43  ;;  %v317_v49 = vpop.f32.mrb[7].mxu1 }
 0x1f7   :  { %p618_p4 = pnand %p617_p3, %p611_p0 }
 0x1f8   :  { %v340_v50 = vadd.f32 %v339_v47, %v338_v42  ;;  %v356_v51 = vrot.slane %v355_v48, 4 }
 0x1fa   :  { %v341_v52 = vrot.slane %v340_v50, 2  ;;  %v357_v53 = vadd.f32 %v356_v51, %v355_v48 }
 0x1fc   :  { %v342_v54 = vadd.f32 %v341_v52, %v340_v50  ;;  %v358_v55 = vrot.slane %v357_v53, 2 }
 0x1fe   :  { %v343_v56 = vrot.slane %v342_v54, 1  ;;  %v359_v57 = vadd.f32 %v358_v55, %v357_v53 }
 0x200   :  { %v344_v58 = vadd.f32 %v343_v56, %v342_v54  ;;  %v360_v59 = vrot.slane %v359_v57, 1 }
 0x202   :  { %v361_v60 = vadd.f32 %v360_v59, %v359_v57  ;;  %v362_v61 = vmul.f32 0.03125, %v344_v58 }
 0x204   :  { %v363_v62 = vmul.f32 0.03125, %v361_v60  ;;  %v364_v63 = vmul.f32 %v362_v61, %v362_v61  ;;  %v368_v0 = vsub.f32 %v250_v27, %v362_v61  ;;  %v369_v1 = vsub.f32 %v574_v23, %v362_v61 }
 0x205   :  { %v367_v2 = vsub.f32 %v247_v24, %v362_v61  ;;  %v370_v3 = vsub.f32 %v575_v26, %v362_v61 }
 0x206   :  { %v365_v4 = vsub.f32 %v363_v62, %v364_v63 }
 0x208   :  { %v366_v5 = vmax.f32 %v365_v4, 0.0 }
 0x20a   :  { %v371_v6 = vadd.f32 1e-05, %v366_v5 }
 0x20c   :  { %608 = vrsqrt.f32 %v371_v6 }
 0x216   :  { %v609_v7 = vpop.eup %608 }
 0x217   :  { %v374_v9 = vmul.f32 %v609_v7, %v368_v0  ;;  %v375_v10 = vmul.f32 %v609_v7, %v369_v1  ;;  %v373_v11 = vmul.f32 %v609_v7, %v367_v2  ;;  %v376_v12 = vmul.f32 %v609_v7, %v370_v3 }
 0x219   :  { %v385_v15 = vmul.f32 %v538_v8, %v375_v10  ;;  %v383_v16 = vmul.f32 %v538_v8, %v373_v11  ;;  %v386_v17 = vmul.f32 %v538_v8, %v376_v12  ;;  %v384_v18 = vmul.f32 %v538_v8, %v374_v9 }
 0x21b   :  { %v395_v19 = vadd.f32 %v539_v14, %v385_v15  ;;  %v393_v20 = vadd.f32 %v539_v14, %v383_v16  ;;  %v396_v21 = vadd.f32 %v539_v14, %v386_v17  ;;  %v394_v13 = vadd.f32 %v539_v14, %v384_v18 }
 0x21d   :  { %v399_v23 = vadd.f32 %v580_v41, %v395_v19  ;;  %v397_v24 = vadd.f32 %v393_v20, %v314_v44  ;;  %v400_v25 = vadd.f32 %v581_v46, %v396_v21  ;;  %v398_v26 = vadd.f32 %v394_v13, %v317_v49 }
 0x21f   :  { %v403_v27 = vmax.f32 %v399_v23, 0.0  ;;  %v401_v28 = vmax.f32 %v397_v24, 0.0  ;;  %v404_v29 = vmax.f32 %v400_v25, 0.0  ;;  %v402_v30 = vmax.f32 %v398_v26, 0.0 }
 0x221   :  { %v407_v31 = vpack.c.bf16 %v404_v29, %v403_v27  ;;  %v406_v32 = vpack.c.bf16 %v402_v30, %v401_v28 }
 0x223   :  { %583 = vmatpush3.bf16.msra.mxu0 %v406_v32 }
 0x224   :  { %584 = vmatprep.subr.bf16.mxu0 %v634_v22 }
 0x227   :  { %585 = vmatpush3.bf16.msra.mxu0 %v407_v31 }
 0x22a   :  { %587 = vmatmul.mubr.msk.bf16.vlgmr.msra.gmra.mrb[4].mxu0 %vm408_vm7, %v405_v33 }
 0x2fd   :  { %v446_v34 = vpop.f32.mrb[4].mxu0 }
 0x2fe   :  { %v452_v35 = vpack.c.bf16 %v446_v34, %v446_v34  ;;  %v588_v36 = vpop.f32.mrb[5].mxu0 }
 0x2ff   :  { %v449_v37 = vpop.f32.mrb[6].mxu0 }
 0x300   :  { %v589_v38 = vpop.f32.mrb[7].mxu0  ;;  %593 = vmatmul.mubr.msk.bf16.vlgmr.msra.gmra.mrb[8].mxu1 %vm331_vm6, %v452_v35 }
 0x3d3   :  { %v505_v22 = vpop.f32.mrb[8].mxu1 }
 0x3d4   :  { %v506_v40 = vadd.f32 %v541_v39, %v505_v22  ;;  %v594_v41 = vpop.f32.mrb[9].mxu1 }
 0x3d5   :  { %v508_v42 = vpop.f32.mrb[10].mxu1 }
 0x3d6   :  { %v595_v43 = vpop.f32.mrb[11].mxu1  ;;  %512 = vst.msk [vmem:[#allocation2] sm:$0x3] %vm511_vm8, %v506_v40 }
 0x3d7   :  { %621 = shalt.err (!%p618_p4)
}
 0x3d8   :  { %s622_s11 = scalar_lea.hbm %s813_s12, 32 }
 0x3d9   :  { %p623_p5 = scmp.ne.s32.totalorder %s813_s12, %s622_s11  ;;  %p626_p6 = scmp.lt.u32.totalorder %s622_s11, %s813_s12 }
 0x3db   :  { %p628_p7 = pnand %p626_p6, %p623_p5 }
 0x3dd   :  { %631 = shalt.err (!%p628_p7)
}
 0x3de   :  { %522 = dma.vmem_to_hbm [thread:$0]  %s520_s16, 32, %s813_s12, [#allocation3]  }
 0x3df   :  { %632 = dma.done.wait [#allocation3], 32  }
 0x3e0   :  { %633 = vsyncadd [#allocation3], 4294967264 }
 0x3e1   :  { %526 = vsyncpa [#allocation3], 1 }

</bundles_post_ra>
